<compile_context>
chip_gen: v7x
topology: tpu7x:2x2x1
jax: 0.10.0
libtpu: 0.0.40
codegen_flags: <defaults>
</compile_context>

<pallas_src>
import jax
import jax.numpy as jnp
from jax import lax
from jax.experimental import pallas as pl
from jax.experimental.pallas import tpu as pltpu


def _round_up(x, m):
    return ((x + m - 1) // m) * m


# PyTorch LSTM gate order is (i, f, g, o); kernel layout is (i, f, o, g) so the three
# sigmoid gates occupy contiguous 128-aligned lane slots.
_GATE_ORDER = (0, 1, 3, 2)


def _pad_gate_cols(a, H, H_pad):
    """(..., 4H) in PyTorch order i,f,g,o -> (..., 4*H_pad) in kernel order i,f,o,g,
    each gate in its own lane-aligned H_pad-wide slot (padding filled with zeros)."""
    lead = a.shape[:-1]
    a4 = a.reshape(*lead, 4, H)
    a4 = jnp.take(a4, jnp.array(_GATE_ORDER), axis=-2)
    pad = [(0, 0)] * (a4.ndim - 1) + [(0, H_pad - H)]
    return jnp.pad(a4, pad).reshape(*lead, 4 * H_pad)


def encoder_forward(x_ids, params, *, t_chunk=None, compute_dtype=jnp.bfloat16):
    """x_ids: (S, B) int32 token ids. Returns (hidden, cell), each (2, B, H) float32.

    compute_dtype is the dtype of the MXU operands (streamed embeddings / weights /
    hidden states fed to the dots). Accumulation, state and activations stay float32.
    """
    emb_table = params["embedding"]            # (V, E)
    S, B = x_ids.shape
    E = emb_table.shape[1]
    H = params["whh0"].shape[1]                # whh0 is (4H, H); hidden dim is axis 1

    H_pad = _round_up(H, 128)                  # lane-dense gates / state
    E_pad = _round_up(E, 128)                  # lane-dense embedding (contraction dim)
    B_pad = _round_up(B, 8)                    # sublane-dense state (f32 min sublane = 8)

    if t_chunk is None:
        cap = min(S, 32)
        # Prefer a divisor of S so the mask path vanishes; fall back to pad+mask.
        t_chunk = max(d for d in range(1, cap + 1) if S % d == 0)
        if t_chunk < min(8, S):                # degenerate divisor (e.g. large prime S)
            t_chunk = cap
    S_pad = _round_up(S, t_chunk)
    n_chunks = S_pad // t_chunk
    needs_mask = (S_pad != S)
    unroll = min(t_chunk, 8)                   # partial unroll: scheduler overlap w/o spills

    G = 4 * H_pad
    W_ROWS = E_pad + 3 * H_pad                 # packed weight rows: wih0 | whh0 | wih1 | whh1

    # ---- glue (wrapper): embedding lookup; nn.Dropout is identity in eval mode ----
    # TODO(synk): training-mode dropout (embedding + inter-layer LSTM dropout) omitted.
    emb = jnp.take(emb_table, x_ids, axis=0).astype(jnp.float32)        # (S, B, E)
    emb_p = jnp.pad(emb, ((0, S_pad - S), (0, B_pad - B), (0, E_pad - E)))
    emb_flat = emb_p.astype(compute_dtype).reshape(S_pad * B_pad, E_pad)  # streamed operand

    # ---- weights: gate-slot padded, packed into ONE matrix (single VMEM copy) ----
    wih0_p = jnp.pad(_pad_gate_cols(params["wih0"].T, H, H_pad), ((0, E_pad - E), (0, 0)))
    whh0_p = jnp.pad(_pad_gate_cols(params["whh0"].T, H, H_pad), ((0, H_pad - H), (0, 0)))
    wih1_p = jnp.pad(_pad_gate_cols(params["wih1"].T, H, H_pad), ((0, H_pad - H), (0, 0)))
    whh1_p = jnp.pad(_pad_gate_cols(params["whh1"].T, H, H_pad), ((0, H_pad - H), (0, 0)))
    w_all = jnp.concatenate([wih0_p, whh0_p, wih1_p, whh1_p], axis=0).astype(compute_dtype)

    b0_p = _pad_gate_cols((params["bih0"] + params["bhh0"])[None, :], H, H_pad)  # (1, G) f32
    b1_p = _pad_gate_cols((params["bih1"] + params["bhh1"])[None, :], H, H_pad)  # (1, G) f32

    def kernel(emb_ref, w_hbm, b0_ref, b1_ref, hid_ref, cell_ref,
               w_scr, pre0_scr, w_sem):
        chunk = pl.program_id(0)

        @pl.when(chunk == 0)
        def _init():
            # One-time weight load into a single (non-double-buffered) VMEM copy.
            cp = pltpu.make_async_copy(w_hbm, w_scr, w_sem)
            cp.start()
            cp.wait()
            hid_ref[...] = jnp.zeros_like(hid_ref)
            cell_ref[...] = jnp.zeros_like(cell_ref)

        # Grid-invariant loads / broadcasts hoisted out of the recurrent loop.
        wih0 = w_scr[0:E_pad, :]
        wr0 = w_scr[E_pad:E_pad + H_pad, :]
        wih1 = w_scr[E_pad + H_pad:E_pad + 2 * H_pad, :]
        whh1 = w_scr[E_pad + 2 * H_pad:E_pad + 3 * H_pad, :]
        b0 = b0_ref[...]                                     # (1, G) f32
        b1 = jnp.broadcast_to(b1_ref[...], (B_pad, G))       # f32, hoisted

        # Layer-0 input projection for the whole chunk: one MXU-dense matmul
        # (M = t_chunk * B_pad), f32 accumulation into VMEM scratch.
        pre0_scr[...] = jnp.dot(emb_ref[...], wih0,
                                preferred_element_type=jnp.float32) + b0

        # State is resident in the output blocks (constant index_map across the grid).
        h0 = hid_ref[0]
        c0 = cell_ref[0]
        h1 = hid_ref[1]
        c1 = cell_ref[1]

        def lstm_act(gates, c_prev):
            # Gate layout [i, f, o | g]: one wide sigmoid (3*H_pad lanes) + one tanh.
            sig = jax.nn.sigmoid(gates[:, 0:3 * H_pad])
            i = sig[:, 0 * H_pad:1 * H_pad]
            f = sig[:, 1 * H_pad:2 * H_pad]
            o = sig[:, 2 * H_pad:3 * H_pad]
            g = jnp.tanh(gates[:, 3 * H_pad:4 * H_pad])
            c_new = f * c_prev + i * g
            h_new = o * jnp.tanh(c_new)
            return h_new, c_new

        def step(t, carry):
            h0, c0, h1, c1 = carry
            off = pl.multiple_of(t * B_pad, B_pad)
            # Layer 0: input projection pre-computed; only the recurrent dot remains.
            gates0 = pre0_scr[pl.ds(off, B_pad), :] + jnp.dot(
                h0.astype(compute_dtype), wr0, preferred_element_type=jnp.float32)
            h0n, c0n = lstm_act(gates0, c0)
            # Layer 1: split dots (no per-step concat / lane relayout).
            gates1 = (jnp.dot(h0n.astype(compute_dtype), wih1,
                              preferred_element_type=jnp.float32)
                      + jnp.dot(h1.astype(compute_dtype), whh1,
                                preferred_element_type=jnp.float32)
                      + b1)
            h1n, c1n = lstm_act(gates1, c1)
            if needs_mask:  # static: only traced when S was padded up to S_pad
                valid = (chunk * t_chunk + t) < S
                h0n = jnp.where(valid, h0n, h0)
                c0n = jnp.where(valid, c0n, c0)
                h1n = jnp.where(valid, h1n, h1)
                c1n = jnp.where(valid, c1n, c1)
            return h0n, c0n, h1n, c1n

        h0, c0, h1, c1 = lax.fori_loop(0, t_chunk, step, (h0, c0, h1, c1),
                                       unroll=unroll)

        hid_ref[0] = h0
        cell_ref[0] = c0
        hid_ref[1] = h1
        cell_ref[1] = c1

    # VMEM budget: streamed emb (double-buffered) + single weight copy + pre0 scratch
    # + biases + resident state, with headroom.
    cd_bytes = jnp.dtype(compute_dtype).itemsize
    vmem_bytes = (
        2 * t_chunk * B_pad * E_pad * cd_bytes          # streamed emb chunk (x2 buffers)
        + W_ROWS * G * cd_bytes                         # single weight copy (scratch)
        + t_chunk * B_pad * G * 4                       # layer-0 pre-activations (f32)
        + 2 * 2 * G * 4                                 # biases
        + 2 * 2 * (2 * B_pad * H_pad * 4)               # hidden/cell output blocks
    )
    vmem_bytes = max(min(int(1.5 * vmem_bytes) + (2 << 20), 100 * 1024 * 1024),
                     4 * 1024 * 1024)

    grid_spec = pltpu.PrefetchScalarGridSpec(
        num_scalar_prefetch=0,
        grid=(n_chunks,),
        in_specs=[
            # t_chunk timesteps of (compute_dtype) embeddings per grid step.
            pl.BlockSpec((t_chunk * B_pad, E_pad), lambda c: (c, 0)),
            # Packed weights stay in HBM; copied once into VMEM scratch (single buffer).
            pl.BlockSpec(memory_space=pl.ANY),
            pl.BlockSpec((1, G), lambda c: (0, 0)),      # layer-0 bias (f32)
            pl.BlockSpec((1, G), lambda c: (0, 0)),      # layer-1 bias (f32)
        ],
        out_specs=[
            pl.BlockSpec((2, B_pad, H_pad), lambda c: (0, 0, 0)),  # hidden (resident)
            pl.BlockSpec((2, B_pad, H_pad), lambda c: (0, 0, 0)),  # cell   (resident)
        ],
        scratch_shapes=[
            pltpu.VMEM((W_ROWS, G), compute_dtype),      # single resident weight copy
            pltpu.VMEM((t_chunk * B_pad, G), jnp.float32),  # layer-0 pre-activations
            pltpu.SemaphoreType.DMA,                     # weight-copy semaphore
        ],
    )

    hid_p, cell_p = pl.pallas_call(
        kernel,
        out_shape=(
            jax.ShapeDtypeStruct((2, B_pad, H_pad), jnp.float32),
            jax.ShapeDtypeStruct((2, B_pad, H_pad), jnp.float32),
        ),
        grid_spec=grid_spec,
        compiler_params=pltpu.CompilerParams(
            # Time is inherently serial. TODO(synk): for B_pad >= 16 add a leading
            # "parallel" batch grid axis so v7x's two TensorCores split the batch.
            dimension_semantics=("arbitrary",),
            vmem_limit_bytes=vmem_bytes,
        ),
    )(emb_flat, w_all, b0_p, b1_p)

    return hid_p[:, :B, :H], cell_p[:, :B, :H]


def _reference_forward(x_ids, params):
    """Pure-JAX reference matching PyTorch nn.LSTM (eval mode) semantics."""
    emb = jnp.take(params["embedding"], x_ids, axis=0).astype(jnp.float32)  # (S,B,E)
    H = params["whh0"].shape[1]
    B = x_ids.shape[1]

    def cell(x, h, c, wih, whh, bih, bhh):
        gates = x @ wih.T + h @ whh.T + bih + bhh
        i = jax.nn.sigmoid(gates[:, 0 * H:1 * H])
        f = jax.nn.sigmoid(gates[:, 1 * H:2 * H])
        g = jnp.tanh(gates[:, 2 * H:3 * H])
        o = jax.nn.sigmoid(gates[:, 3 * H:4 * H])
        c_new = f * c + i * g
        h_new = o * jnp.tanh(c_new)
        return h_new, c_new

    h0 = c0 = h1 = c1 = jnp.zeros((B, H), jnp.float32)
    for t in range(x_ids.shape[0]):
        h0, c0 = cell(emb[t], h0, c0, params["wih0"], params["whh0"],
                      params["bih0"], params["bhh0"])
        h1, c1 = cell(h0, h1, c1, params["wih1"], params["whh1"],
                      params["bih1"], params["bhh1"])
    return jnp.stack([h0, h1]), jnp.stack([c0, c1])


def make_params(key, input_size, embedding_size, hidden_size):
    ks = jax.random.split(key, 10)
    s = 1.0 / jnp.sqrt(hidden_size)
    u = lambda k, shp: jax.random.uniform(k, shp, jnp.float32, -s, s)
    return {
        "embedding": jax.random.normal(ks[0], (input_size, embedding_size), jnp.float32),
        "wih0": u(ks[1], (4 * hidden_size, embedding_size)),
        "whh0": u(ks[2], (4 * hidden_size, hidden_size)),
        "bih0": u(ks[3], (4 * hidden_size,)),
        "bhh0": u(ks[4], (4 * hidden_size,)),
        "wih1": u(ks[5], (4 * hidden_size, hidden_size)),
        "whh1": u(ks[6], (4 * hidden_size, hidden_size)),
        "bih1": u(ks[7], (4 * hidden_size,)),
        "bhh1": u(ks[8], (4 * hidden_size,)),
    }


if __name__ == "__main__":
    # Small shapes consistent with Encoder(input_size, embedding_size, hidden_size, num_layers=2, p)
    INPUT_SIZE = 16     # vocab
    EMBED = 32
    HIDDEN = 32
    SEQ = 8
    BATCH = 2

    key = jax.random.PRNGKey(0)
    kp, kx = jax.random.split(key)
    params = make_params(kp, INPUT_SIZE, EMBED, HIDDEN)
    x_ids = jax.random.randint(kx, (SEQ, BATCH), 0, INPUT_SIZE, dtype=jnp.int32)

    ref_h, ref_c = _reference_forward(x_ids, params)

    # f32 MXU-operand path: tight check against the pure-JAX reference.
    h32, c32 = encoder_forward(x_ids, params, compute_dtype=jnp.float32)
    h32 = jax.block_until_ready(h32)
    c32 = jax.block_until_ready(c32)
    assert jnp.allclose(h32, ref_h, atol=1e-5, rtol=1e-5), "hidden mismatch (f32)"
    assert jnp.allclose(c32, ref_c, atol=1e-5, rtol=1e-5), "cell mismatch (f32)"

    # Default bf16 MXU-operand path (f32 accumulation / state / activations).
    hbf, cbf = encoder_forward(x_ids, params)
    hbf = jax.block_until_ready(hbf)
    cbf = jax.block_until_ready(cbf)
    assert jnp.allclose(hbf, ref_h, atol=5e-2, rtol=5e-2), "hidden mismatch (bf16)"
    assert jnp.allclose(cbf, ref_c, atol=5e-2, rtol=5e-2), "cell mismatch (bf16)"

    print("KERNEL_OK")
</pallas_src>

<mosaic_0001>
module attributes {stable_mosaic.version = 11 : i64} {
  func.func @kernel(%arg0: i32, %arg1: memref<64x128xf32, #tpu.memory_space<vmem>>, %arg2: memref<512x512xf32, #tpu.memory_space<any>>, %arg3: memref<1x512xf32, #tpu.memory_space<vmem>>, %arg4: memref<1x512xf32, #tpu.memory_space<vmem>>, %arg5: memref<2x8x128xf32, #tpu.memory_space<vmem>>, %arg6: memref<2x8x128xf32, #tpu.memory_space<vmem>>, %arg7: memref<512x512xf32, #tpu.memory_space<vmem>>, %arg8: memref<64x512xf32, #tpu.memory_space<vmem>>, %arg9: memref<!tpu.dma_semaphore, #tpu.memory_space<semaphore_mem>>) attributes {dimension_semantics = [#tpu.dimension_semantics<arbitrary>], iteration_bounds = array<i64: 1>, scalar_prefetch = 0 : i64, scratch_operands = 3 : i64, tpu.core_type = #tpu.core_type<tc>, window_params = [{transform_indices = @transform_0, window_bounds = array<i64: 64, 128>}, {}, {pipeline_mode = #tpu.pipeline_mode<synchronous>, transform_indices = @transform_2, window_bounds = array<i64: 1, 512>}, {pipeline_mode = #tpu.pipeline_mode<synchronous>, transform_indices = @transform_3, window_bounds = array<i64: 1, 512>}, {pipeline_mode = #tpu.pipeline_mode<synchronous>, transform_indices = @transform_4, window_bounds = array<i64: 2, 8, 128>}, {pipeline_mode = #tpu.pipeline_mode<synchronous>, transform_indices = @transform_5, window_bounds = array<i64: 2, 8, 128>}]} {
    %c0_i32 = arith.constant 0 : i32
    %0 = arith.cmpi eq, %arg0, %c0_i32 : i32
    %1 = arith.extui %0 : i1 to i32
    %c0_i32_0 = arith.constant 0 : i32
    %2 = arith.cmpi ne, %1, %c0_i32_0 : i32
    scf.if %2 {
      tpu.enqueue_dma source(%arg2 : memref<512x512xf32, #tpu.memory_space<any>>) target(%arg7 : memref<512x512xf32, #tpu.memory_space<vmem>>) target_semaphore(%arg9 : memref<!tpu.dma_semaphore, #tpu.memory_space<semaphore_mem>>)
      tpu.wait_dma2 semaphore(%arg9 : memref<!tpu.dma_semaphore, #tpu.memory_space<semaphore_mem>>) src(%arg2 : memref<512x512xf32, #tpu.memory_space<any>>) dst(%arg7 : memref<512x512xf32, #tpu.memory_space<vmem>>)
      %cst_93 = arith.constant 0.000000e+00 : f32
      %372 = vector.broadcast %cst_93 : f32 to vector<2x8x128xf32>
      %c0_94 = arith.constant 0 : index
      %c0_95 = arith.constant 0 : index
      %c0_96 = arith.constant 0 : index
      %373 = vector.load %arg5[%c0_94, %c0_95, %c0_96] : memref<2x8x128xf32, #tpu.memory_space<vmem>>, vector<2x8x128xf32>
      tpu.vector_store %arg5[%c0_94, %c0_95, %c0_96], %372 {strides = array<i32>} : memref<2x8x128xf32, #tpu.memory_space<vmem>>, vector<2x8x128xf32>,
      %cst_97 = arith.constant 0.000000e+00 : f32
      %374 = vector.broadcast %cst_97 : f32 to vector<2x8x128xf32>
      %c0_98 = arith.constant 0 : index
      %c0_99 = arith.constant 0 : index
      %c0_100 = arith.constant 0 : index
      %375 = vector.load %arg6[%c0_98, %c0_99, %c0_100] : memref<2x8x128xf32, #tpu.memory_space<vmem>>, vector<2x8x128xf32>
      tpu.vector_store %arg6[%c0_98, %c0_99, %c0_100], %374 {strides = array<i32>} : memref<2x8x128xf32, #tpu.memory_space<vmem>>, vector<2x8x128xf32>,
    } else {
    }
    %c0 = arith.constant 0 : index
    %c0_1 = arith.constant 0 : index
    %3 = vector.load %arg7[%c0, %c0_1] : memref<512x512xf32, #tpu.memory_space<vmem>>, vector<128x512xf32>
    %c128 = arith.constant 128 : index
    %c0_2 = arith.constant 0 : index
    %4 = vector.load %arg7[%c128, %c0_2] : memref<512x512xf32, #tpu.memory_space<vmem>>, vector<128x512xf32>
    %c256 = arith.constant 256 : index
    %c0_3 = arith.constant 0 : index
    %5 = vector.load %arg7[%c256, %c0_3] : memref<512x512xf32, #tpu.memory_space<vmem>>, vector<128x512xf32>
    %c384 = arith.constant 384 : index
    %c0_4 = arith.constant 0 : index
    %6 = vector.load %arg7[%c384, %c0_4] : memref<512x512xf32, #tpu.memory_space<vmem>>, vector<128x512xf32>
    %c0_5 = arith.constant 0 : index
    %c0_6 = arith.constant 0 : index
    %7 = vector.load %arg3[%c0_5, %c0_6] : memref<1x512xf32, #tpu.memory_space<vmem>>, vector<1x512xf32>
    %c0_7 = arith.constant 0 : index
    %c0_8 = arith.constant 0 : index
    %8 = vector.load %arg4[%c0_7, %c0_8] : memref<1x512xf32, #tpu.memory_space<vmem>>, vector<1x512xf32>
    %9 = vector.shape_cast %8 : vector<1x512xf32> to vector<1x512xf32>
    %10 = vector.broadcast %9 : vector<1x512xf32> to vector<8x512xf32>
    %c0_9 = arith.constant 0 : index
    %c0_10 = arith.constant 0 : index
    %11 = vector.load %arg1[%c0_9, %c0_10] : memref<64x128xf32, #tpu.memory_space<vmem>>, vector<64x128xf32>
    %cst = arith.constant dense<0.000000e+00> : vector<64x512xf32>
    %12 = tpu.matmul %11, %3, %cst {dimension_numbers = #tpu.dot_dimension_numbers<[1], [0], [0], [1], [0, 0, 1, 1], [], []>} : vector<64x128xf32>, vector<128x512xf32>, vector<64x512xf32> -> vector<64x512xf32>
    %13 = vector.broadcast %7 : vector<1x512xf32> to vector<64x512xf32>
    %14 = arith.addf %12, %13 : vector<64x512xf32>
    %c0_11 = arith.constant 0 : index
    %c0_12 = arith.constant 0 : index
    %15 = vector.load %arg8[%c0_11, %c0_12] : memref<64x512xf32, #tpu.memory_space<vmem>>, vector<64x512xf32>
    tpu.vector_store %arg8[%c0_11, %c0_12], %14 {strides = array<i32>} : memref<64x512xf32, #tpu.memory_space<vmem>>, vector<64x512xf32>,
    %c0_13 = arith.constant 0 : index
    %c0_14 = arith.constant 0 : index
    %c0_15 = arith.constant 0 : index
    %16 = vector.load %arg5[%c0_13, %c0_14, %c0_15] : memref<2x8x128xf32, #tpu.memory_space<vmem>>, vector<1x8x128xf32>
    %17 = vector.shape_cast %16 : vector<1x8x128xf32> to vector<8x128xf32>
    %c0_16 = arith.constant 0 : index
    %c0_17 = arith.constant 0 : index
    %c0_18 = arith.constant 0 : index
    %18 = vector.load %arg6[%c0_16, %c0_17, %c0_18] : memref<2x8x128xf32, #tpu.memory_space<vmem>>, vector<1x8x128xf32>
    %19 = vector.shape_cast %18 : vector<1x8x128xf32> to vector<8x128xf32>
    %c1 = arith.constant 1 : index
    %c0_19 = arith.constant 0 : index
    %c0_20 = arith.constant 0 : index
    %20 = vector.load %arg5[%c1, %c0_19, %c0_20] : memref<2x8x128xf32, #tpu.memory_space<vmem>>, vector<1x8x128xf32>
    %21 = vector.shape_cast %20 : vector<1x8x128xf32> to vector<8x128xf32>
    %c1_21 = arith.constant 1 : index
    %c0_22 = arith.constant 0 : index
    %c0_23 = arith.constant 0 : index
    %22 = vector.load %arg6[%c1_21, %c0_22, %c0_23] : memref<2x8x128xf32, #tpu.memory_space<vmem>>, vector<1x8x128xf32>
    %23 = vector.shape_cast %22 : vector<1x8x128xf32> to vector<8x128xf32>
    %c0_i32_24 = arith.constant 0 : i32
    %c8_i32 = arith.constant 8 : i32
    %24 = arith.muli %c0_i32_24, %c8_i32 : i32
    %25 = tpu.assume_multiple %24, 8 : i32
    %26 = arith.index_cast %25 : i32 to index
    %c0_25 = arith.constant 0 : index
    %27 = vector.load %arg8[%26, %c0_25] : memref<64x512xf32, #tpu.memory_space<vmem>>, vector<8x512xf32>
    %cst_26 = arith.constant dense<0.000000e+00> : vector<8x512xf32>
    %28 = tpu.matmul %17, %4, %cst_26 {dimension_numbers = #tpu.dot_dimension_numbers<[1], [0], [0], [1], [0, 0, 1, 1], [], []>} : vector<8x128xf32>, vector<128x512xf32>, vector<8x512xf32> -> vector<8x512xf32>
    %29 = arith.addf %27, %28 : vector<8x512xf32>
    %30 = vector.extract_strided_slice %29 {offsets = [0, 0], sizes = [8, 384], strides = [1, 1]} : vector<8x512xf32> to vector<8x384xf32>
    %31 = arith.negf %30 : vector<8x384xf32>
    %32 = math.exp %31 : vector<8x384xf32>
    %cst_27 = arith.constant 1.000000e+00 : f32
    %33 = vector.broadcast %cst_27 : f32 to vector<8x384xf32>
    %34 = arith.addf %33, %32 : vector<8x384xf32>
    %35 = arith.divf %33, %34 : vector<8x384xf32>
    %36 = vector.extract_strided_slice %35 {offsets = [0, 0], sizes = [8, 128], strides = [1, 1]} : vector<8x384xf32> to vector<8x128xf32>
    %37 = vector.extract_strided_slice %35 {offsets = [0, 128], sizes = [8, 128], strides = [1, 1]} : vector<8x384xf32> to vector<8x128xf32>
    %38 = vector.extract_strided_slice %35 {offsets = [0, 256], sizes = [8, 128], strides = [1, 1]} : vector<8x384xf32> to vector<8x128xf32>
    %39 = vector.extract_strided_slice %29 {offsets = [0, 384], sizes = [8, 128], strides = [1, 1]} : vector<8x512xf32> to vector<8x128xf32>
    %40 = math.tanh %39 : vector<8x128xf32>
    %41 = arith.mulf %37, %19 : vector<8x128xf32>
    %42 = arith.mulf %36, %40 : vector<8x128xf32>
    %43 = arith.addf %41, %42 : vector<8x128xf32>
    %44 = math.tanh %43 : vector<8x128xf32>
    %45 = arith.mulf %38, %44 : vector<8x128xf32>
    %cst_28 = arith.constant dense<0.000000e+00> : vector<8x512xf32>
    %46 = tpu.matmul %45, %5, %cst_28 {dimension_numbers = #tpu.dot_dimension_numbers<[1], [0], [0], [1], [0, 0, 1, 1], [], []>} : vector<8x128xf32>, vector<128x512xf32>, vector<8x512xf32> -> vector<8x512xf32>
    %cst_29 = arith.constant dense<0.000000e+00> : vector<8x512xf32>
    %47 = tpu.matmul %21, %6, %cst_29 {dimension_numbers = #tpu.dot_dimension_numbers<[1], [0], [0], [1], [0, 0, 1, 1], [], []>} : vector<8x128xf32>, vector<128x512xf32>, vector<8x512xf32> -> vector<8x512xf32>
    %48 = arith.addf %46, %47 : vector<8x512xf32>
    %49 = arith.addf %48, %10 : vector<8x512xf32>
    %50 = vector.extract_strided_slice %49 {offsets = [0, 0], sizes = [8, 384], strides = [1, 1]} : vector<8x512xf32> to vector<8x384xf32>
    %51 = arith.negf %50 : vector<8x384xf32>
    %52 = math.exp %51 : vector<8x384xf32>
    %cst_30 = arith.constant 1.000000e+00 : f32
    %53 = vector.broadcast %cst_30 : f32 to vector<8x384xf32>
    %54 = arith.addf %53, %52 : vector<8x384xf32>
    %55 = arith.divf %53, %54 : vector<8x384xf32>
    %56 = vector.extract_strided_slice %55 {offsets = [0, 0], sizes = [8, 128], strides = [1, 1]} : vector<8x384xf32> to vector<8x128xf32>
    %57 = vector.extract_strided_slice %55 {offsets = [0, 128], sizes = [8, 128], strides = [1, 1]} : vector<8x384xf32> to vector<8x128xf32>
    %58 = vector.extract_strided_slice %55 {offsets = [0, 256], sizes = [8, 128], strides = [1, 1]} : vector<8x384xf32> to vector<8x128xf32>
    %59 = vector.extract_strided_slice %49 {offsets = [0, 384], sizes = [8, 128], strides = [1, 1]} : vector<8x512xf32> to vector<8x128xf32>
    %60 = math.tanh %59 : vector<8x128xf32>
    %61 = arith.mulf %57, %23 : vector<8x128xf32>
    %62 = arith.mulf %56, %60 : vector<8x128xf32>
    %63 = arith.addf %61, %62 : vector<8x128xf32>
    %64 = math.tanh %63 : vector<8x128xf32>
    %65 = arith.mulf %58, %64 : vector<8x128xf32>
    %c1_i32 = arith.constant 1 : i32
    %c8_i32_31 = arith.constant 8 : i32
    %66 = arith.muli %c1_i32, %c8_i32_31 : i32
    %67 = tpu.assume_multiple %66, 8 : i32
    %68 = arith.index_cast %67 : i32 to index
    %c0_32 = arith.constant 0 : index
    %69 = vector.load %arg8[%68, %c0_32] : memref<64x512xf32, #tpu.memory_space<vmem>>, vector<8x512xf32>
    %cst_33 = arith.constant dense<0.000000e+00> : vector<8x512xf32>
    %70 = tpu.matmul %45, %4, %cst_33 {dimension_numbers = #tpu.dot_dimension_numbers<[1], [0], [0], [1], [0, 0, 1, 1], [], []>} : vector<8x128xf32>, vector<128x512xf32>, vector<8x512xf32> -> vector<8x512xf32>
    %71 = arith.addf %69, %70 : vector<8x512xf32>
    %72 = vector.extract_strided_slice %71 {offsets = [0, 0], sizes = [8, 384], strides = [1, 1]} : vector<8x512xf32> to vector<8x384xf32>
    %73 = arith.negf %72 : vector<8x384xf32>
    %74 = math.exp %73 : vector<8x384xf32>
    %cst_34 = arith.constant 1.000000e+00 : f32
    %75 = vector.broadcast %cst_34 : f32 to vector<8x384xf32>
    %76 = arith.addf %75, %74 : vector<8x384xf32>
    %77 = arith.divf %75, %76 : vector<8x384xf32>
    %78 = vector.extract_strided_slice %77 {offsets = [0, 0], sizes = [8, 128], strides = [1, 1]} : vector<8x384xf32> to vector<8x128xf32>
    %79 = vector.extract_strided_slice %77 {offsets = [0, 128], sizes = [8, 128], strides = [1, 1]} : vector<8x384xf32> to vector<8x128xf32>
    %80 = vector.extract_strided_slice %77 {offsets = [0, 256], sizes = [8, 128], strides = [1, 1]} : vector<8x384xf32> to vector<8x128xf32>
    %81 = vector.extract_strided_slice %71 {offsets = [0, 384], sizes = [8, 128], strides = [1, 1]} : vector<8x512xf32> to vector<8x128xf32>
    %82 = math.tanh %81 : vector<8x128xf32>
    %83 = arith.mulf %79, %43 : vector<8x128xf32>
    %84 = arith.mulf %78, %82 : vector<8x128xf32>
    %85 = arith.addf %83, %84 : vector<8x128xf32>
    %86 = math.tanh %85 : vector<8x128xf32>
    %87 = arith.mulf %80, %86 : vector<8x128xf32>
    %cst_35 = arith.constant dense<0.000000e+00> : vector<8x512xf32>
    %88 = tpu.matmul %87, %5, %cst_35 {dimension_numbers = #tpu.dot_dimension_numbers<[1], [0], [0], [1], [0, 0, 1, 1], [], []>} : vector<8x128xf32>, vector<128x512xf32>, vector<8x512xf32> -> vector<8x512xf32>
    %cst_36 = arith.constant dense<0.000000e+00> : vector<8x512xf32>
    %89 = tpu.matmul %65, %6, %cst_36 {dimension_numbers = #tpu.dot_dimension_numbers<[1], [0], [0], [1], [0, 0, 1, 1], [], []>} : vector<8x128xf32>, vector<128x512xf32>, vector<8x512xf32> -> vector<8x512xf32>
    %90 = arith.addf %88, %89 : vector<8x512xf32>
    %91 = arith.addf %90, %10 : vector<8x512xf32>
    %92 = vector.extract_strided_slice %91 {offsets = [0, 0], sizes = [8, 384], strides = [1, 1]} : vector<8x512xf32> to vector<8x384xf32>
    %93 = arith.negf %92 : vector<8x384xf32>
    %94 = math.exp %93 : vector<8x384xf32>
    %cst_37 = arith.constant 1.000000e+00 : f32
    %95 = vector.broadcast %cst_37 : f32 to vector<8x384xf32>
    %96 = arith.addf %95, %94 : vector<8x384xf32>
    %97 = arith.divf %95, %96 : vector<8x384xf32>
    %98 = vector.extract_strided_slice %97 {offsets = [0, 0], sizes = [8, 128], strides = [1, 1]} : vector<8x384xf32> to vector<8x128xf32>
    %99 = vector.extract_strided_slice %97 {offsets = [0, 128], sizes = [8, 128], strides = [1, 1]} : vector<8x384xf32> to vector<8x128xf32>
    %100 = vector.extract_strided_slice %97 {offsets = [0, 256], sizes = [8, 128], strides = [1, 1]} : vector<8x384xf32> to vector<8x128xf32>
    %101 = vector.extract_strided_slice %91 {offsets = [0, 384], sizes = [8, 128], strides = [1, 1]} : vector<8x512xf32> to vector<8x128xf32>
    %102 = math.tanh %101 : vector<8x128xf32>
    %103 = arith.mulf %99, %63 : vector<8x128xf32>
    %104 = arith.mulf %98, %102 : vector<8x128xf32>
    %105 = arith.addf %103, %104 : vector<8x128xf32>
    %106 = math.tanh %105 : vector<8x128xf32>
    %107 = arith.mulf %100, %106 : vector<8x128xf32>
    %c2_i32 = arith.constant 2 : i32
    %c8_i32_38 = arith.constant 8 : i32
    %108 = arith.muli %c2_i32, %c8_i32_38 : i32
    %109 = tpu.assume_multiple %108, 8 : i32
    %110 = arith.index_cast %109 : i32 to index
    %c0_39 = arith.constant 0 : index
    %111 = vector.load %arg8[%110, %c0_39] : memref<64x512xf32, #tpu.memory_space<vmem>>, vector<8x512xf32>
    %cst_40 = arith.constant dense<0.000000e+00> : vector<8x512xf32>
    %112 = tpu.matmul %87, %4, %cst_40 {dimension_numbers = #tpu.dot_dimension_numbers<[1], [0], [0], [1], [0, 0, 1, 1], [], []>} : vector<8x128xf32>, vector<128x512xf32>, vector<8x512xf32> -> vector<8x512xf32>
    %113 = arith.addf %111, %112 : vector<8x512xf32>
    %114 = vector.extract_strided_slice %113 {offsets = [0, 0], sizes = [8, 384], strides = [1, 1]} : vector<8x512xf32> to vector<8x384xf32>
    %115 = arith.negf %114 : vector<8x384xf32>
    %116 = math.exp %115 : vector<8x384xf32>
    %cst_41 = arith.constant 1.000000e+00 : f32
    %117 = vector.broadcast %cst_41 : f32 to vector<8x384xf32>
    %118 = arith.addf %117, %116 : vector<8x384xf32>
    %119 = arith.divf %117, %118 : vector<8x384xf32>
    %120 = vector.extract_strided_slice %119 {offsets = [0, 0], sizes = [8, 128], strides = [1, 1]} : vector<8x384xf32> to vector<8x128xf32>
    %121 = vector.extract_strided_slice %119 {offsets = [0, 128], sizes = [8, 128], strides = [1, 1]} : vector<8x384xf32> to vector<8x128xf32>
    %122 = vector.extract_strided_slice %119 {offsets = [0, 256], sizes = [8, 128], strides = [1, 1]} : vector<8x384xf32> to vector<8x128xf32>
    %123 = vector.extract_strided_slice %113 {offsets = [0, 384], sizes = [8, 128], strides = [1, 1]} : vector<8x512xf32> to vector<8x128xf32>
    %124 = math.tanh %123 : vector<8x128xf32>
    %125 = arith.mulf %121, %85 : vector<8x128xf32>
    %126 = arith.mulf %120, %124 : vector<8x128xf32>
    %127 = arith.addf %125, %126 : vector<8x128xf32>
    %128 = math.tanh %127 : vector<8x128xf32>
    %129 = arith.mulf %122, %128 : vector<8x128xf32>
    %cst_42 = arith.constant dense<0.000000e+00> : vector<8x512xf32>
    %130 = tpu.matmul %129, %5, %cst_42 {dimension_numbers = #tpu.dot_dimension_numbers<[1], [0], [0], [1], [0, 0, 1, 1], [], []>} : vector<8x128xf32>, vector<128x512xf32>, vector<8x512xf32> -> vector<8x512xf32>
    %cst_43 = arith.constant dense<0.000000e+00> : vector<8x512xf32>
    %131 = tpu.matmul %107, %6, %cst_43 {dimension_numbers = #tpu.dot_dimension_numbers<[1], [0], [0], [1], [0, 0, 1, 1], [], []>} : vector<8x128xf32>, vector<128x512xf32>, vector<8x512xf32> -> vector<8x512xf32>
    %132 = arith.addf %130, %131 : vector<8x512xf32>
    %133 = arith.addf %132, %10 : vector<8x512xf32>
    %134 = vector.extract_strided_slice %133 {offsets = [0, 0], sizes = [8, 384], strides = [1, 1]} : vector<8x512xf32> to vector<8x384xf32>
    %135 = arith.negf %134 : vector<8x384xf32>
    %136 = math.exp %135 : vector<8x384xf32>
    %cst_44 = arith.constant 1.000000e+00 : f32
    %137 = vector.broadcast %cst_44 : f32 to vector<8x384xf32>
    %138 = arith.addf %137, %136 : vector<8x384xf32>
    %139 = arith.divf %137, %138 : vector<8x384xf32>
    %140 = vector.extract_strided_slice %139 {offsets = [0, 0], sizes = [8, 128], strides = [1, 1]} : vector<8x384xf32> to vector<8x128xf32>
    %141 = vector.extract_strided_slice %139 {offsets = [0, 128], sizes = [8, 128], strides = [1, 1]} : vector<8x384xf32> to vector<8x128xf32>
    %142 = vector.extract_strided_slice %139 {offsets = [0, 256], sizes = [8, 128], strides = [1, 1]} : vector<8x384xf32> to vector<8x128xf32>
    %143 = vector.extract_strided_slice %133 {offsets = [0, 384], sizes = [8, 128], strides = [1, 1]} : vector<8x512xf32> to vector<8x128xf32>
    %144 = math.tanh %143 : vector<8x128xf32>
    %145 = arith.mulf %141, %105 : vector<8x128xf32>
    %146 = arith.mulf %140, %144 : vector<8x128xf32>
    %147 = arith.addf %145, %146 : vector<8x128xf32>
    %148 = math.tanh %147 : vector<8x128xf32>
    %149 = arith.mulf %142, %148 : vector<8x128xf32>
    %c3_i32 = arith.constant 3 : i32
    %c8_i32_45 = arith.constant 8 : i32
    %150 = arith.muli %c3_i32, %c8_i32_45 : i32
    %151 = tpu.assume_multiple %150, 8 : i32
    %152 = arith.index_cast %151 : i32 to index
    %c0_46 = arith.constant 0 : index
    %153 = vector.load %arg8[%152, %c0_46] : memref<64x512xf32, #tpu.memory_space<vmem>>, vector<8x512xf32>
    %cst_47 = arith.constant dense<0.000000e+00> : vector<8x512xf32>
    %154 = tpu.matmul %129, %4, %cst_47 {dimension_numbers = #tpu.dot_dimension_numbers<[1], [0], [0], [1], [0, 0, 1, 1], [], []>} : vector<8x128xf32>, vector<128x512xf32>, vector<8x512xf32> -> vector<8x512xf32>
    %155 = arith.addf %153, %154 : vector<8x512xf32>
    %156 = vector.extract_strided_slice %155 {offsets = [0, 0], sizes = [8, 384], strides = [1, 1]} : vector<8x512xf32> to vector<8x384xf32>
    %157 = arith.negf %156 : vector<8x384xf32>
    %158 = math.exp %157 : vector<8x384xf32>
    %cst_48 = arith.constant 1.000000e+00 : f32
    %159 = vector.broadcast %cst_48 : f32 to vector<8x384xf32>
    %160 = arith.addf %159, %158 : vector<8x384xf32>
    %161 = arith.divf %159, %160 : vector<8x384xf32>
    %162 = vector.extract_strided_slice %161 {offsets = [0, 0], sizes = [8, 128], strides = [1, 1]} : vector<8x384xf32> to vector<8x128xf32>
    %163 = vector.extract_strided_slice %161 {offsets = [0, 128], sizes = [8, 128], strides = [1, 1]} : vector<8x384xf32> to vector<8x128xf32>
    %164 = vector.extract_strided_slice %161 {offsets = [0, 256], sizes = [8, 128], strides = [1, 1]} : vector<8x384xf32> to vector<8x128xf32>
    %165 = vector.extract_strided_slice %155 {offsets = [0, 384], sizes = [8, 128], strides = [1, 1]} : vector<8x512xf32> to vector<8x128xf32>
    %166 = math.tanh %165 : vector<8x128xf32>
    %167 = arith.mulf %163, %127 : vector<8x128xf32>
    %168 = arith.mulf %162, %166 : vector<8x128xf32>
    %169 = arith.addf %167, %168 : vector<8x128xf32>
    %170 = math.tanh %169 : vector<8x128xf32>
    %171 = arith.mulf %164, %170 : vector<8x128xf32>
    %cst_49 = arith.constant dense<0.000000e+00> : vector<8x512xf32>
    %172 = tpu.matmul %171, %5, %cst_49 {dimension_numbers = #tpu.dot_dimension_numbers<[1], [0], [0], [1], [0, 0, 1, 1], [], []>} : vector<8x128xf32>, vector<128x512xf32>, vector<8x512xf32> -> vector<8x512xf32>
    %cst_50 = arith.constant dense<0.000000e+00> : vector<8x512xf32>
    %173 = tpu.matmul %149, %6, %cst_50 {dimension_numbers = #tpu.dot_dimension_numbers<[1], [0], [0], [1], [0, 0, 1, 1], [], []>} : vector<8x128xf32>, vector<128x512xf32>, vector<8x512xf32> -> vector<8x512xf32>
    %174 = arith.addf %172, %173 : vector<8x512xf32>
    %175 = arith.addf %174, %10 : vector<8x512xf32>
    %176 = vector.extract_strided_slice %175 {offsets = [0, 0], sizes = [8, 384], strides = [1, 1]} : vector<8x512xf32> to vector<8x384xf32>
    %177 = arith.negf %176 : vector<8x384xf32>
    %178 = math.exp %177 : vector<8x384xf32>
    %cst_51 = arith.constant 1.000000e+00 : f32
    %179 = vector.broadcast %cst_51 : f32 to vector<8x384xf32>
    %180 = arith.addf %179, %178 : vector<8x384xf32>
    %181 = arith.divf %179, %180 : vector<8x384xf32>
    %182 = vector.extract_strided_slice %181 {offsets = [0, 0], sizes = [8, 128], strides = [1, 1]} : vector<8x384xf32> to vector<8x128xf32>
    %183 = vector.extract_strided_slice %181 {offsets = [0, 128], sizes = [8, 128], strides = [1, 1]} : vector<8x384xf32> to vector<8x128xf32>
    %184 = vector.extract_strided_slice %181 {offsets = [0, 256], sizes = [8, 128], strides = [1, 1]} : vector<8x384xf32> to vector<8x128xf32>
    %185 = vector.extract_strided_slice %175 {offsets = [0, 384], sizes = [8, 128], strides = [1, 1]} : vector<8x512xf32> to vector<8x128xf32>
    %186 = math.tanh %185 : vector<8x128xf32>
    %187 = arith.mulf %183, %147 : vector<8x128xf32>
    %188 = arith.mulf %182, %186 : vector<8x128xf32>
    %189 = arith.addf %187, %188 : vector<8x128xf32>
    %190 = math.tanh %189 : vector<8x128xf32>
    %191 = arith.mulf %184, %190 : vector<8x128xf32>
    %c4_i32 = arith.constant 4 : i32
    %c8_i32_52 = arith.constant 8 : i32
    %192 = arith.muli %c4_i32, %c8_i32_52 : i32
    %193 = tpu.assume_multiple %192, 8 : i32
    %194 = arith.index_cast %193 : i32 to index
    %c0_53 = arith.constant 0 : index
    %195 = vector.load %arg8[%194, %c0_53] : memref<64x512xf32, #tpu.memory_space<vmem>>, vector<8x512xf32>
    %cst_54 = arith.constant dense<0.000000e+00> : vector<8x512xf32>
    %196 = tpu.matmul %171, %4, %cst_54 {dimension_numbers = #tpu.dot_dimension_numbers<[1], [0], [0], [1], [0, 0, 1, 1], [], []>} : vector<8x128xf32>, vector<128x512xf32>, vector<8x512xf32> -> vector<8x512xf32>
    %197 = arith.addf %195, %196 : vector<8x512xf32>
    %198 = vector.extract_strided_slice %197 {offsets = [0, 0], sizes = [8, 384], strides = [1, 1]} : vector<8x512xf32> to vector<8x384xf32>
    %199 = arith.negf %198 : vector<8x384xf32>
    %200 = math.exp %199 : vector<8x384xf32>
    %cst_55 = arith.constant 1.000000e+00 : f32
    %201 = vector.broadcast %cst_55 : f32 to vector<8x384xf32>
    %202 = arith.addf %201, %200 : vector<8x384xf32>
    %203 = arith.divf %201, %202 : vector<8x384xf32>
    %204 = vector.extract_strided_slice %203 {offsets = [0, 0], sizes = [8, 128], strides = [1, 1]} : vector<8x384xf32> to vector<8x128xf32>
    %205 = vector.extract_strided_slice %203 {offsets = [0, 128], sizes = [8, 128], strides = [1, 1]} : vector<8x384xf32> to vector<8x128xf32>
    %206 = vector.extract_strided_slice %203 {offsets = [0, 256], sizes = [8, 128], strides = [1, 1]} : vector<8x384xf32> to vector<8x128xf32>
    %207 = vector.extract_strided_slice %197 {offsets = [0, 384], sizes = [8, 128], strides = [1, 1]} : vector<8x512xf32> to vector<8x128xf32>
    %208 = math.tanh %207 : vector<8x128xf32>
    %209 = arith.mulf %205, %169 : vector<8x128xf32>
    %210 = arith.mulf %204, %208 : vector<8x128xf32>
    %211 = arith.addf %209, %210 : vector<8x128xf32>
    %212 = math.tanh %211 : vector<8x128xf32>
    %213 = arith.mulf %206, %212 : vector<8x128xf32>
    %cst_56 = arith.constant dense<0.000000e+00> : vector<8x512xf32>
    %214 = tpu.matmul %213, %5, %cst_56 {dimension_numbers = #tpu.dot_dimension_numbers<[1], [0], [0], [1], [0, 0, 1, 1], [], []>} : vector<8x128xf32>, vector<128x512xf32>, vector<8x512xf32> -> vector<8x512xf32>
    %cst_57 = arith.constant dense<0.000000e+00> : vector<8x512xf32>
    %215 = tpu.matmul %191, %6, %cst_57 {dimension_numbers = #tpu.dot_dimension_numbers<[1], [0], [0], [1], [0, 0, 1, 1], [], []>} : vector<8x128xf32>, vector<128x512xf32>, vector<8x512xf32> -> vector<8x512xf32>
    %216 = arith.addf %214, %215 : vector<8x512xf32>
    %217 = arith.addf %216, %10 : vector<8x512xf32>
    %218 = vector.extract_strided_slice %217 {offsets = [0, 0], sizes = [8, 384], strides = [1, 1]} : vector<8x512xf32> to vector<8x384xf32>
    %219 = arith.negf %218 : vector<8x384xf32>
    %220 = math.exp %219 : vector<8x384xf32>
    %cst_58 = arith.constant 1.000000e+00 : f32
    %221 = vector.broadcast %cst_58 : f32 to vector<8x384xf32>
    %222 = arith.addf %221, %220 : vector<8x384xf32>
    %223 = arith.divf %221, %222 : vector<8x384xf32>
    %224 = vector.extract_strided_slice %223 {offsets = [0, 0], sizes = [8, 128], strides = [1, 1]} : vector<8x384xf32> to vector<8x128xf32>
    %225 = vector.extract_strided_slice %223 {offsets = [0, 128], sizes = [8, 128], strides = [1, 1]} : vector<8x384xf32> to vector<8x128xf32>
    %226 = vector.extract_strided_slice %223 {offsets = [0, 256], sizes = [8, 128], strides = [1, 1]} : vector<8x384xf32> to vector<8x128xf32>
    %227 = vector.extract_strided_slice %217 {offsets = [0, 384], sizes = [8, 128], strides = [1, 1]} : vector<8x512xf32> to vector<8x128xf32>
    %228 = math.tanh %227 : vector<8x128xf32>
    %229 = arith.mulf %225, %189 : vector<8x128xf32>
    %230 = arith.mulf %224, %228 : vector<8x128xf32>
    %231 = arith.addf %229, %230 : vector<8x128xf32>
    %232 = math.tanh %231 : vector<8x128xf32>
    %233 = arith.mulf %226, %232 : vector<8x128xf32>
    %c5_i32 = arith.constant 5 : i32
    %c8_i32_59 = arith.constant 8 : i32
    %234 = arith.muli %c5_i32, %c8_i32_59 : i32
    %235 = tpu.assume_multiple %234, 8 : i32
    %236 = arith.index_cast %235 : i32 to index
    %c0_60 = arith.constant 0 : index
    %237 = vector.load %arg8[%236, %c0_60] : memref<64x512xf32, #tpu.memory_space<vmem>>, vector<8x512xf32>
    %cst_61 = arith.constant dense<0.000000e+00> : vector<8x512xf32>
    %238 = tpu.matmul %213, %4, %cst_61 {dimension_numbers = #tpu.dot_dimension_numbers<[1], [0], [0], [1], [0, 0, 1, 1], [], []>} : vector<8x128xf32>, vector<128x512xf32>, vector<8x512xf32> -> vector<8x512xf32>
    %239 = arith.addf %237, %238 : vector<8x512xf32>
    %240 = vector.extract_strided_slice %239 {offsets = [0, 0], sizes = [8, 384], strides = [1, 1]} : vector<8x512xf32> to vector<8x384xf32>
    %241 = arith.negf %240 : vector<8x384xf32>
    %242 = math.exp %241 : vector<8x384xf32>
    %cst_62 = arith.constant 1.000000e+00 : f32
    %243 = vector.broadcast %cst_62 : f32 to vector<8x384xf32>
    %244 = arith.addf %243, %242 : vector<8x384xf32>
    %245 = arith.divf %243, %244 : vector<8x384xf32>
    %246 = vector.extract_strided_slice %245 {offsets = [0, 0], sizes = [8, 128], strides = [1, 1]} : vector<8x384xf32> to vector<8x128xf32>
    %247 = vector.extract_strided_slice %245 {offsets = [0, 128], sizes = [8, 128], strides = [1, 1]} : vector<8x384xf32> to vector<8x128xf32>
    %248 = vector.extract_strided_slice %245 {offsets = [0, 256], sizes = [8, 128], strides = [1, 1]} : vector<8x384xf32> to vector<8x128xf32>
    %249 = vector.extract_strided_slice %239 {offsets = [0, 384], sizes = [8, 128], strides = [1, 1]} : vector<8x512xf32> to vector<8x128xf32>
    %250 = math.tanh %249 : vector<8x128xf32>
    %251 = arith.mulf %247, %211 : vector<8x128xf32>
    %252 = arith.mulf %246, %250 : vector<8x128xf32>
    %253 = arith.addf %251, %252 : vector<8x128xf32>
    %254 = math.tanh %253 : vector<8x128xf32>
    %255 = arith.mulf %248, %254 : vector<8x128xf32>
    %cst_63 = arith.constant dense<0.000000e+00> : vector<8x512xf32>
    %256 = tpu.matmul %255, %5, %cst_63 {dimension_numbers = #tpu.dot_dimension_numbers<[1], [0], [0], [1], [0, 0, 1, 1], [], []>} : vector<8x128xf32>, vector<128x512xf32>, vector<8x512xf32> -> vector<8x512xf32>
    %cst_64 = arith.constant dense<0.000000e+00> : vector<8x512xf32>
    %257 = tpu.matmul %233, %6, %cst_64 {dimension_numbers = #tpu.dot_dimension_numbers<[1], [0], [0], [1], [0, 0, 1, 1], [], []>} : vector<8x128xf32>, vector<128x512xf32>, vector<8x512xf32> -> vector<8x512xf32>
    %258 = arith.addf %256, %257 : vector<8x512xf32>
    %259 = arith.addf %258, %10 : vector<8x512xf32>
    %260 = vector.extract_strided_slice %259 {offsets = [0, 0], sizes = [8, 384], strides = [1, 1]} : vector<8x512xf32> to vector<8x384xf32>
    %261 = arith.negf %260 : vector<8x384xf32>
    %262 = math.exp %261 : vector<8x384xf32>
    %cst_65 = arith.constant 1.000000e+00 : f32
    %263 = vector.broadcast %cst_65 : f32 to vector<8x384xf32>
    %264 = arith.addf %263, %262 : vector<8x384xf32>
    %265 = arith.divf %263, %264 : vector<8x384xf32>
    %266 = vector.extract_strided_slice %265 {offsets = [0, 0], sizes = [8, 128], strides = [1, 1]} : vector<8x384xf32> to vector<8x128xf32>
    %267 = vector.extract_strided_slice %265 {offsets = [0, 128], sizes = [8, 128], strides = [1, 1]} : vector<8x384xf32> to vector<8x128xf32>
    %268 = vector.extract_strided_slice %265 {offsets = [0, 256], sizes = [8, 128], strides = [1, 1]} : vector<8x384xf32> to vector<8x128xf32>
    %269 = vector.extract_strided_slice %259 {offsets = [0, 384], sizes = [8, 128], strides = [1, 1]} : vector<8x512xf32> to vector<8x128xf32>
    %270 = math.tanh %269 : vector<8x128xf32>
    %271 = arith.mulf %267, %231 : vector<8x128xf32>
    %272 = arith.mulf %266, %270 : vector<8x128xf32>
    %273 = arith.addf %271, %272 : vector<8x128xf32>
    %274 = math.tanh %273 : vector<8x128xf32>
    %275 = arith.mulf %268, %274 : vector<8x128xf32>
    %c6_i32 = arith.constant 6 : i32
    %c8_i32_66 = arith.constant 8 : i32
    %276 = arith.muli %c6_i32, %c8_i32_66 : i32
    %277 = tpu.assume_multiple %276, 8 : i32
    %278 = arith.index_cast %277 : i32 to index
    %c0_67 = arith.constant 0 : index
    %279 = vector.load %arg8[%278, %c0_67] : memref<64x512xf32, #tpu.memory_space<vmem>>, vector<8x512xf32>
    %cst_68 = arith.constant dense<0.000000e+00> : vector<8x512xf32>
    %280 = tpu.matmul %255, %4, %cst_68 {dimension_numbers = #tpu.dot_dimension_numbers<[1], [0], [0], [1], [0, 0, 1, 1], [], []>} : vector<8x128xf32>, vector<128x512xf32>, vector<8x512xf32> -> vector<8x512xf32>
    %281 = arith.addf %279, %280 : vector<8x512xf32>
    %282 = vector.extract_strided_slice %281 {offsets = [0, 0], sizes = [8, 384], strides = [1, 1]} : vector<8x512xf32> to vector<8x384xf32>
    %283 = arith.negf %282 : vector<8x384xf32>
    %284 = math.exp %283 : vector<8x384xf32>
    %cst_69 = arith.constant 1.000000e+00 : f32
    %285 = vector.broadcast %cst_69 : f32 to vector<8x384xf32>
    %286 = arith.addf %285, %284 : vector<8x384xf32>
    %287 = arith.divf %285, %286 : vector<8x384xf32>
    %288 = vector.extract_strided_slice %287 {offsets = [0, 0], sizes = [8, 128], strides = [1, 1]} : vector<8x384xf32> to vector<8x128xf32>
    %289 = vector.extract_strided_slice %287 {offsets = [0, 128], sizes = [8, 128], strides = [1, 1]} : vector<8x384xf32> to vector<8x128xf32>
    %290 = vector.extract_strided_slice %287 {offsets = [0, 256], sizes = [8, 128], strides = [1, 1]} : vector<8x384xf32> to vector<8x128xf32>
    %291 = vector.extract_strided_slice %281 {offsets = [0, 384], sizes = [8, 128], strides = [1, 1]} : vector<8x512xf32> to vector<8x128xf32>
    %292 = math.tanh %291 : vector<8x128xf32>
    %293 = arith.mulf %289, %253 : vector<8x128xf32>
    %294 = arith.mulf %288, %292 : vector<8x128xf32>
    %295 = arith.addf %293, %294 : vector<8x128xf32>
    %296 = math.tanh %295 : vector<8x128xf32>
    %297 = arith.mulf %290, %296 : vector<8x128xf32>
    %cst_70 = arith.constant dense<0.000000e+00> : vector<8x512xf32>
    %298 = tpu.matmul %297, %5, %cst_70 {dimension_numbers = #tpu.dot_dimension_numbers<[1], [0], [0], [1], [0, 0, 1, 1], [], []>} : vector<8x128xf32>, vector<128x512xf32>, vector<8x512xf32> -> vector<8x512xf32>
    %cst_71 = arith.constant dense<0.000000e+00> : vector<8x512xf32>
    %299 = tpu.matmul %275, %6, %cst_71 {dimension_numbers = #tpu.dot_dimension_numbers<[1], [0], [0], [1], [0, 0, 1, 1], [], []>} : vector<8x128xf32>, vector<128x512xf32>, vector<8x512xf32> -> vector<8x512xf32>
    %300 = arith.addf %298, %299 : vector<8x512xf32>
    %301 = arith.addf %300, %10 : vector<8x512xf32>
    %302 = vector.extract_strided_slice %301 {offsets = [0, 0], sizes = [8, 384], strides = [1, 1]} : vector<8x512xf32> to vector<8x384xf32>
    %303 = arith.negf %302 : vector<8x384xf32>
    %304 = math.exp %303 : vector<8x384xf32>
    %cst_72 = arith.constant 1.000000e+00 : f32
    %305 = vector.broadcast %cst_72 : f32 to vector<8x384xf32>
    %306 = arith.addf %305, %304 : vector<8x384xf32>
    %307 = arith.divf %305, %306 : vector<8x384xf32>
    %308 = vector.extract_strided_slice %307 {offsets = [0, 0], sizes = [8, 128], strides = [1, 1]} : vector<8x384xf32> to vector<8x128xf32>
    %309 = vector.extract_strided_slice %307 {offsets = [0, 128], sizes = [8, 128], strides = [1, 1]} : vector<8x384xf32> to vector<8x128xf32>
    %310 = vector.extract_strided_slice %307 {offsets = [0, 256], sizes = [8, 128], strides = [1, 1]} : vector<8x384xf32> to vector<8x128xf32>
    %311 = vector.extract_strided_slice %301 {offsets = [0, 384], sizes = [8, 128], strides = [1, 1]} : vector<8x512xf32> to vector<8x128xf32>
    %312 = math.tanh %311 : vector<8x128xf32>
    %313 = arith.mulf %309, %273 : vector<8x128xf32>
    %314 = arith.mulf %308, %312 : vector<8x128xf32>
    %315 = arith.addf %313, %314 : vector<8x128xf32>
    %316 = math.tanh %315 : vector<8x128xf32>
    %317 = arith.mulf %310, %316 : vector<8x128xf32>
    %c7_i32 = arith.constant 7 : i32
    %c8_i32_73 = arith.constant 8 : i32
    %318 = arith.muli %c7_i32, %c8_i32_73 : i32
    %319 = tpu.assume_multiple %318, 8 : i32
    %320 = arith.index_cast %319 : i32 to index
    %c0_74 = arith.constant 0 : index
    %321 = vector.load %arg8[%320, %c0_74] : memref<64x512xf32, #tpu.memory_space<vmem>>, vector<8x512xf32>
    %cst_75 = arith.constant dense<0.000000e+00> : vector<8x512xf32>
    %322 = tpu.matmul %297, %4, %cst_75 {dimension_numbers = #tpu.dot_dimension_numbers<[1], [0], [0], [1], [0, 0, 1, 1], [], []>} : vector<8x128xf32>, vector<128x512xf32>, vector<8x512xf32> -> vector<8x512xf32>
    %323 = arith.addf %321, %322 : vector<8x512xf32>
    %324 = vector.extract_strided_slice %323 {offsets = [0, 0], sizes = [8, 384], strides = [1, 1]} : vector<8x512xf32> to vector<8x384xf32>
    %325 = arith.negf %324 : vector<8x384xf32>
    %326 = math.exp %325 : vector<8x384xf32>
    %cst_76 = arith.constant 1.000000e+00 : f32
    %327 = vector.broadcast %cst_76 : f32 to vector<8x384xf32>
    %328 = arith.addf %327, %326 : vector<8x384xf32>
    %329 = arith.divf %327, %328 : vector<8x384xf32>
    %330 = vector.extract_strided_slice %329 {offsets = [0, 0], sizes = [8, 128], strides = [1, 1]} : vector<8x384xf32> to vector<8x128xf32>
    %331 = vector.extract_strided_slice %329 {offsets = [0, 128], sizes = [8, 128], strides = [1, 1]} : vector<8x384xf32> to vector<8x128xf32>
    %332 = vector.extract_strided_slice %329 {offsets = [0, 256], sizes = [8, 128], strides = [1, 1]} : vector<8x384xf32> to vector<8x128xf32>
    %333 = vector.extract_strided_slice %323 {offsets = [0, 384], sizes = [8, 128], strides = [1, 1]} : vector<8x512xf32> to vector<8x128xf32>
    %334 = math.tanh %333 : vector<8x128xf32>
    %335 = arith.mulf %331, %295 : vector<8x128xf32>
    %336 = arith.mulf %330, %334 : vector<8x128xf32>
    %337 = arith.addf %335, %336 : vector<8x128xf32>
    %338 = math.tanh %337 : vector<8x128xf32>
    %339 = arith.mulf %332, %338 : vector<8x128xf32>
    %cst_77 = arith.constant dense<0.000000e+00> : vector<8x512xf32>
    %340 = tpu.matmul %339, %5, %cst_77 {dimension_numbers = #tpu.dot_dimension_numbers<[1], [0], [0], [1], [0, 0, 1, 1], [], []>} : vector<8x128xf32>, vector<128x512xf32>, vector<8x512xf32> -> vector<8x512xf32>
    %cst_78 = arith.constant dense<0.000000e+00> : vector<8x512xf32>
    %341 = tpu.matmul %317, %6, %cst_78 {dimension_numbers = #tpu.dot_dimension_numbers<[1], [0], [0], [1], [0, 0, 1, 1], [], []>} : vector<8x128xf32>, vector<128x512xf32>, vector<8x512xf32> -> vector<8x512xf32>
    %342 = arith.addf %340, %341 : vector<8x512xf32>
    %343 = arith.addf %342, %10 : vector<8x512xf32>
    %344 = vector.extract_strided_slice %343 {offsets = [0, 0], sizes = [8, 384], strides = [1, 1]} : vector<8x512xf32> to vector<8x384xf32>
    %345 = arith.negf %344 : vector<8x384xf32>
    %346 = math.exp %345 : vector<8x384xf32>
    %cst_79 = arith.constant 1.000000e+00 : f32
    %347 = vector.broadcast %cst_79 : f32 to vector<8x384xf32>
    %348 = arith.addf %347, %346 : vector<8x384xf32>
    %349 = arith.divf %347, %348 : vector<8x384xf32>
    %350 = vector.extract_strided_slice %349 {offsets = [0, 0], sizes = [8, 128], strides = [1, 1]} : vector<8x384xf32> to vector<8x128xf32>
    %351 = vector.extract_strided_slice %349 {offsets = [0, 128], sizes = [8, 128], strides = [1, 1]} : vector<8x384xf32> to vector<8x128xf32>
    %352 = vector.extract_strided_slice %349 {offsets = [0, 256], sizes = [8, 128], strides = [1, 1]} : vector<8x384xf32> to vector<8x128xf32>
    %353 = vector.extract_strided_slice %343 {offsets = [0, 384], sizes = [8, 128], strides = [1, 1]} : vector<8x512xf32> to vector<8x128xf32>
    %354 = math.tanh %353 : vector<8x128xf32>
    %355 = arith.mulf %351, %315 : vector<8x128xf32>
    %356 = arith.mulf %350, %354 : vector<8x128xf32>
    %357 = arith.addf %355, %356 : vector<8x128xf32>
    %358 = math.tanh %357 : vector<8x128xf32>
    %359 = arith.mulf %352, %358 : vector<8x128xf32>
    %c8_i32_80 = arith.constant 8 : i32
    %c0_81 = arith.constant 0 : index
    %c0_82 = arith.constant 0 : index
    %c0_83 = arith.constant 0 : index
    %360 = vector.load %arg5[%c0_81, %c0_82, %c0_83] : memref<2x8x128xf32, #tpu.memory_space<vmem>>, vector<1x8x128xf32>
    %361 = vector.shape_cast %360 : vector<1x8x128xf32> to vector<8x128xf32>
    %362 = vector.shape_cast %339 : vector<8x128xf32> to vector<1x8x128xf32>
    tpu.vector_store %arg5[%c0_81, %c0_82, %c0_83], %362 {strides = array<i32>} : memref<2x8x128xf32, #tpu.memory_space<vmem>>, vector<1x8x128xf32>,
    %c0_84 = arith.constant 0 : index
    %c0_85 = arith.constant 0 : index
    %c0_86 = arith.constant 0 : index
    %363 = vector.load %arg6[%c0_84, %c0_85, %c0_86] : memref<2x8x128xf32, #tpu.memory_space<vmem>>, vector<1x8x128xf32>
    %364 = vector.shape_cast %363 : vector<1x8x128xf32> to vector<8x128xf32>
    %365 = vector.shape_cast %337 : vector<8x128xf32> to vector<1x8x128xf32>
    tpu.vector_store %arg6[%c0_84, %c0_85, %c0_86], %365 {strides = array<i32>} : memref<2x8x128xf32, #tpu.memory_space<vmem>>, vector<1x8x128xf32>,
    %c1_87 = arith.constant 1 : index
    %c0_88 = arith.constant 0 : index
    %c0_89 = arith.constant 0 : index
    %366 = vector.load %arg5[%c1_87, %c0_88, %c0_89] : memref<2x8x128xf32, #tpu.memory_space<vmem>>, vector<1x8x128xf32>
    %367 = vector.shape_cast %366 : vector<1x8x128xf32> to vector<8x128xf32>
    %368 = vector.shape_cast %359 : vector<8x128xf32> to vector<1x8x128xf32>
    tpu.vector_store %arg5[%c1_87, %c0_88, %c0_89], %368 {strides = array<i32>} : memref<2x8x128xf32, #tpu.memory_space<vmem>>, vector<1x8x128xf32>,
    %c1_90 = arith.constant 1 : index
    %c0_91 = arith.constant 0 : index
    %c0_92 = arith.constant 0 : index
    %369 = vector.load %arg6[%c1_90, %c0_91, %c0_92] : memref<2x8x128xf32, #tpu.memory_space<vmem>>, vector<1x8x128xf32>
    %370 = vector.shape_cast %369 : vector<1x8x128xf32> to vector<8x128xf32>
    %371 = vector.shape_cast %357 : vector<8x128xf32> to vector<1x8x128xf32>
    tpu.vector_store %arg6[%c1_90, %c0_91, %c0_92], %371 {strides = array<i32>} : memref<2x8x128xf32, #tpu.memory_space<vmem>>, vector<1x8x128xf32>,
    return
  }
  func.func @transform_0(%arg0: i32) -> (i32, i32) {
    %c0_i32 = arith.constant 0 : i32
    %c0_i32_0 = arith.constant 0 : i32
    return %arg0, %c0_i32 : i32, i32
  }
  func.func @transform_2(%arg0: i32) -> (i32, i32) {
    %c0_i32 = arith.constant 0 : i32
    %c0_i32_0 = arith.constant 0 : i32
    %c0_i32_1 = arith.constant 0 : i32
    return %c0_i32, %c0_i32_0 : i32, i32
  }
  func.func @transform_3(%arg0: i32) -> (i32, i32) {
    %c0_i32 = arith.constant 0 : i32
    %c0_i32_0 = arith.constant 0 : i32
    %c0_i32_1 = arith.constant 0 : i32
    return %c0_i32, %c0_i32_0 : i32, i32
  }
  func.func @transform_4(%arg0: i32) -> (i32, i32, i32) {
    %c0_i32 = arith.constant 0 : i32
    %c0_i32_0 = arith.constant 0 : i32
    %c0_i32_1 = arith.constant 0 : i32
    %c0_i32_2 = arith.constant 0 : i32
    return %c0_i32, %c0_i32_0, %c0_i32_1 : i32, i32, i32
  }
  func.func @transform_5(%arg0: i32) -> (i32, i32, i32) {
    %c0_i32 = arith.constant 0 : i32
    %c0_i32_0 = arith.constant 0 : i32
    %c0_i32_1 = arith.constant 0 : i32
    %c0_i32_2 = arith.constant 0 : i32
    return %c0_i32, %c0_i32_0, %c0_i32_1 : i32, i32, i32
  }
}

</mosaic_0001>

<bundles_post_ra>
// kernel: tpu_custom_call.1
= control target key start
LH: loop header
LB: loop body
LE: loop exit
PB: predicated region body
PF: predicated region fallthrough
CT: control target
= control target key end

     0   :  { %11 = vsyncpa [#allocation6], 0  ;;  %s7980_s0 = inlined_call_operand.hbm [shape: f32[64,128], index: 0, kind: input, shape index: {}]   ;;  %s7981_s1 = inlined_call_operand.hbm [shape: f32[512,512], index: 1, kind: input, shape index: {}]   ;;  %s7982_s2 = inlined_call_operand.vmem [shape: f32[1,512], index: 2, kind: input, shape index: {}]   ;;  %s7983_s3 = inlined_call_operand.vmem [shape: f32[1,512], index: 3, kind: input, shape index: {}]   ;;  %s7984_s4 = inlined_call_operand.hbm [shape: f32[2,8,128], index: 4, kind: output, shape index: {0}]   ;;  %s7985_s5 = inlined_call_operand.hbm [shape: f32[2,8,128], index: 5, kind: output, shape index: {1}]  }
   0x1   :  { %12 = vsyncpa [#allocation7], 0 }
   0x2   :  { %13 = vsyncpa [#allocation10], 0  ;;  %s6694_s18 = smov [#allocation5]   ;;  %s6598_s22 = scalar_lea.hbm %s7980_s0, 1024 }
   0x3   :  { %s19_s19 = sshll.u32 %s6694_s18, 4  ;;  %p6599_p0 = scmp.ne.s32.totalorder %s7980_s0, %s6598_s22  ;;  %s20_s19 = int_to_ptr.vmem [resolvable:$true] %s19_s19 }
   0x4   :  { %p6602_p1 = scmp.lt.u32.totalorder %s6598_s22, %s7980_s0 }
   0x6   :  { %p6604_p2 = pnand %p6602_p1, %p6599_p0 }
   0x8   :  { %6607 = shalt.err (!%p6604_p2)
}
   0x9   :  { %s6608_s27 = scalar_lea.vmem %s20_s19, 1024  ;;  %p6613_p4 = scmp.lt.s32.totalorder %s20_s19, %s20_s19 }
   0xa   :  { %p6609_p3 = scmp.ne.s32.totalorder %s20_s19, %s6608_s27  ;;  %p6614_p5 = scmp.lt.s32.totalorder %s6608_s27, %s6608_s27 }
   0xc   :  { %p6615_p6 = por %p6614_p5, %p6613_p4 }
   0xe   :  { %p6616_p7 = pnand %p6615_p6, %p6609_p3 }
  0x10   :  { %6619 = shalt.err (!%p6616_p7)
}
  0x11   :  { %s6695_s28 = smov 128   ;;  %s6696_s29 = smov 8  }
  0x12   :  { %25 = dma.hbm_to_vmem [thread:$0]  %s7980_s0, 1024, %s20_s19, [#allocation6], %s6695_s28, %s6695_s28, %s6696_s29  }
  0x13   :  { %6686 = dma.done.wait [#allocation6], 1024  }
  0x14   :  { %6687 = vsyncadd [#allocation6], 4294966272  ;;  %s6697_s7 = smov [#allocation2]   ;;  %s6620_s11 = scalar_lea.hbm %s7981_s1, 32768 }
  0x15   :  { %s44_s8 = sshll.u32 %s6697_s7, 4  ;;  %p6621_p8 = scmp.ne.s32.totalorder %s7981_s1, %s6620_s11  ;;  %s45_s8 = int_to_ptr.vmem [resolvable:$true] %s44_s8 }
  0x16   :  { %p6624_p9 = scmp.lt.u32.totalorder %s6620_s11, %s7981_s1 }
  0x18   :  { %p6626_p10 = pnand %p6624_p9, %p6621_p8 }
  0x1a   :  { %6629 = shalt.err (!%p6626_p10)  }
  0x1b   :  { %s6630_s0 = scalar_lea.vmem %s45_s8, 32768  ;;  %p6635_p12 = scmp.lt.s32.totalorder %s45_s8, %s45_s8 }
  0x1c   :  { %p6631_p11 = scmp.ne.s32.totalorder %s45_s8, %s6630_s0  ;;  %p6636_p13 = scmp.lt.s32.totalorder %s6630_s0, %s6630_s0 }
  0x1e   :  { %p6637_p0 = por %p6636_p13, %p6635_p12 }
  0x20   :  { %p6638_p1 = pnand %p6637_p0, %p6631_p11 }
  0x22   :  { %6641 = shalt.err (!%p6638_p1)  }
  0x23   :  { %47 = dma.hbm_to_vmem [thread:$0]  %s7981_s1, 32768, %s45_s8, [#allocation4] }
  0x24   :  { %6688 = dma.done.wait [#allocation4], 32768 }
  0x25   :  { %6689 = vsyncadd [#allocation4], 4294934528  ;;  %v7986_v0 = vmov 0.0   ;;  %v57_v1 = vld [vmem:[#allocation2 + $0x8] sm:$0xff]  ;;  %v59_v3 = vld [vmem:[#allocation2 + $0x18] sm:$0xff] }
  0x26   :  { %428 = vmatprep.mubr.f32.mxu0 %v7986_v0  ;;  %541 = vmatprep.mubr.f32.mxu1 %v7986_v0  ;;  %v61_v2 = vld [vmem:[#allocation2 + $0x28] sm:$0xff]  ;;  %v63_v5 = vld [vmem:[#allocation2 + $0x38] sm:$0xff]  ;;  %v56_v6 = vld [vmem:[#allocation2] sm:$0xff] }
  0x27   :  { %v4639_v4 = vpack.c.bf16 %v61_v2, %v57_v1  ;;  %v60_v7 = vld [vmem:[#allocation2 + $0x20] sm:$0xff]  ;;  %v4671_v8 = vpack.c.bf16 %v63_v5, %v59_v3  ;;  %v58_v10 = vld [vmem:[#allocation2 + $0x10] sm:$0xff]  ;;  %v65_v12 = vld [vmem:[#allocation2 + $0x48] sm:$0xff] }
  0x28   :  { %v4641_v9 = vpack.c.bf16 %v60_v7, %v56_v6  ;;  %v62_v11 = vld [vmem:[#allocation2 + $0x30] sm:$0xff]  ;;  %v69_v14 = vld [vmem:[#allocation2 + $0x68] sm:$0xff]  ;;  %v67_v15 = vld [vmem:[#allocation2 + $0x58] sm:$0xff] }
  0x29   :  { %4640 = vmatprep.subr.bf16.mxu0 %v4639_v4  ;;  %v4673_v13 = vpack.c.bf16 %v62_v11, %v58_v10  ;;  %v71_v16 = vld [vmem:[#allocation2 + $0x78] sm:$0xff]  ;;  %4672 = vmatprep.subr.bf16.mxu1 %v4671_v8  ;;  %v4643_v17 = vpack.c.bf16 %v69_v14, %v65_v12  ;;  %v64_v19 = vld [vmem:[#allocation2 + $0x40] sm:$0xff]  ;;  %v66_v21 = vld [vmem:[#allocation2 + $0x50] sm:$0xff] }
  0x2a   :  { %4642 = vmatpush1.bf16.msra.mxu0 %v4641_v9  ;;  %v4675_v18 = vpack.c.bf16 %v71_v16, %v67_v15  ;;  %v68_v20 = vld [vmem:[#allocation2 + $0x60] sm:$0xff]  ;;  %v70_v23 = vld [vmem:[#allocation2 + $0x70] sm:$0xff]  ;;  %v73_v24 = vld [vmem:[#allocation2 + $0x88] sm:$0xff] }
  0x2b   :  { %4674 = vmatpush1.bf16.msra.mxu1 %v4673_v13  ;;  %v4645_v22 = vpack.c.bf16 %v68_v20, %v64_v19  ;;  %v77_v25 = vld [vmem:[#allocation2 + $0xa8] sm:$0xff]  ;;  %4644 = vmatprep.subr.bf16.mxu0 %v4643_v17  ;;  %v4677_v26 = vpack.c.bf16 %v70_v23, %v66_v21  ;;  %v75_v28 = vld [vmem:[#allocation2 + $0x98] sm:$0xff]  ;;  %v72_v30 = vld [vmem:[#allocation2 + $0x80] sm:$0xff] }
  0x2c   :  { %4676 = vmatprep.subr.bf16.mxu1 %v4675_v18  ;;  %v4647_v27 = vpack.c.bf16 %v77_v25, %v73_v24  ;;  %v79_v29 = vld [vmem:[#allocation2 + $0xb8] sm:$0xff]  ;;  %v76_v32 = vld [vmem:[#allocation2 + $0xa0] sm:$0xff]  ;;  %v74_v33 = vld [vmem:[#allocation2 + $0x90] sm:$0xff] }
  0x2d   :  { %v4679_v31 = vpack.c.bf16 %v79_v29, %v75_v28  ;;  %v78_v34 = vld [vmem:[#allocation2 + $0xb0] sm:$0xff]  ;;  %v4649_v35 = vpack.c.bf16 %v76_v32, %v72_v30  ;;  %v81_v36 = vld [vmem:[#allocation2 + $0xc8] sm:$0xff]  ;;  %v83_v38 = vld [vmem:[#allocation2 + $0xd8] sm:$0xff] }
  0x2e   :  { %4646 = vmatpush1.bf16.msra.mxu0 %v4645_v22  ;;  %v85_v37 = vld [vmem:[#allocation2 + $0xe8] sm:$0xff]  ;;  %v4681_v39 = vpack.c.bf16 %v78_v34, %v74_v33  ;;  %v87_v41 = vld [vmem:[#allocation2 + $0xf8] sm:$0xff]  ;;  %v80_v42 = vld [vmem:[#allocation2 + $0xc0] sm:$0xff] }
  0x2f   :  { %4678 = vmatpush1.bf16.msra.mxu1 %v4677_v26  ;;  %4648 = vmatprep.subr.bf16.mxu0 %v4647_v27  ;;  %v4651_v40 = vpack.c.bf16 %v85_v37, %v81_v36  ;;  %v84_v43 = vld [vmem:[#allocation2 + $0xe0] sm:$0xff]  ;;  %v4683_v44 = vpack.c.bf16 %v87_v41, %v83_v38  ;;  %v82_v45 = vld [vmem:[#allocation2 + $0xd0] sm:$0xff]  ;;  %v89_v47 = vld [vmem:[#allocation2 + $0x108] sm:$0xff] }
  0x30   :  { %4680 = vmatprep.subr.bf16.mxu1 %v4679_v31  ;;  %v86_v46 = vld [vmem:[#allocation2 + $0xf0] sm:$0xff]  ;;  %v93_v48 = vld [vmem:[#allocation2 + $0x128] sm:$0xff]  ;;  %v91_v49 = vld [vmem:[#allocation2 + $0x118] sm:$0xff]  ;;  %v4653_v51 = vpack.c.bf16 %v84_v43, %v80_v42 }
  0x31   :  { %v95_v50 = vld [vmem:[#allocation2 + $0x138] sm:$0xff]  ;;  %v4685_v52 = vpack.c.bf16 %v86_v46, %v82_v45  ;;  %v4655_v53 = vpack.c.bf16 %v93_v48, %v89_v47  ;;  %v88_v54 = vld [vmem:[#allocation2 + $0x100] sm:$0xff]  ;;  %v90_v56 = vld [vmem:[#allocation2 + $0x110] sm:$0xff] }
  0x32   :  { %4650 = vmatpush1.bf16.msra.mxu0 %v4649_v35  ;;  %v92_v55 = vld [vmem:[#allocation2 + $0x120] sm:$0xff]  ;;  %v4687_v57 = vpack.c.bf16 %v95_v50, %v91_v49  ;;  %v94_v58 = vld [vmem:[#allocation2 + $0x130] sm:$0xff]  ;;  %v97_v59 = vld [vmem:[#allocation2 + $0x148] sm:$0xff] }
  0x33   :  { %4682 = vmatpush1.bf16.msra.mxu1 %v4681_v39  ;;  %4652 = vmatprep.subr.bf16.mxu0 %v4651_v40  ;;  %v101_v60 = vld [vmem:[#allocation2 + $0x168] sm:$0xff]  ;;  %v99_v61 = vld [vmem:[#allocation2 + $0x158] sm:$0xff]  ;;  %v4657_v63 = vpack.c.bf16 %v92_v55, %v88_v54  ;;  %v4689_v1 = vpack.c.bf16 %v94_v58, %v90_v56  ;;  %v96_v3 = vld [vmem:[#allocation2 + $0x140] sm:$0xff] }
  0x34   :  { %4684 = vmatprep.subr.bf16.mxu1 %v4683_v44  ;;  %v103_v62 = vld [vmem:[#allocation2 + $0x178] sm:$0xff]  ;;  %v4659_v2 = vpack.c.bf16 %v101_v60, %v97_v59  ;;  %v100_v4 = vld [vmem:[#allocation2 + $0x160] sm:$0xff]  ;;  %v98_v5 = vld [vmem:[#allocation2 + $0x150] sm:$0xff] }
  0x35   :  { %v4691_v6 = vpack.c.bf16 %v103_v62, %v99_v61  ;;  %v102_v7 = vld [vmem:[#allocation2 + $0x170] sm:$0xff]  ;;  %v105_v8 = vld [vmem:[#allocation2 + $0x188] sm:$0xff]  ;;  %v107_v10 = vld [vmem:[#allocation2 + $0x198] sm:$0xff]  ;;  %v4661_v12 = vpack.c.bf16 %v100_v4, %v96_v3 }
  0x36   :  { %4654 = vmatpush1.bf16.msra.mxu0 %v4653_v51  ;;  %v109_v9 = vld [vmem:[#allocation2 + $0x1a8] sm:$0xff]  ;;  %v111_v11 = vld [vmem:[#allocation2 + $0x1b8] sm:$0xff]  ;;  %v4693_v13 = vpack.c.bf16 %v102_v7, %v98_v5  ;;  %v104_v15 = vld [vmem:[#allocation2 + $0x180] sm:$0xff] }
  0x37   :  { %4686 = vmatpush1.bf16.msra.mxu1 %v4685_v52  ;;  %4656 = vmatprep.subr.bf16.mxu0 %v4655_v53  ;;  %v4663_v14 = vpack.c.bf16 %v109_v9, %v105_v8  ;;  %v108_v16 = vld [vmem:[#allocation2 + $0x1a0] sm:$0xff]  ;;  %v106_v17 = vld [vmem:[#allocation2 + $0x190] sm:$0xff]  ;;  %v4695_v18 = vpack.c.bf16 %v111_v11, %v107_v10  ;;  %v113_v20 = vld [vmem:[#allocation2 + $0x1c8] sm:$0xff] }
  0x38   :  { %4688 = vmatprep.subr.bf16.mxu1 %v4687_v57  ;;  %v110_v19 = vld [vmem:[#allocation2 + $0x1b0] sm:$0xff]  ;;  %v117_v21 = vld [vmem:[#allocation2 + $0x1e8] sm:$0xff]  ;;  %v115_v22 = vld [vmem:[#allocation2 + $0x1d8] sm:$0xff]  ;;  %v4665_v24 = vpack.c.bf16 %v108_v16, %v104_v15 }
  0x39   :  { %v119_v23 = vld [vmem:[#allocation2 + $0x1f8] sm:$0xff]  ;;  %v4697_v25 = vpack.c.bf16 %v110_v19, %v106_v17  ;;  %v4667_v26 = vpack.c.bf16 %v117_v21, %v113_v20  ;;  %v112_v27 = vld [vmem:[#allocation2 + $0x1c0] sm:$0xff]  ;;  %v114_v29 = vld [vmem:[#allocation2 + $0x1d0] sm:$0xff] }
  0x3a   :  { %4658 = vmatpush1.bf16.msra.mxu0 %v4657_v63  ;;  %v116_v28 = vld [vmem:[#allocation2 + $0x1e0] sm:$0xff]  ;;  %v4699_v30 = vpack.c.bf16 %v119_v23, %v115_v22  ;;  %v118_v31 = vld [vmem:[#allocation2 + $0x1f0] sm:$0xff]  ;;  %v121_v32 = vld [vmem:[#allocation2 + $0x208] sm:$0xff] }
  0x3b   :  { %4690 = vmatpush1.bf16.msra.mxu1 %v4689_v1  ;;  %4660 = vmatprep.subr.bf16.mxu0 %v4659_v2  ;;  %v125_v33 = vld [vmem:[#allocation2 + $0x228] sm:$0xff]  ;;  %v123_v34 = vld [vmem:[#allocation2 + $0x218] sm:$0xff]  ;;  %v4669_v36 = vpack.c.bf16 %v116_v28, %v112_v27  ;;  %v4701_v37 = vpack.c.bf16 %v118_v31, %v114_v29  ;;  %v120_v39 = vld [vmem:[#allocation2 + $0x200] sm:$0xff] }
  0x3c   :  { %4692 = vmatprep.subr.bf16.mxu1 %v4691_v6  ;;  %v127_v35 = vld [vmem:[#allocation2 + $0x238] sm:$0xff]  ;;  %v6760_v38 = vpack.c.bf16 %v125_v33, %v121_v32  ;;  %v124_v40 = vld [vmem:[#allocation2 + $0x220] sm:$0xff]  ;;  %v122_v42 = vld [vmem:[#allocation2 + $0x210] sm:$0xff] }
  0x3d   :  { %v6762_v41 = vpack.c.bf16 %v127_v35, %v123_v34  ;;  %v126_v43 = vld [vmem:[#allocation2 + $0x230] sm:$0xff]  ;;  %v129_v44 = vld [vmem:[#allocation2 + $0x248] sm:$0xff]  ;;  %v335_v46 = vld [vmem:[#allocation5] sm:$0xff]  ;;  %v6764_v47 = vpack.c.bf16 %v124_v40, %v120_v39 }
  0x3e   :  { %4662 = vmatpush1.bf16.msra.mxu0 %v4661_v12  ;;  %8186 = vst [vmem:[#allocation19_spill] sm:$0xff] %v6760_v38  ;;  %v133_v45 = vld [vmem:[#allocation2 + $0x268] sm:$0xff]  ;;  %v131_v48 = vld [vmem:[#allocation2 + $0x258] sm:$0xff]  ;;  %v6767_v50 = vpack.c.bf16 %v126_v43, %v122_v42  ;;  %v128_v51 = vld [vmem:[#allocation2 + $0x240] sm:$0xff] }
  0x3f   :  { %4694 = vmatpush1.bf16.msra.mxu1 %v4693_v13  ;;  %4664 = vmatprep.subr.bf16.mxu0 %v4663_v14  ;;  %8187 = vst [vmem:[#allocation20_spill] sm:$0xff] %v6762_v41  ;;  %v135_v49 = vld [vmem:[#allocation2 + $0x278] sm:$0xff]  ;;  %v132_v52 = vld [vmem:[#allocation2 + $0x260] sm:$0xff]  ;;  %v6770_v53 = vpack.c.bf16 %v133_v45, %v129_v44  ;;  %v130_v54 = vld [vmem:[#allocation2 + $0x250] sm:$0xff] }
  0x40   :  { %4696 = vmatprep.subr.bf16.mxu1 %v4695_v18  ;;  %v134_v55 = vld [vmem:[#allocation2 + $0x270] sm:$0xff]  ;;  %v6772_v56 = vpack.c.bf16 %v135_v49, %v131_v48  ;;  %v137_v57 = vld [vmem:[#allocation2 + $0x288] sm:$0xff]  ;;  %v6775_v60 = vpack.c.bf16 %v132_v52, %v128_v51  ;;  %v139_v61 = vld [vmem:[#allocation2 + $0x298] sm:$0xff] }
  0x41   :  { %v141_v58 = vld [vmem:[#allocation2 + $0x2a8] sm:$0xff]  ;;  %v143_v62 = vld [vmem:[#allocation2 + $0x2b8] sm:$0xff]  ;;  %v6779_v63 = vpack.c.bf16 %v134_v55, %v130_v54  ;;  %v136_v1 = vld [vmem:[#allocation2 + $0x280] sm:$0xff] }
  0x42   :  { %4666 = vmatpush1.bf16.msra.mxu0 %v4665_v24  ;;  %v336_v59 = vld [vmem:[#allocation5 + $0x8] sm:$0xff]  ;;  %v140_v2 = vld [vmem:[#allocation2 + $0x2a0] sm:$0xff]  ;;  %v6783_v3 = vpack.c.bf16 %v141_v58, %v137_v57  ;;  %v138_v4 = vld [vmem:[#allocation2 + $0x290] sm:$0xff]  ;;  %v6786_v6 = vpack.c.bf16 %v143_v62, %v139_v61 }
  0x43   :  { %4698 = vmatpush1.bf16.msra.mxu1 %v4697_v25  ;;  %4668 = vmatprep.subr.bf16.mxu0 %v4667_v26  ;;  %v142_v5 = vld [vmem:[#allocation2 + $0x2b0] sm:$0xff]  ;;  %v145_v7 = vld [vmem:[#allocation2 + $0x2c8] sm:$0xff]  ;;  %v6789_v10 = vpack.c.bf16 %v140_v2, %v136_v1  ;;  %v147_v11 = vld [vmem:[#allocation2 + $0x2d8] sm:$0xff] }
  0x44   :  { %4700 = vmatprep.subr.bf16.mxu1 %v4699_v30  ;;  %8188 = vst [vmem:[#allocation21_spill] sm:$0xff] %v6783_v3  ;;  %8189 = vst [vmem:[#allocation22_spill] sm:$0xff] %v6786_v6  ;;  %v149_v8 = vld [vmem:[#allocation2 + $0x2e8] sm:$0xff]  ;;  %v337_v9 = vld [vmem:[#allocation5 + $0x10] sm:$0xff]  ;;  %v6793_v13 = vpack.c.bf16 %v142_v5, %v138_v4 }
  0x45   :  { %8190 = vst [vmem:[#allocation23_spill] sm:$0xff] %v6789_v10  ;;  %v151_v12 = vld [vmem:[#allocation2 + $0x2f8] sm:$0xff]  ;;  %v144_v14 = vld [vmem:[#allocation2 + $0x2c0] sm:$0xff]  ;;  %v6797_v16 = vpack.c.bf16 %v149_v8, %v145_v7  ;;  %v146_v17 = vld [vmem:[#allocation2 + $0x2d0] sm:$0xff] }
  0x46   :  { %4670 = vmatpush1.bf16.msra.mxu0 %v4669_v36  ;;  %8191 = vst [vmem:[#allocation24_spill] sm:$0xff] %v6793_v13  ;;  %v148_v15 = vld [vmem:[#allocation2 + $0x2e0] sm:$0xff]  ;;  %v150_v18 = vld [vmem:[#allocation2 + $0x2f0] sm:$0xff]  ;;  %v6800_v19 = vpack.c.bf16 %v151_v12, %v147_v11  ;;  %v153_v20 = vld [vmem:[#allocation2 + $0x308] sm:$0xff] }
  0x47   :  { %4702 = vmatpush1.bf16.msra.mxu1 %v4701_v37  ;;  %4704 = vmatprep.subr.bf16.mxu0 %v6760_v38  ;;  %8192 = vst [vmem:[#allocation25_spill] sm:$0xff] %v6797_v16  ;;  %v157_v21 = vld [vmem:[#allocation2 + $0x328] sm:$0xff]  ;;  %v338_v22 = vld [vmem:[#allocation5 + $0x18] sm:$0xff]  ;;  %v6803_v23 = vpack.c.bf16 %v148_v15, %v144_v14  ;;  %v6807_v26 = vpack.c.bf16 %v150_v18, %v146_v17  ;;  %v152_v27 = vld [vmem:[#allocation2 + $0x300] sm:$0xff] }
  0x48   :  { %4736 = vmatprep.subr.bf16.mxu1 %v6762_v41  ;;  %8193 = vst [vmem:[#allocation26_spill] sm:$0xff] %v6800_v19  ;;  %v155_v24 = vld [vmem:[#allocation2 + $0x318] sm:$0xff]  ;;  %v156_v28 = vld [vmem:[#allocation2 + $0x320] sm:$0xff]  ;;  %v6811_v29 = vpack.c.bf16 %v157_v21, %v153_v20  ;;  %v154_v30 = vld [vmem:[#allocation2 + $0x310] sm:$0xff] }
  0x49   :  { %429 = vmatmul.mubr.f32.vlgmr.msra.gmra.mrb[0].mxu0 %v335_v46  ;;  %8194 = vst [vmem:[#allocation27_spill] sm:$0xff] %v6803_v23  ;;  %v159_v25 = vld [vmem:[#allocation2 + $0x338] sm:$0xff]  ;;  %8195 = vst [vmem:[#allocation28_spill] sm:$0xff] %v6807_v26  ;;  %v158_v31 = vld [vmem:[#allocation2 + $0x330] sm:$0xff]  ;;  %v6817_v36 = vpack.c.bf16 %v156_v28, %v152_v27 }
  0x4a   :  { %542 = vmatmul.mubr.f32.vlgmr.msra.gmra.mrb[0].mxu1 %v335_v46  ;;  %4706 = vmatpush1.bf16.msra.mxu0 %v6764_v47  ;;  %8196 = vst [vmem:[#allocation29_spill] sm:$0xff] %v6811_v29  ;;  %v6814_v32 = vpack.c.bf16 %v159_v25, %v155_v24  ;;  %v161_v33 = vld [vmem:[#allocation2 + $0x348] sm:$0xff]  ;;  %v339_v35 = vld [vmem:[#allocation5 + $0x20] sm:$0xff]  ;;  %v163_v37 = vld [vmem:[#allocation2 + $0x358] sm:$0xff]  ;;  %v6821_v40 = vpack.c.bf16 %v158_v31, %v154_v30 }
  0x4b   :  { %4738 = vmatpush1.bf16.msra.mxu1 %v6767_v50  ;;  %434 = vmatprep.mubr.f32.mxu0 %v7986_v0  ;;  %v165_v34 = vld [vmem:[#allocation2 + $0x368] sm:$0xff]  ;;  %8198 = vst [vmem:[#allocation31_spill] sm:$0xff] %v6817_v36  ;;  %v167_v39 = vld [vmem:[#allocation2 + $0x378] sm:$0xff]  ;;  %v160_v42 = vld [vmem:[#allocation2 + $0x340] sm:$0xff] }
  0x4c   :  { %547 = vmatprep.mubr.f32.mxu1 %v7986_v0  ;;  %4708 = vmatprep.subr.bf16.mxu0 %v6770_v53  ;;  %8197 = vst [vmem:[#allocation30_spill] sm:$0xff] %v6814_v32  ;;  %8199 = vst [vmem:[#allocation32_spill] sm:$0xff] %v6821_v40  ;;  %v164_v43 = vld [vmem:[#allocation2 + $0x360] sm:$0xff]  ;;  %v6825_v44 = vpack.c.bf16 %v165_v34, %v161_v33  ;;  %v162_v45 = vld [vmem:[#allocation2 + $0x350] sm:$0xff]  ;;  %v6828_v48 = vpack.c.bf16 %v167_v39, %v163_v37 }
  0x4d   :  { %435 = vmatmul.mubr.f32.gmra.mrb[2].mxu0 %v336_v59  ;;  %4740 = vmatprep.subr.bf16.mxu1 %v6772_v56  ;;  %v166_v46 = vld [vmem:[#allocation2 + $0x370] sm:$0xff]  ;;  %v169_v49 = vld [vmem:[#allocation2 + $0x388] sm:$0xff]  ;;  %v6831_v54 = vpack.c.bf16 %v164_v43, %v160_v42  ;;  %v171_v55 = vld [vmem:[#allocation2 + $0x398] sm:$0xff] }
  0x4e   :  { %548 = vmatmul.mubr.f32.gmra.mrb[2].mxu1 %v336_v59  ;;  %4710 = vmatpush1.bf16.msra.mxu0 %v6775_v60  ;;  %8200 = vst [vmem:[#allocation33_spill] sm:$0xff] %v6825_v44  ;;  %8201 = vst [vmem:[#allocation34_spill] sm:$0xff] %v6828_v48  ;;  %v173_v51 = vld [vmem:[#allocation2 + $0x3a8] sm:$0xff]  ;;  %v175_v57 = vld [vmem:[#allocation2 + $0x3b8] sm:$0xff]  ;;  %v6835_v58 = vpack.c.bf16 %v166_v46, %v162_v45 }
  0x4f   :  { %4742 = vmatpush1.bf16.msra.mxu1 %v6779_v63  ;;  %440 = vmatprep.mubr.f32.mxu0 %v7986_v0  ;;  %v340_v52 = vld [vmem:[#allocation5 + $0x28] sm:$0xff]  ;;  %8202 = vst [vmem:[#allocation35_spill] sm:$0xff] %v6831_v54  ;;  %v168_v59 = vld [vmem:[#allocation2 + $0x380] sm:$0xff]  ;;  %v6839_v62 = vpack.c.bf16 %v173_v51, %v169_v49  ;;  %v170_v1 = vld [vmem:[#allocation2 + $0x390] sm:$0xff]  ;;  %v6842_v4 = vpack.c.bf16 %v175_v57, %v171_v55 }
  0x50   :  { %553 = vmatprep.mubr.f32.mxu1 %v7986_v0  ;;  %4712 = vmatprep.subr.bf16.mxu0 %v6783_v3  ;;  %8203 = vst [vmem:[#allocation36_spill] sm:$0xff] %v6835_v58  ;;  %v172_v61 = vld [vmem:[#allocation2 + $0x3a0] sm:$0xff]  ;;  %v174_v2 = vld [vmem:[#allocation2 + $0x3b0] sm:$0xff]  ;;  %v177_v5 = vld [vmem:[#allocation2 + $0x3c8] sm:$0xff] }
  0x51   :  { %441 = vmatmul.mubr.f32.gmra.mrb[4].mxu0 %v337_v9  ;;  %4744 = vmatprep.subr.bf16.mxu1 %v6786_v6  ;;  %8204 = vst [vmem:[#allocation37_spill] sm:$0xff] %v6839_v62  ;;  %8205 = vst [vmem:[#allocation38_spill] sm:$0xff] %v6842_v4  ;;  %v181_v7 = vld [vmem:[#allocation2 + $0x3e8] sm:$0xff]  ;;  %v341_v8 = vld [vmem:[#allocation5 + $0x30] sm:$0xff]  ;;  %v6849_v14 = vpack.c.bf16 %v174_v2, %v170_v1 }
  0x52   :  { %554 = vmatmul.mubr.f32.gmra.mrb[4].mxu1 %v337_v9  ;;  %4714 = vmatpush1.bf16.msra.mxu0 %v6789_v10  ;;  %v6845_v9 = vpack.c.bf16 %v172_v61, %v168_v59  ;;  %v179_v11 = vld [vmem:[#allocation2 + $0x3d8] sm:$0xff]  ;;  %v176_v15 = vld [vmem:[#allocation2 + $0x3c0] sm:$0xff]  ;;  %v6853_v18 = vpack.c.bf16 %v181_v7, %v177_v5  ;;  %v178_v20 = vld [vmem:[#allocation2 + $0x3d0] sm:$0xff] }
  0x53   :  { %4746 = vmatpush1.bf16.msra.mxu1 %v6793_v13  ;;  %446 = vmatprep.mubr.f32.mxu0 %v7986_v0  ;;  %v183_v12 = vld [vmem:[#allocation2 + $0x3f8] sm:$0xff]  ;;  %8207 = vst [vmem:[#allocation40_spill] sm:$0xff] %v6849_v14  ;;  %v180_v17 = vld [vmem:[#allocation2 + $0x3e0] sm:$0xff]  ;;  %v182_v21 = vld [vmem:[#allocation2 + $0x3f0] sm:$0xff] }
  0x54   :  { %559 = vmatprep.mubr.f32.mxu1 %v7986_v0  ;;  %4716 = vmatprep.subr.bf16.mxu0 %v6797_v16  ;;  %8206 = vst [vmem:[#allocation39_spill] sm:$0xff] %v6845_v9  ;;  %8208 = vst [vmem:[#allocation41_spill] sm:$0xff] %v6853_v18  ;;  %v249_v24 = vld [vmem:[#allocation2 + $0x608] sm:$0xff]  ;;  %v342_v27 = vld [vmem:[#allocation5 + $0x38] sm:$0xff]  ;;  %v6859_v28 = vpack.c.bf16 %v180_v17, %v176_v15  ;;  %v6863_v33 = vpack.c.bf16 %v182_v21, %v178_v20 }
  0x55   :  { %447 = vmatmul.mubr.f32.gmra.mrb[6].mxu0 %v338_v22  ;;  %4748 = vmatprep.subr.bf16.mxu1 %v6800_v19  ;;  %v253_v25 = vld [vmem:[#allocation2 + $0x628] sm:$0xff]  ;;  %v251_v30 = vld [vmem:[#allocation2 + $0x618] sm:$0xff]  ;;  %v248_v34 = vld [vmem:[#allocation2 + $0x600] sm:$0xff] }
  0x56   :  { %560 = vmatmul.mubr.f32.gmra.mrb[6].mxu1 %v338_v22  ;;  %4718 = vmatpush1.bf16.msra.mxu0 %v6803_v23  ;;  %v6856_v22 = vpack.c.bf16 %v183_v12, %v179_v11  ;;  %8210 = vst [vmem:[#allocation43_spill] sm:$0xff] %v6859_v28  ;;  %v255_v31 = vld [vmem:[#allocation2 + $0x638] sm:$0xff]  ;;  %8211 = vst [vmem:[#allocation44_spill] sm:$0xff] %v6863_v33  ;;  %v250_v37 = vld [vmem:[#allocation2 + $0x610] sm:$0xff]  ;;  %v6867_v39 = vpack.c.bf16 %v253_v25, %v249_v24 }
  0x57   :  { %4750 = vmatpush1.bf16.msra.mxu1 %v6807_v26  ;;  %452 = vmatprep.mubr.f32.mxu0 %v7986_v0  ;;  %v254_v42 = vld [vmem:[#allocation2 + $0x630] sm:$0xff]  ;;  %v257_v43 = vld [vmem:[#allocation2 + $0x648] sm:$0xff]  ;;  %v6870_v46 = vpack.c.bf16 %v255_v31, %v251_v30  ;;  %v259_v49 = vld [vmem:[#allocation2 + $0x658] sm:$0xff] }
  0x58   :  { %565 = vmatprep.mubr.f32.mxu1 %v7986_v0  ;;  %4720 = vmatprep.subr.bf16.mxu0 %v6811_v29  ;;  %8209 = vst [vmem:[#allocation42_spill] sm:$0xff] %v6856_v22  ;;  %8212 = vst [vmem:[#allocation45_spill] sm:$0xff] %v6867_v39  ;;  %v261_v45 = vld [vmem:[#allocation2 + $0x668] sm:$0xff]  ;;  %v263_v51 = vld [vmem:[#allocation2 + $0x678] sm:$0xff]  ;;  %v6877_v55 = vpack.c.bf16 %v254_v42, %v250_v37 }
  0x59   :  { %453 = vmatmul.mubr.f32.gmra.mrb[8].mxu0 %v339_v35  ;;  %4752 = vmatprep.subr.bf16.mxu1 %v6814_v32  ;;  %8213 = vst [vmem:[#allocation46_spill] sm:$0xff] %v6870_v46  ;;  %v6879_v57 = vpack.c.bf16 %v261_v45, %v257_v43  ;;  %v256_v59 = vld [vmem:[#allocation2 + $0x640] sm:$0xff]  ;;  %v258_v1 = vld [vmem:[#allocation2 + $0x650] sm:$0xff]  ;;  %v6883_v2 = vpack.c.bf16 %v263_v51, %v259_v49  ;;  %v265_v7 = vld [vmem:[#allocation2 + $0x688] sm:$0xff] }
  0x5a   :  { %566 = vmatmul.mubr.f32.gmra.mrb[8].mxu1 %v339_v35  ;;  %4722 = vmatpush1.bf16.msra.mxu0 %v6817_v36  ;;  %v252_v35 = vld [vmem:[#allocation2 + $0x620] sm:$0xff]  ;;  %8215 = vst [vmem:[#allocation48_spill] sm:$0xff] %v6877_v55  ;;  %v262_v5 = vld [vmem:[#allocation2 + $0x670] sm:$0xff]  ;;  %v267_v11 = vld [vmem:[#allocation2 + $0x698] sm:$0xff] }
  0x5b   :  { %4754 = vmatpush1.bf16.msra.mxu1 %v6821_v40  ;;  %458 = vmatprep.mubr.f32.mxu0 %v7986_v0  ;;  %8216 = vst [vmem:[#allocation49_spill] sm:$0xff] %v6879_v57  ;;  %v260_v61 = vld [vmem:[#allocation2 + $0x660] sm:$0xff]  ;;  %8217 = vst [vmem:[#allocation50_spill] sm:$0xff] %v6883_v2  ;;  %v271_v12 = vld [vmem:[#allocation2 + $0x6b8] sm:$0xff]  ;;  %v6893_v17 = vpack.c.bf16 %v262_v5, %v258_v1 }
  0x5c   :  { %571 = vmatprep.mubr.f32.mxu1 %v7986_v0  ;;  %4724 = vmatprep.subr.bf16.mxu0 %v6825_v44  ;;  %v6889_v15 = vpack.c.bf16 %v260_v61, %v256_v59  ;;  %v264_v21 = vld [vmem:[#allocation2 + $0x680] sm:$0xff]  ;;  %v266_v25 = vld [vmem:[#allocation2 + $0x690] sm:$0xff]  ;;  %v273_v31 = vld [vmem:[#allocation2 + $0x6c8] sm:$0xff] }
  0x5d   :  { %459 = vmatmul.mubr.f32.gmra.mrb[10].mxu0 %v340_v52  ;;  %4756 = vmatprep.subr.bf16.mxu1 %v6828_v48  ;;  %8219 = vst [vmem:[#allocation52_spill] sm:$0xff] %v6893_v17  ;;  %v268_v24 = vld [vmem:[#allocation2 + $0x6a0] sm:$0xff]  ;;  %v270_v30 = vld [vmem:[#allocation2 + $0x6b0] sm:$0xff]  ;;  %v279_v37 = vld [vmem:[#allocation2 + $0x6f8] sm:$0xff] }
  0x5e   :  { %572 = vmatmul.mubr.f32.gmra.mrb[10].mxu1 %v340_v52  ;;  %4726 = vmatpush1.bf16.msra.mxu0 %v6831_v54  ;;  %v6873_v52 = vpack.c.bf16 %v252_v35, %v248_v34  ;;  %8218 = vst [vmem:[#allocation51_spill] sm:$0xff] %v6889_v15  ;;  %v277_v34 = vld [vmem:[#allocation2 + $0x6e8] sm:$0xff]  ;;  %v275_v35 = vld [vmem:[#allocation2 + $0x6d8] sm:$0xff]  ;;  %v6903_v42 = vpack.c.bf16 %v268_v24, %v264_v21  ;;  %v272_v49 = vld [vmem:[#allocation2 + $0x6c0] sm:$0xff] }
  0x5f   :  { %4758 = vmatpush1.bf16.msra.mxu1 %v6835_v58  ;;  %464 = vmatprep.mubr.f32.mxu0 %v7986_v0  ;;  %v6907_v43 = vpack.c.bf16 %v270_v30, %v266_v25  ;;  %v6909_v45 = vpack.c.bf16 %v277_v34, %v273_v31  ;;  %v276_v51 = vld [vmem:[#allocation2 + $0x6e0] sm:$0xff]  ;;  %v274_v59 = vld [vmem:[#allocation2 + $0x6d0] sm:$0xff]  ;;  %v6912_v61 = vpack.c.bf16 %v279_v37, %v275_v35  ;;  %v281_v5 = vld [vmem:[#allocation2 + $0x708] sm:$0xff] }
  0x60   :  { %577 = vmatprep.mubr.f32.mxu1 %v7986_v0  ;;  %4728 = vmatprep.subr.bf16.mxu0 %v6839_v62  ;;  %8214 = vst [vmem:[#allocation47_spill] sm:$0xff] %v6873_v52  ;;  %8222 = vst [vmem:[#allocation55_spill] sm:$0xff] %v6903_v42  ;;  %v278_v1 = vld [vmem:[#allocation2 + $0x6f0] sm:$0xff]  ;;  %v280_v25 = vld [vmem:[#allocation2 + $0x700] sm:$0xff] }
  0x61   :  { %465 = vmatmul.mubr.f32.gmra.mrb[12].mxu0 %v341_v8  ;;  %4760 = vmatprep.subr.bf16.mxu1 %v6842_v4  ;;  %8223 = vst [vmem:[#allocation56_spill] sm:$0xff] %v6907_v43  ;;  %8224 = vst [vmem:[#allocation57_spill] sm:$0xff] %v6909_v45  ;;  %v6919_v21 = vpack.c.bf16 %v278_v1, %v274_v59  ;;  %v284_v30 = vld [vmem:[#allocation2 + $0x720] sm:$0xff]  ;;  %v282_v34 = vld [vmem:[#allocation2 + $0x710] sm:$0xff] }
  0x62   :  { %578 = vmatmul.mubr.f32.gmra.mrb[12].mxu1 %v341_v8  ;;  %4730 = vmatpush1.bf16.msra.mxu0 %v6845_v9  ;;  %v269_v8 = vld [vmem:[#allocation2 + $0x6a8] sm:$0xff]  ;;  %8225 = vst [vmem:[#allocation58_spill] sm:$0xff] %v6912_v61  ;;  %v286_v35 = vld [vmem:[#allocation2 + $0x730] sm:$0xff]  ;;  %v6927_v37 = vpack.c.bf16 %v284_v30, %v280_v25  ;;  %v291_v1 = vld [vmem:[#allocation2 + $0x758] sm:$0xff] }
  0x63   :  { %4762 = vmatpush1.bf16.msra.mxu1 %v6849_v14  ;;  %470 = vmatprep.mubr.f32.mxu0 %v7986_v0  ;;  %v6895_v20 = vpack.c.bf16 %v269_v8, %v265_v7  ;;  %v285_v7 = vld [vmem:[#allocation2 + $0x728] sm:$0xff]  ;;  %v283_v8 = vld [vmem:[#allocation2 + $0x718] sm:$0xff]  ;;  %8227 = vst [vmem:[#allocation60_spill] sm:$0xff] %v6919_v21 }
  0x64   :  { %583 = vmatprep.mubr.f32.mxu1 %v7986_v0  ;;  %4732 = vmatprep.subr.bf16.mxu0 %v6853_v18  ;;  %v6921_v24 = vpack.c.bf16 %v285_v7, %v281_v5  ;;  %8230 = vst [vmem:[#allocation63_spill] sm:$0xff] %v6927_v37  ;;  %v293_v59 = vld [vmem:[#allocation2 + $0x768] sm:$0xff]  ;;  %v295_v7 = vld [vmem:[#allocation2 + $0x778] sm:$0xff] }
  0x65   :  { %471 = vmatmul.mubr.f32.gmra.mrb[14].mxu0 %v342_v27  ;;  %4764 = vmatprep.subr.bf16.mxu1 %v6856_v22  ;;  %8220 = vst [vmem:[#allocation53_spill] sm:$0xff] %v6895_v20  ;;  %v6938_v25 = vpack.c.bf16 %v295_v7, %v291_v1  ;;  %v303_v1 = vld [vmem:[#allocation2 + $0x7b8] sm:$0xff]  ;;  %v296_v7 = vld [vmem:[#allocation2 + $0x780] sm:$0xff] }
  0x66   :  { %584 = vmatmul.mubr.f32.gmra.mrb[14].mxu1 %v342_v27  ;;  %4734 = vmatpush1.bf16.msra.mxu0 %v6859_v28  ;;  %v6898_v27 = vpack.c.bf16 %v271_v12, %v267_v11  ;;  %v287_v11 = vld [vmem:[#allocation2 + $0x738] sm:$0xff]  ;;  %v6915_v12 = vpack.c.bf16 %v276_v51, %v272_v49  ;;  %8228 = vst [vmem:[#allocation61_spill] sm:$0xff] %v6921_v24  ;;  %v289_v51 = vld [vmem:[#allocation2 + $0x748] sm:$0xff] }
  0x67   :  { %4766 = vmatpush1.bf16.msra.mxu1 %v6863_v33  ;;  %699 = vmatprep.mubr.f32.mxu0 %v7986_v0  ;;  %v6924_v31 = vpack.c.bf16 %v287_v11, %v283_v8  ;;  %v6931_v49 = vpack.c.bf16 %v286_v35, %v282_v34  ;;  %v6936_v5 = vpack.c.bf16 %v293_v59, %v289_v51  ;;  %v288_v8 = vld [vmem:[#allocation2 + $0x740] sm:$0xff]  ;;  %v290_v34 = vld [vmem:[#allocation2 + $0x750] sm:$0xff]  ;;  %v301_v51 = vld [vmem:[#allocation2 + $0x7a8] sm:$0xff] }
  0x68   :  { %770 = vmatprep.mubr.f32.mxu1 %v7986_v0  ;;  %4768 = vmatprep.subr.bf16.mxu0 %v6867_v39  ;;  %8221 = vst [vmem:[#allocation54_spill] sm:$0xff] %v6898_v27  ;;  %8226 = vst [vmem:[#allocation59_spill] sm:$0xff] %v6915_v12  ;;  %v292_v11 = vld [vmem:[#allocation2 + $0x760] sm:$0xff]  ;;  %v294_v35 = vld [vmem:[#allocation2 + $0x770] sm:$0xff] }
  0x69   :  { %700 = vmatmul.mubr.f32.vlgmr.msra.gmra.mrb[0].mxu0 %v7986_v0  ;;  %4800 = vmatprep.subr.bf16.mxu1 %v6870_v46  ;;  %8229 = vst [vmem:[#allocation62_spill] sm:$0xff] %v6924_v31  ;;  %8231 = vst [vmem:[#allocation64_spill] sm:$0xff] %v6931_v49  ;;  %v6940_v30 = vpack.c.bf16 %v292_v11, %v288_v8  ;;  %v299_v59 = vld [vmem:[#allocation2 + $0x798] sm:$0xff]  ;;  %v300_v8 = vld [vmem:[#allocation2 + $0x7a0] sm:$0xff] }
  0x6a   :  { %771 = vmatmul.mubr.f32.vlgmr.msra.gmra.mrb[0].mxu1 %v7986_v0  ;;  %4770 = vmatpush1.bf16.msra.mxu0 %v6873_v52  ;;  %8232 = vst [vmem:[#allocation65_spill] sm:$0xff] %v6936_v5  ;;  %8233 = vst [vmem:[#allocation66_spill] sm:$0xff] %v6938_v25  ;;  %v6950_v11 = vpack.c.bf16 %v303_v1, %v299_v59  ;;  %v311_v59 = vld [vmem:[#allocation2 + $0x7f8] sm:$0xff]  ;;  %v304_v1 = vld [vmem:[#allocation2 + $0x7c0] sm:$0xff] }
  0x6b   :  { %4802 = vmatpush1.bf16.msra.mxu1 %v6877_v55  ;;  %4772 = vmatprep.subr.bf16.mxu0 %v6879_v57  ;;  %8234 = vst [vmem:[#allocation67_spill] sm:$0xff] %v6940_v30 }
  0x6c   :  { %4804 = vmatprep.subr.bf16.mxu1 %v6883_v2  ;;  %869 = vmatprep.mubr.f32.mxu0 %v7986_v0  ;;  %8237 = vst [vmem:[#allocation70_spill] sm:$0xff] %v6950_v11 }
  0x6d   :  { %940 = vmatprep.mubr.f32.mxu1 %v7986_v0  ;;  %v6943_v0 = vpack.c.bf16 %v294_v35, %v290_v34  ;;  %v298_v34 = vld [vmem:[#allocation2 + $0x790] sm:$0xff] }
  0x6e   :  { %4774 = vmatpush1.bf16.msra.mxu0 %v6889_v15  ;;  %v302_v35 = vld [vmem:[#allocation2 + $0x7b0] sm:$0xff] }
  0x6f   :  { %4806 = vmatpush1.bf16.msra.mxu1 %v6893_v17  ;;  %4776 = vmatprep.subr.bf16.mxu0 %v6895_v20  ;;  %8235 = vst [vmem:[#allocation68_spill] sm:$0xff] %v6943_v0 }
  0x70   :  { %4808 = vmatprep.subr.bf16.mxu1 %v6898_v27 }
  0x72   :  { %4778 = vmatpush1.bf16.msra.mxu0 %v6903_v42 }
  0x73   :  { %4810 = vmatpush1.bf16.msra.mxu1 %v6907_v43  ;;  %4780 = vmatprep.subr.bf16.mxu0 %v6909_v45 }
  0x74   :  { %4812 = vmatprep.subr.bf16.mxu1 %v6912_v61 }
  0x76   :  { %4782 = vmatpush1.bf16.msra.mxu0 %v6915_v12  ;;  %v239_v12 = vld [vmem:[#allocation2 + $0x5b8] sm:$0xff] }
  0x77   :  { %4814 = vmatpush1.bf16.msra.mxu1 %v6919_v21  ;;  %4784 = vmatprep.subr.bf16.mxu0 %v6921_v24  ;;  %v237_v21 = vld [vmem:[#allocation2 + $0x5a8] sm:$0xff] }
  0x78   :  { %4816 = vmatprep.subr.bf16.mxu1 %v6924_v31  ;;  %v6952_v31 = vpack.c.bf16 %v300_v8, %v296_v7  ;;  %v308_v7 = vld [vmem:[#allocation2 + $0x7e0] sm:$0xff] }
  0x7a   :  { %4786 = vmatpush1.bf16.msra.mxu0 %v6927_v37  ;;  %8238 = vst [vmem:[#allocation71_spill] sm:$0xff] %v6952_v31 }
  0x7b   :  { %4818 = vmatpush1.bf16.msra.mxu1 %v6931_v49  ;;  %4788 = vmatprep.subr.bf16.mxu0 %v6936_v5  ;;  %v297_v49 = vld [vmem:[#allocation2 + $0x788] sm:$0xff]  ;;  %v6964_v5 = vpack.c.bf16 %v308_v7, %v304_v1  ;;  %v188_v1 = vld [vmem:[#allocation2 + $0x420] sm:$0xff] }
  0x7c   :  { %4820 = vmatprep.subr.bf16.mxu1 %v6938_v25  ;;  %v6948_v37 = vpack.c.bf16 %v301_v51, %v297_v49  ;;  %v6955_v25 = vpack.c.bf16 %v302_v35, %v298_v34  ;;  %v309_v49 = vld [vmem:[#allocation2 + $0x7e8] sm:$0xff]  ;;  %v307_v51 = vld [vmem:[#allocation2 + $0x7d8] sm:$0xff]  ;;  %v306_v34 = vld [vmem:[#allocation2 + $0x7d0] sm:$0xff] }
  0x7d   :  { %v6962_v8 = vpack.c.bf16 %v311_v59, %v307_v51  ;;  %8242 = vst [vmem:[#allocation75_spill] sm:$0xff] %v6964_v5  ;;  %v310_v35 = vld [vmem:[#allocation2 + $0x7f0] sm:$0xff]  ;;  %v191_v51 = vld [vmem:[#allocation2 + $0x438] sm:$0xff]  ;;  %v184_v59 = vld [vmem:[#allocation2 + $0x400] sm:$0xff] }
  0x7e   :  { %4790 = vmatpush1.bf16.msra.mxu0 %v6940_v30  ;;  %8236 = vst [vmem:[#allocation69_spill] sm:$0xff] %v6948_v37  ;;  %8239 = vst [vmem:[#allocation72_spill] sm:$0xff] %v6955_v25 }
  0x7f   :  { %4822 = vmatpush1.bf16.msra.mxu1 %v6943_v0  ;;  %4792 = vmatprep.subr.bf16.mxu0 %v6948_v37  ;;  %v305_v0 = vld [vmem:[#allocation2 + $0x7c8] sm:$0xff]  ;;  %8241 = vst [vmem:[#allocation74_spill] sm:$0xff] %v6962_v8  ;;  %v6976_v37 = vpack.c.bf16 %v188_v1, %v184_v59  ;;  %v192_v59 = vld [vmem:[#allocation2 + $0x440] sm:$0xff] }
  0x80   :  { %4824 = vmatprep.subr.bf16.mxu1 %v6950_v11  ;;  %v6960_v30 = vpack.c.bf16 %v309_v49, %v305_v0  ;;  %v6967_v11 = vpack.c.bf16 %v310_v35, %v306_v34  ;;  %v189_v0 = vld [vmem:[#allocation2 + $0x428] sm:$0xff]  ;;  %v187_v49 = vld [vmem:[#allocation2 + $0x418] sm:$0xff]  ;;  %v186_v34 = vld [vmem:[#allocation2 + $0x410] sm:$0xff] }
  0x81   :  { %v6974_v7 = vpack.c.bf16 %v191_v51, %v187_v49  ;;  %8246 = vst [vmem:[#allocation79_spill] sm:$0xff] %v6976_v37  ;;  %v190_v35 = vld [vmem:[#allocation2 + $0x430] sm:$0xff]  ;;  %v199_v51 = vld [vmem:[#allocation2 + $0x478] sm:$0xff]  ;;  %v196_v1 = vld [vmem:[#allocation2 + $0x460] sm:$0xff] }
  0x82   :  { %4794 = vmatpush1.bf16.msra.mxu0 %v6952_v31  ;;  %8240 = vst [vmem:[#allocation73_spill] sm:$0xff] %v6960_v30  ;;  %8243 = vst [vmem:[#allocation76_spill] sm:$0xff] %v6967_v11 }
  0x83   :  { %4826 = vmatpush1.bf16.msra.mxu1 %v6955_v25  ;;  %4796 = vmatprep.subr.bf16.mxu0 %v6960_v30  ;;  %v185_v25 = vld [vmem:[#allocation2 + $0x408] sm:$0xff]  ;;  %8245 = vst [vmem:[#allocation78_spill] sm:$0xff] %v6974_v7 }
  0x84   :  { %4828 = vmatprep.subr.bf16.mxu1 %v6962_v8  ;;  %v6972_v31 = vpack.c.bf16 %v189_v0, %v185_v25  ;;  %v8247_v8 = vmov 0.0   ;;  %v193_v25 = vld [vmem:[#allocation2 + $0x448] sm:$0xff] }
  0x85   :  { %v197_v0 = vld [vmem:[#allocation2 + $0x468] sm:$0xff] }
  0x86   :  { %4798 = vmatpush1.bf16.msra.mxu0 %v6964_v5  ;;  %8244 = vst [vmem:[#allocation77_spill] sm:$0xff] %v6972_v31  ;;  %v6980_v5 = vpack.c.bf16 %v190_v35, %v186_v34  ;;  %v6986_v49 = vpack.c.bf16 %v197_v0, %v193_v25  ;;  %v6990_v34 = vpack.c.bf16 %v196_v1, %v192_v59  ;;  %v194_v35 = vld [vmem:[#allocation2 + $0x450] sm:$0xff]  ;;  %v201_v25 = vld [vmem:[#allocation2 + $0x488] sm:$0xff]  ;;  %v200_v59 = vld [vmem:[#allocation2 + $0x480] sm:$0xff] }
  0x87   :  { %4830 = vmatpush1.bf16.msra.mxu1 %v6967_v11  ;;  %4832 = vmatprep.subr.bf16.mxu0 %v6972_v31  ;;  %v195_v11 = vld [vmem:[#allocation2 + $0x458] sm:$0xff]  ;;  %v205_v0 = vld [vmem:[#allocation2 + $0x4a8] sm:$0xff]  ;;  %v204_v1 = vld [vmem:[#allocation2 + $0x4a0] sm:$0xff] }
  0x88   :  { %8248 = vst [vmem:[#allocation80_spill] sm:$0xff] %v6980_v5  ;;  %4864 = vmatprep.subr.bf16.mxu1 %v6974_v7  ;;  %8249 = vst [vmem:[#allocation81_spill] sm:$0xff] %v6986_v49  ;;  %v6988_v31 = vpack.c.bf16 %v199_v51, %v195_v11  ;;  %v198_v7 = vld [vmem:[#allocation2 + $0x470] sm:$0xff]  ;;  %v7000_v11 = vpack.c.bf16 %v205_v0, %v201_v25  ;;  %v207_v51 = vld [vmem:[#allocation2 + $0x4b8] sm:$0xff]  ;;  %v7004_v24 = vpack.c.bf16 %v204_v1, %v200_v59 }
  0x89   :  { %870 = vmatmul.mubr.f32.vlgmr.msra.gmra.mrb[16].mxu0 %v8247_v8  ;;  %8251 = vst [vmem:[#allocation83_spill] sm:$0xff] %v6990_v34  ;;  %v208_v0 = vld [vmem:[#allocation2 + $0x4c0] sm:$0xff] }
  0x8a   :  { %941 = vmatmul.mubr.f32.vlgmr.msra.gmra.mrb[16].mxu1 %v8247_v8  ;;  %4834 = vmatpush1.bf16.msra.mxu0 %v6976_v37  ;;  %8250 = vst [vmem:[#allocation82_spill] sm:$0xff] %v6988_v31  ;;  %v6995_v37 = vpack.c.bf16 %v198_v7, %v194_v35  ;;  %8253 = vst [vmem:[#allocation85_spill] sm:$0xff] %v7000_v11  ;;  %v202_v7 = vld [vmem:[#allocation2 + $0x490] sm:$0xff] }
  0x8b   :  { %4866 = vmatpush1.bf16.msra.mxu1 %v6980_v5  ;;  %1011 = vmatprep.mubr.f32.mxu0 %v8247_v8  ;;  %v203_v5 = vld [vmem:[#allocation2 + $0x498] sm:$0xff]  ;;  %8255 = vst [vmem:[#allocation87_spill] sm:$0xff] %v7004_v24  ;;  %v206_v35 = vld [vmem:[#allocation2 + $0x4b0] sm:$0xff] }
  0x8c   :  { %1082 = vmatprep.mubr.f32.mxu1 %v8247_v8  ;;  %4836 = vmatprep.subr.bf16.mxu0 %v6986_v49  ;;  %8252 = vst [vmem:[#allocation84_spill] sm:$0xff] %v6995_v37  ;;  %v7002_v30 = vpack.c.bf16 %v207_v51, %v203_v5  ;;  %v213_v49 = vld [vmem:[#allocation2 + $0x4e8] sm:$0xff]  ;;  %v215_v5 = vld [vmem:[#allocation2 + $0x4f8] sm:$0xff]  ;;  %v212_v51 = vld [vmem:[#allocation2 + $0x4e0] sm:$0xff] }
  0x8d   :  { %4868 = vmatprep.subr.bf16.mxu1 %v6988_v31  ;;  %v7007_v31 = vpack.c.bf16 %v206_v35, %v202_v7  ;;  %v7016_v1 = vpack.c.bf16 %v212_v51, %v208_v0  ;;  %v210_v7 = vld [vmem:[#allocation2 + $0x4d0] sm:$0xff] }
  0x8e   :  { %4838 = vmatpush1.bf16.msra.mxu0 %v6990_v34  ;;  %8254 = vst [vmem:[#allocation86_spill] sm:$0xff] %v7002_v30  ;;  %v209_v34 = vld [vmem:[#allocation2 + $0x4c8] sm:$0xff]  ;;  %v214_v35 = vld [vmem:[#allocation2 + $0x4f0] sm:$0xff] }
  0x8f   :  { %4870 = vmatpush1.bf16.msra.mxu1 %v6995_v37  ;;  %4840 = vmatprep.subr.bf16.mxu0 %v7000_v11  ;;  %8256 = vst [vmem:[#allocation88_spill] sm:$0xff] %v7007_v31  ;;  %v211_v37 = vld [vmem:[#allocation2 + $0x4d8] sm:$0xff]  ;;  %v7012_v25 = vpack.c.bf16 %v213_v49, %v209_v34  ;;  %8259 = vst [vmem:[#allocation91_spill] sm:$0xff] %v7016_v1  ;;  %v221_v11 = vld [vmem:[#allocation2 + $0x528] sm:$0xff] }
  0x90   :  { %4872 = vmatprep.subr.bf16.mxu1 %v7002_v30  ;;  %v7014_v59 = vpack.c.bf16 %v215_v5, %v211_v37  ;;  %v7019_v30 = vpack.c.bf16 %v214_v35, %v210_v7  ;;  %v223_v37 = vld [vmem:[#allocation2 + $0x538] sm:$0xff]  ;;  %v216_v34 = vld [vmem:[#allocation2 + $0x500] sm:$0xff]  ;;  %v218_v7 = vld [vmem:[#allocation2 + $0x510] sm:$0xff] }
  0x91   :  { %8257 = vst [vmem:[#allocation89_spill] sm:$0xff] %v7012_v25  ;;  %v220_v5 = vld [vmem:[#allocation2 + $0x520] sm:$0xff]  ;;  %v222_v35 = vld [vmem:[#allocation2 + $0x530] sm:$0xff] }
  0x92   :  { %4842 = vmatpush1.bf16.msra.mxu0 %v7004_v24  ;;  %8258 = vst [vmem:[#allocation90_spill] sm:$0xff] %v7014_v59  ;;  %8260 = vst [vmem:[#allocation92_spill] sm:$0xff] %v7019_v30  ;;  %v217_v24 = vld [vmem:[#allocation2 + $0x508] sm:$0xff]  ;;  %v7028_v51 = vpack.c.bf16 %v220_v5, %v216_v34 }
  0x93   :  { %4874 = vmatpush1.bf16.msra.mxu1 %v7007_v31  ;;  %4844 = vmatprep.subr.bf16.mxu0 %v7012_v25  ;;  %v219_v31 = vld [vmem:[#allocation2 + $0x518] sm:$0xff]  ;;  %v7024_v49 = vpack.c.bf16 %v221_v11, %v217_v24  ;;  %v229_v25 = vld [vmem:[#allocation2 + $0x568] sm:$0xff]  ;;  %v224_v11 = vld [vmem:[#allocation2 + $0x540] sm:$0xff] }
  0x94   :  { %4876 = vmatprep.subr.bf16.mxu1 %v7014_v59  ;;  %v7026_v0 = vpack.c.bf16 %v223_v37, %v219_v31  ;;  %8263 = vst [vmem:[#allocation95_spill] sm:$0xff] %v7028_v51  ;;  %v7031_v59 = vpack.c.bf16 %v222_v35, %v218_v7  ;;  %v231_v31 = vld [vmem:[#allocation2 + $0x578] sm:$0xff]  ;;  %v228_v37 = vld [vmem:[#allocation2 + $0x560] sm:$0xff]  ;;  %v226_v7 = vld [vmem:[#allocation2 + $0x550] sm:$0xff] }
  0x95   :  { %8261 = vst [vmem:[#allocation93_spill] sm:$0xff] %v7024_v49  ;;  %v7040_v5 = vpack.c.bf16 %v228_v37, %v224_v11  ;;  %v230_v35 = vld [vmem:[#allocation2 + $0x570] sm:$0xff] }
  0x96   :  { %4846 = vmatpush1.bf16.msra.mxu0 %v7016_v1  ;;  %8262 = vst [vmem:[#allocation94_spill] sm:$0xff] %v7026_v0  ;;  %8264 = vst [vmem:[#allocation96_spill] sm:$0xff] %v7031_v59  ;;  %v225_v1 = vld [vmem:[#allocation2 + $0x548] sm:$0xff]  ;;  %v234_v11 = vld [vmem:[#allocation2 + $0x590] sm:$0xff] }
  0x97   :  { %4878 = vmatpush1.bf16.msra.mxu1 %v7019_v30  ;;  %4848 = vmatprep.subr.bf16.mxu0 %v7024_v49  ;;  %v227_v30 = vld [vmem:[#allocation2 + $0x558] sm:$0xff]  ;;  %v7036_v24 = vpack.c.bf16 %v229_v25, %v225_v1  ;;  %8267 = vst [vmem:[#allocation99_spill] sm:$0xff] %v7040_v5  ;;  %v233_v49 = vld [vmem:[#allocation2 + $0x588] sm:$0xff] }
  0x98   :  { %4880 = vmatprep.subr.bf16.mxu1 %v7026_v0  ;;  %v7038_v34 = vpack.c.bf16 %v231_v31, %v227_v30  ;;  %v7043_v0 = vpack.c.bf16 %v230_v35, %v226_v7  ;;  %v7046_v25 = vpack.c.bf16 %v237_v21, %v233_v49  ;;  %v232_v30 = vld [vmem:[#allocation2 + $0x580] sm:$0xff]  ;;  %v238_v7 = vld [vmem:[#allocation2 + $0x5b0] sm:$0xff]  ;;  %v241_v35 = vld [vmem:[#allocation2 + $0x5c8] sm:$0xff] }
  0x99   :  { %8265 = vst [vmem:[#allocation97_spill] sm:$0xff] %v7036_v24  ;;  %v236_v31 = vld [vmem:[#allocation2 + $0x5a0] sm:$0xff]  ;;  %v7056_v21 = vpack.c.bf16 %v238_v7, %v234_v11  ;;  %v243_v49 = vld [vmem:[#allocation2 + $0x5d8] sm:$0xff] }
  0x9a   :  { %4850 = vmatpush1.bf16.msra.mxu0 %v7028_v51  ;;  %8266 = vst [vmem:[#allocation98_spill] sm:$0xff] %v7038_v34  ;;  %8268 = vst [vmem:[#allocation100_spill] sm:$0xff] %v7043_v0  ;;  %v235_v51 = vld [vmem:[#allocation2 + $0x598] sm:$0xff]  ;;  %v7052_v37 = vpack.c.bf16 %v236_v31, %v232_v30  ;;  %v246_v30 = vld [vmem:[#allocation2 + $0x5f0] sm:$0xff] }
  0x9b   :  { %4882 = vmatpush1.bf16.msra.mxu1 %v7031_v59  ;;  %4852 = vmatprep.subr.bf16.mxu0 %v7036_v24  ;;  %8269 = vst [vmem:[#allocation101_spill] sm:$0xff] %v7046_v25  ;;  %v7048_v1 = vpack.c.bf16 %v239_v12, %v235_v51  ;;  %v245_v24 = vld [vmem:[#allocation2 + $0x5e8] sm:$0xff]  ;;  %8272 = vst [vmem:[#allocation104_spill] sm:$0xff] %v7056_v21  ;;  %v247_v51 = vld [vmem:[#allocation2 + $0x5f8] sm:$0xff] }
  0x9c   :  { %4884 = vmatprep.subr.bf16.mxu1 %v7038_v34  ;;  %8271 = vst [vmem:[#allocation103_spill] sm:$0xff] %v7052_v37  ;;  %v7058_v12 = vpack.c.bf16 %v245_v24, %v241_v35  ;;  %v240_v34 = vld [vmem:[#allocation2 + $0x5c0] sm:$0xff]  ;;  %v7060_v59 = vpack.c.bf16 %v247_v51, %v243_v49  ;;  %v315_v24 = vlaneseq }
  0x9d   :  { %8270 = vst [vmem:[#allocation102_spill] sm:$0xff] %v7048_v1 }
  0x9e   :  { %4854 = vmatpush1.bf16.msra.mxu0 %v7040_v5  ;;  %8273 = vst [vmem:[#allocation105_spill] sm:$0xff] %v7058_v12  ;;  %8274 = vst [vmem:[#allocation106_spill] sm:$0xff] %v7060_v59  ;;  %v244_v5 = vld [vmem:[#allocation2 + $0x5e0] sm:$0xff]  ;;  %v7074_v11 = vshrl.u32 %v315_v24, 7 }
  0x9f   :  { %4886 = vmatpush1.bf16.msra.mxu1 %v7043_v0  ;;  %4856 = vmatprep.subr.bf16.mxu0 %v7046_v25  ;;  %v242_v0 = vld [vmem:[#allocation2 + $0x5d0] sm:$0xff]  ;;  %v7064_v31 = vpack.c.bf16 %v244_v5, %v240_v34 }
  0xa0   :  { %4888 = vmatprep.subr.bf16.mxu1 %v7048_v1  ;;  %v7066_v25 = vpack.c.bf16 %v246_v30, %v242_v0  ;;  %v8084_v34 = vsub.s32 0, %v7074_v11  ;;  %v312_v0 = vld [vmem:[%s7982_s2] sm:$0xf]  ;;  %v8085_v5 = vsub.s32 1, %v7074_v11  ;;  %v8094_v51 = vsub.s32 2, %v7074_v11 }
  0xa1   :  { %8275 = vst [vmem:[#allocation107_spill] sm:$0xff] %v7064_v31 }
  0xa2   :  { %4858 = vmatpush1.bf16.msra.mxu0 %v7052_v37  ;;  %8276 = vst [vmem:[#allocation108_spill] sm:$0xff] %v7066_v25  ;;  %v7083_v7 = vrot.slane %v312_v0, %v8084_v34  ;;  %v7087_v35 = vrot.slane %v312_v0, %v8085_v5  ;;  %v8101_v5 = vsub.s32 3, %v7074_v11 }
  0xa3   :  { %4890 = vmatpush1.bf16.msra.mxu1 %v7056_v21  ;;  %4860 = vmatprep.subr.bf16.mxu0 %v7058_v12 }
  0xa4   :  { %4892 = vmatprep.subr.bf16.mxu1 %v7060_v59  ;;  %8277 = vst [vmem:[#allocation109_spill] sm:$0xff] %v7083_v7  ;;  %8278 = vst [vmem:[#allocation110_spill] sm:$0xff] %v7087_v35  ;;  %v7094_v59 = vrot.slane %v312_v0, %v8094_v51 }
  0xa6   :  { %4862 = vmatpush1.bf16.msra.mxu0 %v7064_v31  ;;  %8279 = vst [vmem:[#allocation111_spill] sm:$0xff] %v7094_v59 }
  0xa7   :  { %4894 = vmatpush1.bf16.msra.mxu1 %v7066_v25  ;;  %4896 = vmatprep.subr.bf16.mxu0 %v6760_v38 }
  0xa8   :  { %4928 = vmatprep.subr.bf16.mxu1 %v6762_v41 }
 0x13c   :  { %v701_v49 = vpop.f32.mrb[0].mxu0 }
 0x13d   :  { %v6239_v30 = vadd.f32 %v701_v49, %v7083_v7  ;;  %v772_v24 = vpop.f32.mrb[0].mxu1  ;;  %v703_v41 = vpop.f32.mrb[1].mxu0  ;;  %v7100_v49 = vrot.slane %v312_v0, %v8101_v5  ;;  %v8295_v5 = vld [vmem:[#allocation74_spill] sm:$0xff] }
 0x13e   :  { %v6240_v38 = vadd.f32 %v703_v41, %v7087_v35  ;;  %v774_v25 = vpop.f32.mrb[1].mxu1  ;;  %v6255_v12 = vadd.f32 %v772_v24, %v7094_v59 }
 0x13f   :  { %v4590_v31 = vmul.f32 -1.442695, %v6239_v30  ;;  %v6256_v41 = vadd.f32 %v774_v25, %v7100_v49 }
 0x140   :  { %v4591_v34 = vmul.f32 -1.442695, %v6240_v38  ;;  %v4592_v21 = vmul.f32 -1.442695, %v6255_v12  ;;  %v8282_v12 = vld [vmem:[#allocation61_spill] sm:$0xff] }
 0x141   :  { %6342 = vpow2.f32 %v4590_v31 }
 0x142   :  { %6344 = vpow2.f32 %v4591_v34 }
 0x143   :  { %6346 = vpow2.f32 %v4592_v21 }
 0x144   :  { %6348 = vtanh.f32 %v6256_v41  ;;  %v8286_v41 = vld [vmem:[#allocation65_spill] sm:$0xff] }
 0x14b   :  { %v6343_v37 = vpop.eup %6342 }
 0x14c   :  { %v790_v30 = vadd.f32 1.0, %v6343_v37  ;;  %v6345_v1 = vpop.eup %6344 }
 0x14d   :  { %v791_v38 = vadd.f32 1.0, %v6345_v1  ;;  %v6347_v31 = vpop.eup %6346  ;;  %v8281_v1 = vld [vmem:[#allocation60_spill] sm:$0xff] }
 0x14e   :  { %6350 = vrcp.f32 %v790_v30  ;;  %v6349_v51 = vpop.eup %6348  ;;  %v792_v59 = vadd.f32 1.0, %v6347_v31  ;;  %v8287_v30 = vld [vmem:[#allocation66_spill] sm:$0xff]  ;;  %v8289_v31 = vld [vmem:[#allocation68_spill] sm:$0xff] }
 0x14f   :  { %6352 = vrcp.f32 %v791_v38  ;;  %v8288_v38 = vld [vmem:[#allocation67_spill] sm:$0xff] }
 0x150   :  { %6354 = vrcp.f32 %v792_v59  ;;  %v8280_v59 = vld [vmem:[#allocation59_spill] sm:$0xff] }
 0x158   :  { %v6351_v34 = vpop.eup %6350 }
 0x159   :  { %v801_v35 = vmul.f32 %v6351_v34, %v6349_v51  ;;  %v6353_v24 = vpop.eup %6352  ;;  %v8285_v51 = vld [vmem:[#allocation64_spill] sm:$0xff]  ;;  %v8290_v34 = vld [vmem:[#allocation69_spill] sm:$0xff] }
 0x15a   :  { %v800_v7 = vmul.f32 0.0, %v6353_v24  ;;  %v6355_v25 = vpop.eup %6354  ;;  %v8291_v24 = vld [vmem:[#allocation70_spill] sm:$0xff] }
 0x15c   :  { %v7103_v0 = vadd.f32 %v801_v35, %v800_v7  ;;  %v8283_v7 = vld [vmem:[#allocation62_spill] sm:$0xff]  ;;  %v8284_v35 = vld [vmem:[#allocation63_spill] sm:$0xff] }
 0x15e   :  { %6356 = vtanh.f32 %v7103_v0 }
 0x168   :  { %v6357_v37 = vpop.eup %6356 }
 0x169   :  { %v804_v21 = vmul.f32 %v6357_v37, %v6355_v25  ;;  %v8292_v25 = vld [vmem:[#allocation71_spill] sm:$0xff]  ;;  %v8293_v37 = vld [vmem:[#allocation72_spill] sm:$0xff] }
 0x16b   :  { %1012 = vmatmul.mubr.f32.vlgmr.msra.gmra.mrb[16].mxu0 %v804_v21  ;;  %1083 = vmatmul.mubr.f32.vlgmr.msra.gmra.mrb[16].mxu1 %v804_v21 }
 0x16c   :  { %4898 = vmatpush1.bf16.msra.mxu0 %v6764_v47  ;;  %4930 = vmatpush1.bf16.msra.mxu1 %v6767_v50 }
 0x16d   :  { %4900 = vmatprep.subr.bf16.mxu0 %v6770_v53  ;;  %4932 = vmatprep.subr.bf16.mxu1 %v6772_v56 }
 0x16e   :  { %1188 = vmatprep.mubr.f32.mxu0 %v8247_v8  ;;  %1259 = vmatprep.mubr.f32.mxu1 %v8247_v8 }
 0x170   :  { %4902 = vmatpush1.bf16.msra.mxu0 %v6775_v60  ;;  %4934 = vmatpush1.bf16.msra.mxu1 %v6779_v63 }
 0x171   :  { %4904 = vmatprep.subr.bf16.mxu0 %v6783_v3  ;;  %4936 = vmatprep.subr.bf16.mxu1 %v6786_v6 }
 0x174   :  { %4906 = vmatpush1.bf16.msra.mxu0 %v6789_v10  ;;  %4938 = vmatpush1.bf16.msra.mxu1 %v6793_v13 }
 0x175   :  { %4908 = vmatprep.subr.bf16.mxu0 %v6797_v16  ;;  %4940 = vmatprep.subr.bf16.mxu1 %v6800_v19 }
 0x178   :  { %4910 = vmatpush1.bf16.msra.mxu0 %v6803_v23  ;;  %4942 = vmatpush1.bf16.msra.mxu1 %v6807_v26 }
 0x179   :  { %4912 = vmatprep.subr.bf16.mxu0 %v6811_v29  ;;  %4944 = vmatprep.subr.bf16.mxu1 %v6814_v32 }
 0x17c   :  { %4914 = vmatpush1.bf16.msra.mxu0 %v6817_v36  ;;  %4946 = vmatpush1.bf16.msra.mxu1 %v6821_v40 }
 0x17d   :  { %4916 = vmatprep.subr.bf16.mxu0 %v6825_v44  ;;  %4948 = vmatprep.subr.bf16.mxu1 %v6828_v48 }
 0x180   :  { %4918 = vmatpush1.bf16.msra.mxu0 %v6831_v54  ;;  %4950 = vmatpush1.bf16.msra.mxu1 %v6835_v58 }
 0x181   :  { %4920 = vmatprep.subr.bf16.mxu0 %v6839_v62  ;;  %4952 = vmatprep.subr.bf16.mxu1 %v6842_v4 }
 0x184   :  { %4922 = vmatpush1.bf16.msra.mxu0 %v6845_v9  ;;  %4954 = vmatpush1.bf16.msra.mxu1 %v6849_v14 }
 0x185   :  { %4924 = vmatprep.subr.bf16.mxu0 %v6853_v18  ;;  %4956 = vmatprep.subr.bf16.mxu1 %v6856_v22 }
 0x188   :  { %4926 = vmatpush1.bf16.msra.mxu0 %v6859_v28  ;;  %4958 = vmatpush1.bf16.msra.mxu1 %v6863_v33 }
 0x189   :  { %4960 = vmatprep.subr.bf16.mxu0 %v6867_v39  ;;  %4992 = vmatprep.subr.bf16.mxu1 %v6870_v46 }
 0x18b   :  { %1189 = vmatmul.mubr.f32.vlgmr.msra.gmra.mrb[2].mxu0 %v804_v21  ;;  %1260 = vmatmul.mubr.f32.vlgmr.msra.gmra.mrb[2].mxu1 %v804_v21  ;;  %v8294_v21 = vld [vmem:[#allocation73_spill] sm:$0xff] }
 0x18c   :  { %4962 = vmatpush1.bf16.msra.mxu0 %v6873_v52  ;;  %4994 = vmatpush1.bf16.msra.mxu1 %v6877_v55 }
 0x18d   :  { %4964 = vmatprep.subr.bf16.mxu0 %v6879_v57  ;;  %4996 = vmatprep.subr.bf16.mxu1 %v6883_v2 }
 0x18e   :  { %1358 = vmatprep.mubr.f32.mxu0 %v8247_v8  ;;  %1429 = vmatprep.mubr.f32.mxu1 %v8247_v8 }
 0x190   :  { %4966 = vmatpush1.bf16.msra.mxu0 %v6889_v15  ;;  %4998 = vmatpush1.bf16.msra.mxu1 %v6893_v17 }
 0x191   :  { %4968 = vmatprep.subr.bf16.mxu0 %v6895_v20  ;;  %5000 = vmatprep.subr.bf16.mxu1 %v6898_v27 }
 0x194   :  { %4970 = vmatpush1.bf16.msra.mxu0 %v6903_v42  ;;  %5002 = vmatpush1.bf16.msra.mxu1 %v6907_v43 }
 0x195   :  { %4972 = vmatprep.subr.bf16.mxu0 %v6909_v45  ;;  %5004 = vmatprep.subr.bf16.mxu1 %v6912_v61 }
 0x198   :  { %4974 = vmatpush1.bf16.msra.mxu0 %v8280_v59  ;;  %5006 = vmatpush1.bf16.msra.mxu1 %v8281_v1 }
 0x199   :  { %4976 = vmatprep.subr.bf16.mxu0 %v8282_v12  ;;  %5008 = vmatprep.subr.bf16.mxu1 %v8283_v7  ;;  %v8304_v12 = vsub.s32 2, %v7074_v11 }
 0x19c   :  { %4978 = vmatpush1.bf16.msra.mxu0 %v8284_v35  ;;  %5010 = vmatpush1.bf16.msra.mxu1 %v8285_v51  ;;  %v8296_v51 = vld [vmem:[#allocation75_spill] sm:$0xff] }
 0x19d   :  { %4980 = vmatprep.subr.bf16.mxu0 %v8286_v41  ;;  %5012 = vmatprep.subr.bf16.mxu1 %v8287_v30  ;;  %v8297_v41 = vld [vmem:[#allocation76_spill] sm:$0xff]  ;;  %v8298_v30 = vld [vmem:[#allocation77_spill] sm:$0xff] }
 0x1a0   :  { %4982 = vmatpush1.bf16.msra.mxu0 %v8288_v38  ;;  %5014 = vmatpush1.bf16.msra.mxu1 %v8289_v31  ;;  %v8299_v38 = vld [vmem:[#allocation78_spill] sm:$0xff] }
 0x1a1   :  { %4984 = vmatprep.subr.bf16.mxu0 %v8290_v34  ;;  %5016 = vmatprep.subr.bf16.mxu1 %v8291_v24  ;;  %v313_v24 = vld [vmem:[%s7983_s3] sm:$0xf]  ;;  %s6699_s3 = smov [#allocation9]  }
 0x1a2   :  { %v7189_v1 = vrot.slane %v313_v24, %v8304_v12  ;;  %s4561_s20 = sshll.u32 %s6699_s3, 4  ;;  %s4562_s20 = int_to_ptr.vmem [resolvable:$true] %s4561_s20 }
 0x1a3   :  { %s6642_s21 = scalar_lea.vmem %s4562_s20, 256  ;;  %p6647_p3 = scmp.lt.s32.totalorder %s4562_s20, %s4562_s20 }
 0x1a4   :  { %4986 = vmatpush1.bf16.msra.mxu0 %v8292_v25  ;;  %5018 = vmatpush1.bf16.msra.mxu1 %v8293_v37  ;;  %v8300_v25 = vsub.s32 0, %v7074_v11  ;;  %8305 = vst [vmem:[#allocation114_spill] sm:$0xff] %v7189_v1  ;;  %p6643_p2 = scmp.ne.s32.totalorder %s4562_s20, %s6642_s21  ;;  %p6648_p4 = scmp.lt.s32.totalorder %s6642_s21, %s6642_s21 }
 0x1a5   :  { %4988 = vmatprep.subr.bf16.mxu0 %v8294_v21  ;;  %5020 = vmatprep.subr.bf16.mxu1 %v8295_v5  ;;  %v8302_v21 = vsub.s32 1, %v7074_v11 }
 0x1a6   :  { %v7179_v34 = vrot.slane %v313_v24, %v8300_v25  ;;  %v8306_v25 = vsub.s32 3, %v7074_v11  ;;  %p6649_p5 = por %p6648_p4, %p6647_p3 }
 0x1a7   :  { %v7183_v37 = vrot.slane %v313_v24, %v8302_v21 }
 0x1a8   :  { %4990 = vmatpush1.bf16.msra.mxu0 %v8296_v51  ;;  %5022 = vmatpush1.bf16.msra.mxu1 %v8297_v41  ;;  %8301 = vst [vmem:[#allocation112_spill] sm:$0xff] %v7179_v34  ;;  %v7193_v21 = vrot.slane %v313_v24, %v8306_v25  ;;  %p6650_p6 = pnand %p6649_p5, %p6643_p2 }
 0x1a9   :  { %5024 = vmatprep.subr.bf16.mxu0 %v8298_v30  ;;  %5056 = vmatprep.subr.bf16.mxu1 %v8299_v38  ;;  %8303 = vst [vmem:[#allocation113_spill] sm:$0xff] %v7183_v37 }
 0x1aa   :  { %8307 = vst [vmem:[#allocation115_spill] sm:$0xff] %v7193_v21 }
 0x23e   :  { %v1013_v5 = vpop.f32.mrb[16].mxu0  ;;  %v1084_v51 = vpop.f32.mrb[16].mxu1 }
 0x23f   :  { %v1089_v41 = vadd.f32 %v1013_v5, %v7179_v34  ;;  %v1015_v31 = vpop.f32.mrb[17].mxu0  ;;  %v1086_v30 = vpop.f32.mrb[17].mxu1  ;;  %v1091_v59 = vadd.f32 %v1084_v51, %v7189_v1 }
 0x240   :  { %v1090_v38 = vadd.f32 %v1015_v31, %v7183_v37  ;;  %v1092_v5 = vadd.f32 %v1086_v30, %v7193_v21 }
 0x241   :  { %v4593_v35 = vmul.f32 -1.442695, %v1089_v41  ;;  %v4595_v34 = vmul.f32 -1.442695, %v1091_v59  ;;  %v8308_v59 = vld [vmem:[#allocation109_spill] sm:$0xff] }
 0x242   :  { %v4594_v7 = vmul.f32 -1.442695, %v1090_v38 }
 0x243   :  { %6358 = vpow2.f32 %v4593_v35 }
 0x244   :  { %6360 = vpow2.f32 %v4594_v7 }
 0x245   :  { %6362 = vtanh.f32 %v1092_v5 }
 0x246   :  { %6364 = vpow2.f32 %v4595_v34  ;;  %v8309_v34 = vld [vmem:[#allocation110_spill] sm:$0xff] }
 0x24d   :  { %v6359_v61 = vpop.eup %6358 }
 0x24e   :  { %v1102_v45 = vadd.f32 1.0, %v6359_v61  ;;  %v6361_v41 = vpop.eup %6360 }
 0x24f   :  { %v1103_v35 = vadd.f32 1.0, %v6361_v41  ;;  %v6363_v12 = vpop.eup %6362 }
 0x250   :  { %6366 = vrcp.f32 %v1102_v45  ;;  %v6365_v38 = vpop.eup %6364 }
 0x251   :  { %6368 = vrcp.f32 %v1103_v35  ;;  %v1104_v24 = vadd.f32 1.0, %v6365_v38 }
 0x253   :  { %6370 = vrcp.f32 %v1104_v24 }
 0x25a   :  { %v6367_v7 = vpop.eup %6366 }
 0x25b   :  { %v1113_v31 = vmul.f32 %v6367_v7, %v6363_v12  ;;  %v6369_v11 = vpop.eup %6368  ;;  %v8310_v12 = vld [vmem:[#allocation111_spill] sm:$0xff] }
 0x25c   :  { %v1112_v25 = vmul.f32 0.0, %v6369_v11 }
 0x25d   :  { %v6371_v7 = vpop.eup %6370 }
 0x25e   :  { %v1190_v37 = vpop.f32.mrb[2].mxu0  ;;  %v1261_v51 = vpop.f32.mrb[2].mxu1  ;;  %v7197_v1 = vadd.f32 %v1113_v31, %v1112_v25 }
 0x25f   :  { %v6241_v30 = vadd.f32 %v1190_v37, %v8308_v59  ;;  %v1192_v61 = vpop.f32.mrb[3].mxu0  ;;  %v1263_v5 = vpop.f32.mrb[3].mxu1  ;;  %v6257_v38 = vadd.f32 %v1261_v51, %v8310_v12  ;;  %v8313_v51 = vld [vmem:[#allocation81_spill] sm:$0xff] }
 0x260   :  { %v6242_v45 = vadd.f32 %v1192_v61, %v8309_v34  ;;  %6372 = vtanh.f32 %v7197_v1  ;;  %v6258_v11 = vadd.f32 %v1263_v5, %v7100_v49  ;;  %v8311_v61 = vld [vmem:[#allocation79_spill] sm:$0xff] }
 0x261   :  { %v4596_v41 = vmul.f32 -1.442695, %v6241_v30  ;;  %v4598_v25 = vmul.f32 -1.442695, %v6257_v38  ;;  %v8312_v30 = vld [vmem:[#allocation80_spill] sm:$0xff]  ;;  %v8315_v5 = vld [vmem:[#allocation83_spill] sm:$0xff] }
 0x262   :  { %v4597_v35 = vmul.f32 -1.442695, %v6242_v45  ;;  %v8318_v38 = vld [vmem:[#allocation86_spill] sm:$0xff] }
 0x263   :  { %6374 = vpow2.f32 %v4596_v41  ;;  %v8314_v41 = vld [vmem:[#allocation82_spill] sm:$0xff] }
 0x264   :  { %6376 = vpow2.f32 %v4597_v35  ;;  %v8317_v35 = vld [vmem:[#allocation85_spill] sm:$0xff] }
 0x265   :  { %6378 = vtanh.f32 %v6258_v11 }
 0x266   :  { %6380 = vpow2.f32 %v4598_v25  ;;  %v8322_v25 = vld [vmem:[#allocation90_spill] sm:$0xff] }
 0x26a   :  { %v6373_v31 = vpop.eup %6372 }
 0x26b   :  { %v1116_v21 = vmul.f32 %v6373_v31, %v6371_v7  ;;  %v8319_v7 = vld [vmem:[#allocation87_spill] sm:$0xff]  ;;  %v8321_v31 = vld [vmem:[#allocation89_spill] sm:$0xff] }
 0x26d   :  { %v6375_v37 = vpop.eup %6374  ;;  %1359 = vmatmul.mubr.f32.vlgmr.msra.gmra.mrb[18].mxu0 %v1116_v21  ;;  %1430 = vmatmul.mubr.f32.vlgmr.msra.gmra.mrb[18].mxu1 %v1116_v21  ;;  %v8316_v21 = vld [vmem:[#allocation84_spill] sm:$0xff] }
 0x26e   :  { %v1279_v59 = vadd.f32 1.0, %v6375_v37  ;;  %v6377_v24 = vpop.eup %6376  ;;  %5026 = vmatpush1.bf16.msra.mxu0 %v8311_v61  ;;  %5058 = vmatpush1.bf16.msra.mxu1 %v8312_v30 }
 0x26f   :  { %v1280_v45 = vadd.f32 1.0, %v6377_v24  ;;  %5028 = vmatprep.subr.bf16.mxu0 %v8313_v51  ;;  %5060 = vmatprep.subr.bf16.mxu1 %v8314_v41  ;;  %v6379_v11 = vpop.eup %6378  ;;  %v8323_v41 = vld [vmem:[#allocation91_spill] sm:$0xff]  ;;  %v8325_v51 = vld [vmem:[#allocation93_spill] sm:$0xff] }
 0x270   :  { %6382 = vrcp.f32 %v1279_v59  ;;  %1500 = vmatprep.mubr.f32.mxu0 %v8247_v8  ;;  %1571 = vmatprep.mubr.f32.mxu1 %v8247_v8  ;;  %v8320_v59 = vld [vmem:[#allocation88_spill] sm:$0xff]  ;;  %v6381_v37 = vpop.eup %6380 }
 0x271   :  { %6384 = vrcp.f32 %v1280_v45 }
 0x272   :  { %5030 = vmatpush1.bf16.msra.mxu0 %v8315_v5  ;;  %5062 = vmatpush1.bf16.msra.mxu1 %v8316_v21  ;;  %v8324_v5 = vld [vmem:[#allocation92_spill] sm:$0xff] }
 0x273   :  { %5032 = vmatprep.subr.bf16.mxu0 %v8317_v35  ;;  %5064 = vmatprep.subr.bf16.mxu1 %v8318_v38  ;;  %v1281_v35 = vadd.f32 1.0, %v6381_v37  ;;  %v8326_v38 = vld [vmem:[#allocation94_spill] sm:$0xff]  ;;  %v8331_v37 = vld [vmem:[#allocation99_spill] sm:$0xff] }
 0x275   :  { %6386 = vrcp.f32 %v1281_v35  ;;  %v8338_v35 = vld [vmem:[#allocation106_spill] sm:$0xff] }
 0x276   :  { %5034 = vmatpush1.bf16.msra.mxu0 %v8319_v7  ;;  %5066 = vmatpush1.bf16.msra.mxu1 %v8320_v59 }
 0x277   :  { %5036 = vmatprep.subr.bf16.mxu0 %v8321_v31  ;;  %5068 = vmatprep.subr.bf16.mxu1 %v8322_v25  ;;  %v8327_v31 = vld [vmem:[#allocation95_spill] sm:$0xff]  ;;  %v8328_v25 = vld [vmem:[#allocation96_spill] sm:$0xff] }
 0x27a   :  { %v6383_v24 = vpop.eup %6382  ;;  %5038 = vmatpush1.bf16.msra.mxu0 %v8323_v41  ;;  %5070 = vmatpush1.bf16.msra.mxu1 %v8324_v5 }
 0x27b   :  { %v1290_v45 = vmul.f32 %v6383_v24, %v6379_v11  ;;  %v6385_v21 = vpop.eup %6384  ;;  %5040 = vmatprep.subr.bf16.mxu0 %v8325_v51  ;;  %5072 = vmatprep.subr.bf16.mxu1 %v8326_v38  ;;  %v8329_v11 = vld [vmem:[#allocation97_spill] sm:$0xff]  ;;  %v8330_v24 = vld [vmem:[#allocation98_spill] sm:$0xff]  ;;  %v8332_v51 = vld [vmem:[#allocation100_spill] sm:$0xff] }
 0x27c   :  { %v1289_v59 = vmul.f32 %v6385_v21, %v7103_v0  ;;  %v8333_v38 = vld [vmem:[#allocation101_spill] sm:$0xff]  ;;  %v8334_v0 = vld [vmem:[#allocation102_spill] sm:$0xff]  ;;  %v8335_v21 = vld [vmem:[#allocation103_spill] sm:$0xff] }
 0x27e   :  { %v7223_v7 = vadd.f32 %v1290_v45, %v1289_v59  ;;  %5042 = vmatpush1.bf16.msra.mxu0 %v8327_v31  ;;  %5074 = vmatpush1.bf16.msra.mxu1 %v8328_v25  ;;  %v8336_v59 = vld [vmem:[#allocation104_spill] sm:$0xff]  ;;  %v8337_v45 = vld [vmem:[#allocation105_spill] sm:$0xff]  ;;  %v8339_v25 = vld [vmem:[#allocation107_spill] sm:$0xff] }
 0x27f   :  { %5044 = vmatprep.subr.bf16.mxu0 %v8329_v11  ;;  %5076 = vmatprep.subr.bf16.mxu1 %v8330_v24  ;;  %v6387_v11 = vpop.eup %6386  ;;  %v8340_v31 = vld [vmem:[#allocation108_spill] sm:$0xff] }
 0x280   :  { %6388 = vtanh.f32 %v7223_v7 }
 0x282   :  { %5046 = vmatpush1.bf16.msra.mxu0 %v8331_v37  ;;  %5078 = vmatpush1.bf16.msra.mxu1 %v8332_v51  ;;  %v8341_v51 = vld [vmem:[#allocation19_spill] sm:$0xff] }
 0x283   :  { %5048 = vmatprep.subr.bf16.mxu0 %v8333_v38  ;;  %5080 = vmatprep.subr.bf16.mxu1 %v8334_v0  ;;  %v8342_v38 = vld [vmem:[#allocation20_spill] sm:$0xff] }
 0x286   :  { %5050 = vmatpush1.bf16.msra.mxu0 %v8335_v21  ;;  %5082 = vmatpush1.bf16.msra.mxu1 %v8336_v59 }
 0x287   :  { %5052 = vmatprep.subr.bf16.mxu0 %v8337_v45  ;;  %5084 = vmatprep.subr.bf16.mxu1 %v8338_v35 }
 0x28a   :  { %v6389_v24 = vpop.eup %6388  ;;  %5054 = vmatpush1.bf16.msra.mxu0 %v8339_v25  ;;  %5086 = vmatpush1.bf16.msra.mxu1 %v8340_v31 }
 0x28b   :  { %v1293_v37 = vmul.f32 %v6389_v24, %v6387_v11  ;;  %5088 = vmatprep.subr.bf16.mxu0 %v8341_v51  ;;  %5120 = vmatprep.subr.bf16.mxu1 %v8342_v38  ;;  %v8343_v11 = vld [vmem:[#allocation57_spill] sm:$0xff]  ;;  %v8344_v24 = vld [vmem:[#allocation58_spill] sm:$0xff] }
 0x28d   :  { %1501 = vmatmul.mubr.f32.vlgmr.msra.gmra.mrb[18].mxu0 %v1293_v37  ;;  %1572 = vmatmul.mubr.f32.vlgmr.msra.gmra.mrb[18].mxu1 %v1293_v37 }
 0x28e   :  { %5090 = vmatpush1.bf16.msra.mxu0 %v6764_v47  ;;  %5122 = vmatpush1.bf16.msra.mxu1 %v6767_v50 }
 0x28f   :  { %5092 = vmatprep.subr.bf16.mxu0 %v6770_v53  ;;  %5124 = vmatprep.subr.bf16.mxu1 %v6772_v56 }
 0x290   :  { %1677 = vmatprep.mubr.f32.mxu0 %v8247_v8  ;;  %1748 = vmatprep.mubr.f32.mxu1 %v8247_v8 }
 0x292   :  { %5094 = vmatpush1.bf16.msra.mxu0 %v6775_v60  ;;  %5126 = vmatpush1.bf16.msra.mxu1 %v6779_v63 }
 0x293   :  { %5096 = vmatprep.subr.bf16.mxu0 %v6783_v3  ;;  %5128 = vmatprep.subr.bf16.mxu1 %v6786_v6 }
 0x296   :  { %5098 = vmatpush1.bf16.msra.mxu0 %v6789_v10  ;;  %5130 = vmatpush1.bf16.msra.mxu1 %v6793_v13 }
 0x297   :  { %5100 = vmatprep.subr.bf16.mxu0 %v6797_v16  ;;  %5132 = vmatprep.subr.bf16.mxu1 %v6800_v19 }
 0x29a   :  { %5102 = vmatpush1.bf16.msra.mxu0 %v6803_v23  ;;  %5134 = vmatpush1.bf16.msra.mxu1 %v6807_v26 }
 0x29b   :  { %5104 = vmatprep.subr.bf16.mxu0 %v6811_v29  ;;  %5136 = vmatprep.subr.bf16.mxu1 %v6814_v32 }
 0x29e   :  { %5106 = vmatpush1.bf16.msra.mxu0 %v6817_v36  ;;  %5138 = vmatpush1.bf16.msra.mxu1 %v6821_v40 }
 0x29f   :  { %5108 = vmatprep.subr.bf16.mxu0 %v6825_v44  ;;  %5140 = vmatprep.subr.bf16.mxu1 %v6828_v48 }
 0x2a2   :  { %5110 = vmatpush1.bf16.msra.mxu0 %v6831_v54  ;;  %5142 = vmatpush1.bf16.msra.mxu1 %v6835_v58 }
 0x2a3   :  { %5112 = vmatprep.subr.bf16.mxu0 %v6839_v62  ;;  %5144 = vmatprep.subr.bf16.mxu1 %v6842_v4 }
 0x2a6   :  { %5114 = vmatpush1.bf16.msra.mxu0 %v6845_v9  ;;  %5146 = vmatpush1.bf16.msra.mxu1 %v6849_v14 }
 0x2a7   :  { %5116 = vmatprep.subr.bf16.mxu0 %v6853_v18  ;;  %5148 = vmatprep.subr.bf16.mxu1 %v6856_v22 }
 0x2aa   :  { %5118 = vmatpush1.bf16.msra.mxu0 %v6859_v28  ;;  %5150 = vmatpush1.bf16.msra.mxu1 %v6863_v33  ;;  %v8368_v33 = vld [vmem:[#allocation115_spill] sm:$0xff] }
 0x2ab   :  { %5152 = vmatprep.subr.bf16.mxu0 %v6867_v39  ;;  %5184 = vmatprep.subr.bf16.mxu1 %v6870_v46  ;;  %v8366_v46 = vld [vmem:[#allocation113_spill] sm:$0xff] }
 0x2ad   :  { %1678 = vmatmul.mubr.f32.vlgmr.msra.gmra.mrb[4].mxu0 %v1293_v37  ;;  %1749 = vmatmul.mubr.f32.vlgmr.msra.gmra.mrb[4].mxu1 %v1293_v37  ;;  %v8345_v37 = vld [vmem:[#allocation59_spill] sm:$0xff] }
 0x2ae   :  { %5154 = vmatpush1.bf16.msra.mxu0 %v6873_v52  ;;  %5186 = vmatpush1.bf16.msra.mxu1 %v6877_v55  ;;  %v8365_v55 = vld [vmem:[#allocation112_spill] sm:$0xff] }
 0x2af   :  { %5156 = vmatprep.subr.bf16.mxu0 %v6879_v57  ;;  %5188 = vmatprep.subr.bf16.mxu1 %v6883_v2  ;;  %v8346_v2 = vld [vmem:[#allocation60_spill] sm:$0xff]  ;;  %v8347_v57 = vld [vmem:[#allocation61_spill] sm:$0xff] }
 0x2b0   :  { %1847 = vmatprep.mubr.f32.mxu0 %v8247_v8  ;;  %1918 = vmatprep.mubr.f32.mxu1 %v8247_v8 }
 0x2b2   :  { %5158 = vmatpush1.bf16.msra.mxu0 %v6889_v15  ;;  %5190 = vmatpush1.bf16.msra.mxu1 %v6893_v17  ;;  %v8348_v15 = vld [vmem:[#allocation62_spill] sm:$0xff]  ;;  %v8349_v17 = vld [vmem:[#allocation63_spill] sm:$0xff] }
 0x2b3   :  { %5160 = vmatprep.subr.bf16.mxu0 %v6895_v20  ;;  %5192 = vmatprep.subr.bf16.mxu1 %v6898_v27  ;;  %v8350_v20 = vld [vmem:[#allocation64_spill] sm:$0xff]  ;;  %v8351_v27 = vld [vmem:[#allocation65_spill] sm:$0xff] }
 0x2b6   :  { %5162 = vmatpush1.bf16.msra.mxu0 %v6903_v42  ;;  %5194 = vmatpush1.bf16.msra.mxu1 %v6907_v43  ;;  %v8352_v42 = vld [vmem:[#allocation66_spill] sm:$0xff]  ;;  %v8353_v43 = vld [vmem:[#allocation67_spill] sm:$0xff] }
 0x2b7   :  { %5164 = vmatprep.subr.bf16.mxu0 %v8343_v11  ;;  %5196 = vmatprep.subr.bf16.mxu1 %v8344_v24  ;;  %v8354_v11 = vld [vmem:[#allocation68_spill] sm:$0xff]  ;;  %v8355_v24 = vld [vmem:[#allocation69_spill] sm:$0xff] }
 0x2ba   :  { %5166 = vmatpush1.bf16.msra.mxu0 %v8345_v37  ;;  %5198 = vmatpush1.bf16.msra.mxu1 %v8346_v2  ;;  %v8356_v37 = vld [vmem:[#allocation70_spill] sm:$0xff]  ;;  %v8357_v2 = vld [vmem:[#allocation71_spill] sm:$0xff] }
 0x2bb   :  { %5168 = vmatprep.subr.bf16.mxu0 %v8347_v57  ;;  %5200 = vmatprep.subr.bf16.mxu1 %v8348_v15  ;;  %v8358_v57 = vld [vmem:[#allocation72_spill] sm:$0xff]  ;;  %v8359_v15 = vld [vmem:[#allocation73_spill] sm:$0xff] }
 0x2be   :  { %5170 = vmatpush1.bf16.msra.mxu0 %v8349_v17  ;;  %5202 = vmatpush1.bf16.msra.mxu1 %v8350_v20  ;;  %v8360_v17 = vld [vmem:[#allocation74_spill] sm:$0xff]  ;;  %v8361_v20 = vld [vmem:[#allocation75_spill] sm:$0xff] }
 0x2bf   :  { %5172 = vmatprep.subr.bf16.mxu0 %v8351_v27  ;;  %5204 = vmatprep.subr.bf16.mxu1 %v8352_v42  ;;  %v8362_v27 = vld [vmem:[#allocation76_spill] sm:$0xff]  ;;  %v8363_v42 = vld [vmem:[#allocation77_spill] sm:$0xff] }
 0x2c2   :  { %5174 = vmatpush1.bf16.msra.mxu0 %v8353_v43  ;;  %5206 = vmatpush1.bf16.msra.mxu1 %v8354_v11  ;;  %v8364_v43 = vld [vmem:[#allocation78_spill] sm:$0xff] }
 0x2c3   :  { %5176 = vmatprep.subr.bf16.mxu0 %v8355_v24  ;;  %5208 = vmatprep.subr.bf16.mxu1 %v8356_v37 }
 0x2c6   :  { %5178 = vmatpush1.bf16.msra.mxu0 %v8357_v2  ;;  %5210 = vmatpush1.bf16.msra.mxu1 %v8358_v57 }
 0x2c7   :  { %5180 = vmatprep.subr.bf16.mxu0 %v8359_v15  ;;  %5212 = vmatprep.subr.bf16.mxu1 %v8360_v17  ;;  %v8367_v17 = vld [vmem:[#allocation114_spill] sm:$0xff] }
 0x2ca   :  { %5182 = vmatpush1.bf16.msra.mxu0 %v8361_v20  ;;  %5214 = vmatpush1.bf16.msra.mxu1 %v8362_v27 }
 0x2cb   :  { %5216 = vmatprep.subr.bf16.mxu0 %v8363_v42  ;;  %5248 = vmatprep.subr.bf16.mxu1 %v8364_v43 }
 0x360   :  { %v1502_v11 = vpop.f32.mrb[18].mxu0  ;;  %v1573_v24 = vpop.f32.mrb[18].mxu1 }
 0x361   :  { %v1578_v37 = vadd.f32 %v1502_v11, %v8365_v55  ;;  %v1504_v52 = vpop.f32.mrb[19].mxu0  ;;  %v1575_v2 = vpop.f32.mrb[19].mxu1  ;;  %v1580_v20 = vadd.f32 %v1573_v24, %v8367_v17 }
 0x362   :  { %v1579_v57 = vadd.f32 %v1504_v52, %v8366_v46  ;;  %v1581_v27 = vadd.f32 %v1575_v2, %v8368_v33 }
 0x363   :  { %v4599_v39 = vmul.f32 -1.442695, %v1578_v37  ;;  %v4601_v28 = vmul.f32 -1.442695, %v1580_v20  ;;  %v8369_v20 = vld [vmem:[#allocation109_spill] sm:$0xff] }
 0x364   :  { %v4600_v15 = vmul.f32 -1.442695, %v1579_v57 }
 0x365   :  { %6390 = vpow2.f32 %v4599_v39 }
 0x366   :  { %6392 = vpow2.f32 %v4600_v15 }
 0x367   :  { %6394 = vtanh.f32 %v1581_v27 }
 0x368   :  { %6396 = vpow2.f32 %v4601_v28 }
 0x36f   :  { %v6391_v42 = vpop.eup %6390 }
 0x370   :  { %v1591_v22 = vadd.f32 1.0, %v6391_v42  ;;  %v6393_v43 = vpop.eup %6392 }
 0x371   :  { %v1592_v11 = vadd.f32 1.0, %v6393_v43  ;;  %v6395_v55 = vpop.eup %6394 }
 0x372   :  { %6398 = vrcp.f32 %v1591_v22  ;;  %v6397_v18 = vpop.eup %6396 }
 0x373   :  { %6400 = vrcp.f32 %v1592_v11  ;;  %v1593_v39 = vadd.f32 1.0, %v6397_v18 }
 0x375   :  { %6402 = vrcp.f32 %v1593_v39 }
 0x37c   :  { %v6399_v52 = vpop.eup %6398 }
 0x37d   :  { %v1602_v37 = vmul.f32 %v6399_v52, %v6395_v55  ;;  %v6401_v57 = vpop.eup %6400 }
 0x37e   :  { %v1601_v15 = vmul.f32 %v6401_v57, %v7197_v1 }
 0x37f   :  { %v6403_v55 = vpop.eup %6402 }
 0x380   :  { %v1679_v24 = vpop.f32.mrb[4].mxu0  ;;  %v1750_v17 = vpop.f32.mrb[4].mxu1  ;;  %v7315_v2 = vadd.f32 %v1602_v37, %v1601_v15 }
 0x381   :  { %v6243_v42 = vadd.f32 %v1679_v24, %v8369_v20  ;;  %v1681_v27 = vpop.f32.mrb[5].mxu0  ;;  %v1752_v33 = vpop.f32.mrb[5].mxu1  ;;  %v6259_v18 = vadd.f32 %v1750_v17, %v8310_v12  ;;  %v8370_v17 = vld [vmem:[#allocation81_spill] sm:$0xff] }
 0x382   :  { %v6244_v22 = vadd.f32 %v1681_v27, %v8309_v34  ;;  %6404 = vtanh.f32 %v7315_v2  ;;  %v6260_v1 = vadd.f32 %v1752_v33, %v7100_v49  ;;  %v8372_v33 = vld [vmem:[#allocation83_spill] sm:$0xff]  ;;  %v8373_v27 = vld [vmem:[#allocation84_spill] sm:$0xff] }
 0x383   :  { %v4602_v28 = vmul.f32 -1.442695, %v6243_v42  ;;  %v4604_v52 = vmul.f32 -1.442695, %v6259_v18  ;;  %v8371_v42 = vld [vmem:[#allocation82_spill] sm:$0xff]  ;;  %v8377_v18 = vld [vmem:[#allocation88_spill] sm:$0xff] }
 0x384   :  { %v4603_v43 = vmul.f32 -1.442695, %v6244_v22  ;;  %v8374_v22 = vld [vmem:[#allocation85_spill] sm:$0xff] }
 0x385   :  { %6406 = vpow2.f32 %v4602_v28  ;;  %v8375_v28 = vld [vmem:[#allocation86_spill] sm:$0xff] }
 0x386   :  { %6408 = vpow2.f32 %v4603_v43  ;;  %v8376_v43 = vld [vmem:[#allocation87_spill] sm:$0xff] }
 0x387   :  { %6410 = vtanh.f32 %v6260_v1  ;;  %v8378_v1 = vld [vmem:[#allocation89_spill] sm:$0xff] }
 0x388   :  { %6412 = vpow2.f32 %v4604_v52 }
 0x38c   :  { %v6405_v11 = vpop.eup %6404 }
 0x38d   :  { %v1605_v37 = vmul.f32 %v6405_v11, %v6403_v55  ;;  %v8379_v11 = vld [vmem:[#allocation90_spill] sm:$0xff] }
 0x38f   :  { %v6407_v57 = vpop.eup %6406  ;;  %1848 = vmatmul.mubr.f32.vlgmr.msra.gmra.mrb[20].mxu0 %v1605_v37  ;;  %1919 = vmatmul.mubr.f32.vlgmr.msra.gmra.mrb[20].mxu1 %v1605_v37 }
 0x390   :  { %v1768_v15 = vadd.f32 1.0, %v6407_v57  ;;  %v6409_v39 = vpop.eup %6408  ;;  %5218 = vmatpush1.bf16.msra.mxu0 %v8311_v61  ;;  %5250 = vmatpush1.bf16.msra.mxu1 %v8312_v30 }
 0x391   :  { %v1769_v24 = vadd.f32 1.0, %v6409_v39  ;;  %5220 = vmatprep.subr.bf16.mxu0 %v8370_v17  ;;  %5252 = vmatprep.subr.bf16.mxu1 %v8371_v42  ;;  %v6411_v55 = vpop.eup %6410 }
 0x392   :  { %6414 = vrcp.f32 %v1768_v15  ;;  %1989 = vmatprep.mubr.f32.mxu0 %v8247_v8  ;;  %2060 = vmatprep.mubr.f32.mxu1 %v8247_v8  ;;  %v6413_v52 = vpop.eup %6412 }
 0x393   :  { %6416 = vrcp.f32 %v1769_v24  ;;  %v1770_v39 = vadd.f32 1.0, %v6413_v52  ;;  %v8380_v24 = vld [vmem:[#allocation93_spill] sm:$0xff]  ;;  %v8386_v52 = vld [vmem:[#allocation99_spill] sm:$0xff] }
 0x394   :  { %5222 = vmatpush1.bf16.msra.mxu0 %v8372_v33  ;;  %5254 = vmatpush1.bf16.msra.mxu1 %v8373_v27 }
 0x395   :  { %5224 = vmatprep.subr.bf16.mxu0 %v8374_v22  ;;  %5256 = vmatprep.subr.bf16.mxu1 %v8375_v28  ;;  %v8381_v28 = vld [vmem:[#allocation94_spill] sm:$0xff]  ;;  %6418 = vrcp.f32 %v1770_v39 }
 0x396   :  { %v8390_v39 = vld [vmem:[#allocation42_spill] sm:$0xff] }
 0x398   :  { %5226 = vmatpush1.bf16.msra.mxu0 %v8376_v43  ;;  %5258 = vmatpush1.bf16.msra.mxu1 %v8377_v18 }
 0x399   :  { %5228 = vmatprep.subr.bf16.mxu0 %v8378_v1  ;;  %5260 = vmatprep.subr.bf16.mxu1 %v8379_v11  ;;  %v8382_v1 = vld [vmem:[#allocation95_spill] sm:$0xff]  ;;  %v8383_v11 = vld [vmem:[#allocation96_spill] sm:$0xff] }
 0x39c   :  { %v6415_v37 = vpop.eup %6414  ;;  %5230 = vmatpush1.bf16.msra.mxu0 %v8323_v41  ;;  %5262 = vmatpush1.bf16.msra.mxu1 %v8324_v5 }
 0x39d   :  { %v1779_v57 = vmul.f32 %v6415_v37, %v6411_v55  ;;  %v6417_v15 = vpop.eup %6416  ;;  %5232 = vmatprep.subr.bf16.mxu0 %v8380_v24  ;;  %5264 = vmatprep.subr.bf16.mxu1 %v8381_v28  ;;  %v8384_v55 = vld [vmem:[#allocation97_spill] sm:$0xff]  ;;  %v8385_v37 = vld [vmem:[#allocation98_spill] sm:$0xff]  ;;  %v8387_v24 = vld [vmem:[#allocation100_spill] sm:$0xff] }
 0x39e   :  { %v1778_v18 = vmul.f32 %v6417_v15, %v7223_v7  ;;  %v8388_v28 = vld [vmem:[#allocation101_spill] sm:$0xff] }
 0x39f   :  { %v6419_v7 = vpop.eup %6418  ;;  %v8389_v15 = vld [vmem:[#allocation41_spill] sm:$0xff] }
 0x3a0   :  { %v7341_v43 = vadd.f32 %v1779_v57, %v1778_v18  ;;  %5234 = vmatpush1.bf16.msra.mxu0 %v8382_v1  ;;  %5266 = vmatpush1.bf16.msra.mxu1 %v8383_v11 }
 0x3a1   :  { %5236 = vmatprep.subr.bf16.mxu0 %v8384_v55  ;;  %5268 = vmatprep.subr.bf16.mxu1 %v8385_v37 }
 0x3a2   :  { %6420 = vtanh.f32 %v7341_v43 }
 0x3a4   :  { %5238 = vmatpush1.bf16.msra.mxu0 %v8386_v52  ;;  %5270 = vmatpush1.bf16.msra.mxu1 %v8387_v24 }
 0x3a5   :  { %5240 = vmatprep.subr.bf16.mxu0 %v8388_v28  ;;  %5272 = vmatprep.subr.bf16.mxu1 %v8334_v0 }
 0x3a8   :  { %5242 = vmatpush1.bf16.msra.mxu0 %v8335_v21  ;;  %5274 = vmatpush1.bf16.msra.mxu1 %v8336_v59 }
 0x3a9   :  { %5244 = vmatprep.subr.bf16.mxu0 %v8337_v45  ;;  %5276 = vmatprep.subr.bf16.mxu1 %v8338_v35 }
 0x3ac   :  { %v6421_v18 = vpop.eup %6420  ;;  %5246 = vmatpush1.bf16.msra.mxu0 %v8339_v25  ;;  %5278 = vmatpush1.bf16.msra.mxu1 %v8340_v31 }
 0x3ad   :  { %5280 = vmatprep.subr.bf16.mxu0 %v8341_v51  ;;  %5312 = vmatprep.subr.bf16.mxu1 %v8342_v38  ;;  %v1782_v57 = vmul.f32 %v6421_v18, %v6419_v7  ;;  %v8391_v7 = vld [vmem:[#allocation43_spill] sm:$0xff]  ;;  %v8392_v18 = vld [vmem:[#allocation44_spill] sm:$0xff] }
 0x3af   :  { %1990 = vmatmul.mubr.f32.vlgmr.msra.gmra.mrb[20].mxu0 %v1782_v57  ;;  %2061 = vmatmul.mubr.f32.vlgmr.msra.gmra.mrb[20].mxu1 %v1782_v57 }
 0x3b0   :  { %5282 = vmatpush1.bf16.msra.mxu0 %v6764_v47  ;;  %5314 = vmatpush1.bf16.msra.mxu1 %v6767_v50 }
 0x3b1   :  { %5284 = vmatprep.subr.bf16.mxu0 %v6770_v53  ;;  %5316 = vmatprep.subr.bf16.mxu1 %v6772_v56 }
 0x3b2   :  { %2166 = vmatprep.mubr.f32.mxu0 %v8247_v8  ;;  %2237 = vmatprep.mubr.f32.mxu1 %v8247_v8 }
 0x3b4   :  { %5286 = vmatpush1.bf16.msra.mxu0 %v6775_v60  ;;  %5318 = vmatpush1.bf16.msra.mxu1 %v6779_v63 }
 0x3b5   :  { %5288 = vmatprep.subr.bf16.mxu0 %v6783_v3  ;;  %5320 = vmatprep.subr.bf16.mxu1 %v6786_v6 }
 0x3b8   :  { %5290 = vmatpush1.bf16.msra.mxu0 %v6789_v10  ;;  %5322 = vmatpush1.bf16.msra.mxu1 %v6793_v13 }
 0x3b9   :  { %5292 = vmatprep.subr.bf16.mxu0 %v6797_v16  ;;  %5324 = vmatprep.subr.bf16.mxu1 %v6800_v19 }
 0x3bc   :  { %5294 = vmatpush1.bf16.msra.mxu0 %v6803_v23  ;;  %5326 = vmatpush1.bf16.msra.mxu1 %v6807_v26 }
 0x3bd   :  { %5296 = vmatprep.subr.bf16.mxu0 %v6811_v29  ;;  %5328 = vmatprep.subr.bf16.mxu1 %v6814_v32 }
 0x3c0   :  { %5298 = vmatpush1.bf16.msra.mxu0 %v6817_v36  ;;  %5330 = vmatpush1.bf16.msra.mxu1 %v6821_v40  ;;  %v8429_v36 = vld [vmem:[#allocation115_spill] sm:$0xff] }
 0x3c1   :  { %5300 = vmatprep.subr.bf16.mxu0 %v6825_v44  ;;  %5332 = vmatprep.subr.bf16.mxu1 %v6828_v48  ;;  %v8393_v48 = vld [vmem:[#allocation45_spill] sm:$0xff] }
 0x3c4   :  { %5302 = vmatpush1.bf16.msra.mxu0 %v6831_v54  ;;  %5334 = vmatpush1.bf16.msra.mxu1 %v6835_v58  ;;  %v8394_v54 = vld [vmem:[#allocation46_spill] sm:$0xff]  ;;  %v8427_v58 = vld [vmem:[#allocation112_spill] sm:$0xff] }
 0x3c5   :  { %5304 = vmatprep.subr.bf16.mxu0 %v6839_v62  ;;  %5336 = vmatprep.subr.bf16.mxu1 %v6842_v4  ;;  %v8395_v62 = vld [vmem:[#allocation47_spill] sm:$0xff]  ;;  %v8396_v4 = vld [vmem:[#allocation48_spill] sm:$0xff] }
 0x3c8   :  { %5306 = vmatpush1.bf16.msra.mxu0 %v6845_v9  ;;  %5338 = vmatpush1.bf16.msra.mxu1 %v6849_v14  ;;  %v8397_v9 = vld [vmem:[#allocation49_spill] sm:$0xff]  ;;  %v8398_v14 = vld [vmem:[#allocation50_spill] sm:$0xff] }
 0x3c9   :  { %5308 = vmatprep.subr.bf16.mxu0 %v8389_v15  ;;  %5340 = vmatprep.subr.bf16.mxu1 %v8390_v39  ;;  %v8408_v39 = vld [vmem:[#allocation60_spill] sm:$0xff]  ;;  %v8409_v15 = vld [vmem:[#allocation61_spill] sm:$0xff] }
 0x3cc   :  { %5310 = vmatpush1.bf16.msra.mxu0 %v8391_v7  ;;  %5342 = vmatpush1.bf16.msra.mxu1 %v8392_v18  ;;  %v8399_v7 = vld [vmem:[#allocation51_spill] sm:$0xff]  ;;  %v8400_v18 = vld [vmem:[#allocation52_spill] sm:$0xff] }
 0x3cd   :  { %5344 = vmatprep.subr.bf16.mxu0 %v8393_v48  ;;  %5376 = vmatprep.subr.bf16.mxu1 %v8394_v54  ;;  %v8401_v48 = vld [vmem:[#allocation53_spill] sm:$0xff]  ;;  %v8402_v54 = vld [vmem:[#allocation54_spill] sm:$0xff] }
 0x3cf   :  { %2167 = vmatmul.mubr.f32.vlgmr.msra.gmra.mrb[6].mxu0 %v1782_v57  ;;  %2238 = vmatmul.mubr.f32.vlgmr.msra.gmra.mrb[6].mxu1 %v1782_v57  ;;  %v8403_v57 = vld [vmem:[#allocation55_spill] sm:$0xff] }
 0x3d0   :  { %5346 = vmatpush1.bf16.msra.mxu0 %v8395_v62  ;;  %5378 = vmatpush1.bf16.msra.mxu1 %v8396_v4  ;;  %v8404_v62 = vld [vmem:[#allocation56_spill] sm:$0xff]  ;;  %v8405_v4 = vld [vmem:[#allocation57_spill] sm:$0xff] }
 0x3d1   :  { %5348 = vmatprep.subr.bf16.mxu0 %v8397_v9  ;;  %5380 = vmatprep.subr.bf16.mxu1 %v8398_v14  ;;  %v8406_v9 = vld [vmem:[#allocation58_spill] sm:$0xff]  ;;  %v8407_v14 = vld [vmem:[#allocation59_spill] sm:$0xff] }
 0x3d2   :  { %2336 = vmatprep.mubr.f32.mxu0 %v8247_v8  ;;  %2407 = vmatprep.mubr.f32.mxu1 %v8247_v8 }
 0x3d4   :  { %5350 = vmatpush1.bf16.msra.mxu0 %v8399_v7  ;;  %5382 = vmatpush1.bf16.msra.mxu1 %v8400_v18  ;;  %v8410_v7 = vld [vmem:[#allocation62_spill] sm:$0xff]  ;;  %v8411_v18 = vld [vmem:[#allocation63_spill] sm:$0xff] }
 0x3d5   :  { %5352 = vmatprep.subr.bf16.mxu0 %v8401_v48  ;;  %5384 = vmatprep.subr.bf16.mxu1 %v8402_v54  ;;  %v8412_v48 = vld [vmem:[#allocation64_spill] sm:$0xff]  ;;  %v8413_v54 = vld [vmem:[#allocation65_spill] sm:$0xff] }
 0x3d8   :  { %5354 = vmatpush1.bf16.msra.mxu0 %v8403_v57  ;;  %5386 = vmatpush1.bf16.msra.mxu1 %v8404_v62  ;;  %v8414_v57 = vld [vmem:[#allocation66_spill] sm:$0xff]  ;;  %v8415_v62 = vld [vmem:[#allocation67_spill] sm:$0xff] }
 0x3d9   :  { %5356 = vmatprep.subr.bf16.mxu0 %v8405_v4  ;;  %5388 = vmatprep.subr.bf16.mxu1 %v8406_v9  ;;  %v8416_v4 = vld [vmem:[#allocation68_spill] sm:$0xff]  ;;  %v8417_v9 = vld [vmem:[#allocation69_spill] sm:$0xff] }
 0x3dc   :  { %5358 = vmatpush1.bf16.msra.mxu0 %v8407_v14  ;;  %5390 = vmatpush1.bf16.msra.mxu1 %v8408_v39  ;;  %v8418_v14 = vld [vmem:[#allocation70_spill] sm:$0xff]  ;;  %v8419_v39 = vld [vmem:[#allocation71_spill] sm:$0xff] }
 0x3dd   :  { %5360 = vmatprep.subr.bf16.mxu0 %v8409_v15  ;;  %5392 = vmatprep.subr.bf16.mxu1 %v8410_v7  ;;  %v8420_v15 = vld [vmem:[#allocation72_spill] sm:$0xff]  ;;  %v8421_v7 = vld [vmem:[#allocation73_spill] sm:$0xff] }
 0x3e0   :  { %5362 = vmatpush1.bf16.msra.mxu0 %v8411_v18  ;;  %5394 = vmatpush1.bf16.msra.mxu1 %v8412_v48  ;;  %v8422_v18 = vld [vmem:[#allocation74_spill] sm:$0xff]  ;;  %v8423_v48 = vld [vmem:[#allocation75_spill] sm:$0xff] }
 0x3e1   :  { %5364 = vmatprep.subr.bf16.mxu0 %v8413_v54  ;;  %5396 = vmatprep.subr.bf16.mxu1 %v8414_v57  ;;  %v8424_v54 = vld [vmem:[#allocation76_spill] sm:$0xff]  ;;  %v8425_v57 = vld [vmem:[#allocation77_spill] sm:$0xff] }
 0x3e4   :  { %5366 = vmatpush1.bf16.msra.mxu0 %v8415_v62  ;;  %5398 = vmatpush1.bf16.msra.mxu1 %v8416_v4  ;;  %v8426_v62 = vld [vmem:[#allocation78_spill] sm:$0xff] }
 0x3e5   :  { %5368 = vmatprep.subr.bf16.mxu0 %v8417_v9  ;;  %5400 = vmatprep.subr.bf16.mxu1 %v8418_v14 }
 0x3e8   :  { %5370 = vmatpush1.bf16.msra.mxu0 %v8419_v39  ;;  %5402 = vmatpush1.bf16.msra.mxu1 %v8420_v15 }
 0x3e9   :  { %5372 = vmatprep.subr.bf16.mxu0 %v8421_v7  ;;  %5404 = vmatprep.subr.bf16.mxu1 %v8422_v18  ;;  %v8428_v18 = vld [vmem:[#allocation114_spill] sm:$0xff] }
 0x3ec   :  { %5374 = vmatpush1.bf16.msra.mxu0 %v8423_v48  ;;  %5406 = vmatpush1.bf16.msra.mxu1 %v8424_v54 }
 0x3ed   :  { %5408 = vmatprep.subr.bf16.mxu0 %v8425_v57  ;;  %5440 = vmatprep.subr.bf16.mxu1 %v8426_v62 }
 0x482   :  { %v1991_v4 = vpop.f32.mrb[20].mxu0  ;;  %v2062_v9 = vpop.f32.mrb[20].mxu1 }
 0x483   :  { %v2067_v14 = vadd.f32 %v1991_v4, %v8427_v58  ;;  %v1993_v44 = vpop.f32.mrb[21].mxu0  ;;  %v2064_v39 = vpop.f32.mrb[21].mxu1  ;;  %v2069_v48 = vadd.f32 %v2062_v9, %v8428_v18 }
 0x484   :  { %v2068_v15 = vadd.f32 %v1993_v44, %v8366_v46  ;;  %v2070_v54 = vadd.f32 %v2064_v39, %v8429_v36 }
 0x485   :  { %v4605_v40 = vmul.f32 -1.442695, %v2067_v14  ;;  %v4607_v32 = vmul.f32 -1.442695, %v2069_v48 }
 0x486   :  { %v4606_v7 = vmul.f32 -1.442695, %v2068_v15 }
 0x487   :  { %6422 = vpow2.f32 %v4605_v40 }
 0x488   :  { %6424 = vpow2.f32 %v4606_v7 }
 0x489   :  { %6426 = vtanh.f32 %v2070_v54 }
 0x48a   :  { %6428 = vpow2.f32 %v4607_v32 }
 0x491   :  { %v6423_v57 = vpop.eup %6422 }
 0x492   :  { %v2080_v29 = vadd.f32 1.0, %v6423_v57  ;;  %v6425_v62 = vpop.eup %6424 }
 0x493   :  { %v2081_v4 = vadd.f32 1.0, %v6425_v62  ;;  %v6427_v58 = vpop.eup %6426 }
 0x494   :  { %6430 = vrcp.f32 %v2080_v29  ;;  %v6429_v26 = vpop.eup %6428 }
 0x495   :  { %6432 = vrcp.f32 %v2081_v4  ;;  %v2082_v40 = vadd.f32 1.0, %v6429_v26 }
 0x497   :  { %6434 = vrcp.f32 %v2082_v40 }
 0x49e   :  { %v6431_v44 = vpop.eup %6430 }
 0x49f   :  { %v2091_v14 = vmul.f32 %v6431_v44, %v6427_v58  ;;  %v6433_v15 = vpop.eup %6432 }
 0x4a0   :  { %v2090_v7 = vmul.f32 %v6433_v15, %v7315_v2 }
 0x4a1   :  { %v6435_v58 = vpop.eup %6434 }
 0x4a2   :  { %v2168_v9 = vpop.f32.mrb[6].mxu0  ;;  %v2239_v18 = vpop.f32.mrb[6].mxu1  ;;  %v7433_v39 = vadd.f32 %v2091_v14, %v2090_v7 }
 0x4a3   :  { %v6245_v48 = vadd.f32 %v2168_v9, %v8369_v20  ;;  %v2170_v54 = vpop.f32.mrb[7].mxu0  ;;  %v2241_v57 = vpop.f32.mrb[7].mxu1  ;;  %v6261_v26 = vadd.f32 %v2239_v18, %v8310_v12  ;;  %v8430_v18 = vld [vmem:[#allocation86_spill] sm:$0xff] }
 0x4a4   :  { %v6246_v29 = vadd.f32 %v2170_v54, %v8309_v34  ;;  %6436 = vtanh.f32 %v7433_v39  ;;  %v6262_v2 = vadd.f32 %v2241_v57, %v7100_v49  ;;  %v8432_v54 = vld [vmem:[#allocation88_spill] sm:$0xff] }
 0x4a5   :  { %v4608_v32 = vmul.f32 -1.442695, %v6245_v48  ;;  %v4610_v44 = vmul.f32 -1.442695, %v6261_v26  ;;  %v8431_v48 = vld [vmem:[#allocation87_spill] sm:$0xff] }
 0x4a6   :  { %v4609_v62 = vmul.f32 -1.442695, %v6246_v29  ;;  %v8433_v29 = vld [vmem:[#allocation89_spill] sm:$0xff] }
 0x4a7   :  { %6438 = vpow2.f32 %v4608_v32  ;;  %v8434_v32 = vld [vmem:[#allocation90_spill] sm:$0xff] }
 0x4a8   :  { %6440 = vpow2.f32 %v4609_v62 }
 0x4a9   :  { %6442 = vtanh.f32 %v6262_v2 }
 0x4aa   :  { %6444 = vpow2.f32 %v4610_v44  ;;  %v8435_v44 = vld [vmem:[#allocation93_spill] sm:$0xff] }
 0x4ae   :  { %v6437_v4 = vpop.eup %6436 }
 0x4af   :  { %v2094_v14 = vmul.f32 %v6437_v4, %v6435_v58 }
 0x4b1   :  { %v6439_v15 = vpop.eup %6438  ;;  %2337 = vmatmul.mubr.f32.vlgmr.msra.gmra.mrb[22].mxu0 %v2094_v14  ;;  %2408 = vmatmul.mubr.f32.vlgmr.msra.gmra.mrb[22].mxu1 %v2094_v14  ;;  %v8436_v14 = vld [vmem:[#allocation94_spill] sm:$0xff] }
 0x4b2   :  { %v2257_v7 = vadd.f32 1.0, %v6439_v15  ;;  %v6441_v40 = vpop.eup %6440  ;;  %5410 = vmatpush1.bf16.msra.mxu0 %v8311_v61  ;;  %5442 = vmatpush1.bf16.msra.mxu1 %v8312_v30 }
 0x4b3   :  { %v2258_v9 = vadd.f32 1.0, %v6441_v40  ;;  %5412 = vmatprep.subr.bf16.mxu0 %v8370_v17  ;;  %5444 = vmatprep.subr.bf16.mxu1 %v8371_v42  ;;  %v6443_v57 = vpop.eup %6442 }
 0x4b4   :  { %6446 = vrcp.f32 %v2257_v7  ;;  %2478 = vmatprep.mubr.f32.mxu0 %v8247_v8  ;;  %2549 = vmatprep.mubr.f32.mxu1 %v8247_v8  ;;  %v6445_v62 = vpop.eup %6444 }
 0x4b5   :  { %6448 = vrcp.f32 %v2258_v9  ;;  %v2259_v4 = vadd.f32 1.0, %v6445_v62  ;;  %v8438_v62 = vld [vmem:[#allocation29_spill] sm:$0xff] }
 0x4b6   :  { %5414 = vmatpush1.bf16.msra.mxu0 %v8372_v33  ;;  %5446 = vmatpush1.bf16.msra.mxu1 %v8373_v27 }
 0x4b7   :  { %5416 = vmatprep.subr.bf16.mxu0 %v8374_v22  ;;  %5448 = vmatprep.subr.bf16.mxu1 %v8430_v18  ;;  %6450 = vrcp.f32 %v2259_v4  ;;  %v8442_v4 = vld [vmem:[#allocation33_spill] sm:$0xff] }
 0x4ba   :  { %5418 = vmatpush1.bf16.msra.mxu0 %v8431_v48  ;;  %5450 = vmatpush1.bf16.msra.mxu1 %v8432_v54 }
 0x4bb   :  { %5420 = vmatprep.subr.bf16.mxu0 %v8433_v29  ;;  %5452 = vmatprep.subr.bf16.mxu1 %v8434_v32 }
 0x4be   :  { %v6447_v26 = vpop.eup %6446  ;;  %5422 = vmatpush1.bf16.msra.mxu0 %v8323_v41  ;;  %5454 = vmatpush1.bf16.msra.mxu1 %v8324_v5 }
 0x4bf   :  { %v2268_v58 = vmul.f32 %v6447_v26, %v6443_v57  ;;  %v6449_v2 = vpop.eup %6448  ;;  %5424 = vmatprep.subr.bf16.mxu0 %v8435_v44  ;;  %5456 = vmatprep.subr.bf16.mxu1 %v8436_v14  ;;  %v8437_v57 = vld [vmem:[#allocation28_spill] sm:$0xff]  ;;  %v8439_v26 = vld [vmem:[#allocation30_spill] sm:$0xff] }
 0x4c0   :  { %v2267_v15 = vmul.f32 %v6449_v2, %v7341_v43  ;;  %v8441_v2 = vld [vmem:[#allocation32_spill] sm:$0xff] }
 0x4c1   :  { %v6451_v43 = vpop.eup %6450 }
 0x4c2   :  { %v7459_v7 = vadd.f32 %v2268_v58, %v2267_v15  ;;  %5426 = vmatpush1.bf16.msra.mxu0 %v8382_v1  ;;  %5458 = vmatpush1.bf16.msra.mxu1 %v8383_v11  ;;  %v8440_v58 = vld [vmem:[#allocation31_spill] sm:$0xff]  ;;  %v8443_v15 = vld [vmem:[#allocation34_spill] sm:$0xff] }
 0x4c3   :  { %5428 = vmatprep.subr.bf16.mxu0 %v8384_v55  ;;  %5460 = vmatprep.subr.bf16.mxu1 %v8385_v37 }
 0x4c4   :  { %6452 = vtanh.f32 %v7459_v7 }
 0x4c6   :  { %5430 = vmatpush1.bf16.msra.mxu0 %v8386_v52  ;;  %5462 = vmatpush1.bf16.msra.mxu1 %v8387_v24 }
 0x4c7   :  { %5432 = vmatprep.subr.bf16.mxu0 %v8388_v28  ;;  %5464 = vmatprep.subr.bf16.mxu1 %v8334_v0 }
 0x4ca   :  { %5434 = vmatpush1.bf16.msra.mxu0 %v8335_v21  ;;  %5466 = vmatpush1.bf16.msra.mxu1 %v8336_v59 }
 0x4cb   :  { %5436 = vmatprep.subr.bf16.mxu0 %v8337_v45  ;;  %5468 = vmatprep.subr.bf16.mxu1 %v8338_v35 }
 0x4ce   :  { %v6453_v40 = vpop.eup %6452  ;;  %5438 = vmatpush1.bf16.msra.mxu0 %v8339_v25  ;;  %5470 = vmatpush1.bf16.msra.mxu1 %v8340_v31 }
 0x4cf   :  { %v2271_v9 = vmul.f32 %v6453_v40, %v6451_v43  ;;  %5472 = vmatprep.subr.bf16.mxu0 %v8341_v51  ;;  %5504 = vmatprep.subr.bf16.mxu1 %v8342_v38  ;;  %v8444_v43 = vld [vmem:[#allocation35_spill] sm:$0xff]  ;;  %v8445_v40 = vld [vmem:[#allocation36_spill] sm:$0xff] }
 0x4d1   :  { %2479 = vmatmul.mubr.f32.vlgmr.msra.gmra.mrb[22].mxu0 %v2271_v9  ;;  %2550 = vmatmul.mubr.f32.vlgmr.msra.gmra.mrb[22].mxu1 %v2271_v9 }
 0x4d2   :  { %5474 = vmatpush1.bf16.msra.mxu0 %v6764_v47  ;;  %5506 = vmatpush1.bf16.msra.mxu1 %v6767_v50 }
 0x4d3   :  { %5476 = vmatprep.subr.bf16.mxu0 %v6770_v53  ;;  %5508 = vmatprep.subr.bf16.mxu1 %v6772_v56 }
 0x4d4   :  { %2655 = vmatprep.mubr.f32.mxu0 %v8247_v8  ;;  %2726 = vmatprep.mubr.f32.mxu1 %v8247_v8 }
 0x4d6   :  { %5478 = vmatpush1.bf16.msra.mxu0 %v6775_v60  ;;  %5510 = vmatpush1.bf16.msra.mxu1 %v6779_v63 }
 0x4d7   :  { %5480 = vmatprep.subr.bf16.mxu0 %v6783_v3  ;;  %5512 = vmatprep.subr.bf16.mxu1 %v6786_v6 }
 0x4da   :  { %5482 = vmatpush1.bf16.msra.mxu0 %v6789_v10  ;;  %5514 = vmatpush1.bf16.msra.mxu1 %v6793_v13 }
 0x4db   :  { %5484 = vmatprep.subr.bf16.mxu0 %v6797_v16  ;;  %5516 = vmatprep.subr.bf16.mxu1 %v6800_v19  ;;  %v8446_v19 = vld [vmem:[#allocation37_spill] sm:$0xff] }
 0x4de   :  { %5486 = vmatpush1.bf16.msra.mxu0 %v6803_v23  ;;  %5518 = vmatpush1.bf16.msra.mxu1 %v8437_v57  ;;  %v8447_v23 = vld [vmem:[#allocation38_spill] sm:$0xff]  ;;  %v8448_v57 = vld [vmem:[#allocation39_spill] sm:$0xff] }
 0x4df   :  { %5488 = vmatprep.subr.bf16.mxu0 %v8438_v62  ;;  %5520 = vmatprep.subr.bf16.mxu1 %v8439_v26  ;;  %v8449_v62 = vld [vmem:[#allocation40_spill] sm:$0xff]  ;;  %v8450_v26 = vld [vmem:[#allocation41_spill] sm:$0xff] }
 0x4e2   :  { %5490 = vmatpush1.bf16.msra.mxu0 %v8440_v58  ;;  %5522 = vmatpush1.bf16.msra.mxu1 %v8441_v2  ;;  %v8451_v58 = vld [vmem:[#allocation42_spill] sm:$0xff]  ;;  %v8452_v2 = vld [vmem:[#allocation43_spill] sm:$0xff] }
 0x4e3   :  { %5492 = vmatprep.subr.bf16.mxu0 %v8442_v4  ;;  %5524 = vmatprep.subr.bf16.mxu1 %v8443_v15  ;;  %v8453_v4 = vld [vmem:[#allocation44_spill] sm:$0xff]  ;;  %v8454_v15 = vld [vmem:[#allocation45_spill] sm:$0xff] }
 0x4e6   :  { %5494 = vmatpush1.bf16.msra.mxu0 %v8444_v43  ;;  %5526 = vmatpush1.bf16.msra.mxu1 %v8445_v40  ;;  %v8455_v43 = vld [vmem:[#allocation46_spill] sm:$0xff]  ;;  %v8488_v40 = vld [vmem:[#allocation112_spill] sm:$0xff] }
 0x4e7   :  { %5496 = vmatprep.subr.bf16.mxu0 %v8446_v19  ;;  %5528 = vmatprep.subr.bf16.mxu1 %v8447_v23  ;;  %v8456_v19 = vld [vmem:[#allocation47_spill] sm:$0xff]  ;;  %v8457_v23 = vld [vmem:[#allocation48_spill] sm:$0xff] }
 0x4ea   :  { %5498 = vmatpush1.bf16.msra.mxu0 %v8448_v57  ;;  %5530 = vmatpush1.bf16.msra.mxu1 %v8449_v62  ;;  %v8458_v57 = vld [vmem:[#allocation49_spill] sm:$0xff]  ;;  %v8459_v62 = vld [vmem:[#allocation50_spill] sm:$0xff] }
 0x4eb   :  { %5500 = vmatprep.subr.bf16.mxu0 %v8450_v26  ;;  %5532 = vmatprep.subr.bf16.mxu1 %v8451_v58  ;;  %v8469_v58 = vld [vmem:[#allocation60_spill] sm:$0xff]  ;;  %v8470_v26 = vld [vmem:[#allocation61_spill] sm:$0xff] }
 0x4ee   :  { %5502 = vmatpush1.bf16.msra.mxu0 %v8452_v2  ;;  %5534 = vmatpush1.bf16.msra.mxu1 %v8453_v4  ;;  %v8460_v2 = vld [vmem:[#allocation51_spill] sm:$0xff]  ;;  %v8461_v4 = vld [vmem:[#allocation52_spill] sm:$0xff] }
 0x4ef   :  { %5536 = vmatprep.subr.bf16.mxu0 %v8454_v15  ;;  %5568 = vmatprep.subr.bf16.mxu1 %v8455_v43  ;;  %v8462_v15 = vld [vmem:[#allocation53_spill] sm:$0xff]  ;;  %v8463_v43 = vld [vmem:[#allocation54_spill] sm:$0xff] }
 0x4f1   :  { %2656 = vmatmul.mubr.f32.vlgmr.msra.gmra.mrb[8].mxu0 %v2271_v9  ;;  %2727 = vmatmul.mubr.f32.vlgmr.msra.gmra.mrb[8].mxu1 %v2271_v9  ;;  %v8464_v9 = vld [vmem:[#allocation55_spill] sm:$0xff] }
 0x4f2   :  { %5538 = vmatpush1.bf16.msra.mxu0 %v8456_v19  ;;  %5570 = vmatpush1.bf16.msra.mxu1 %v8457_v23  ;;  %v8465_v19 = vld [vmem:[#allocation56_spill] sm:$0xff]  ;;  %v8466_v23 = vld [vmem:[#allocation57_spill] sm:$0xff] }
 0x4f3   :  { %5540 = vmatprep.subr.bf16.mxu0 %v8458_v57  ;;  %5572 = vmatprep.subr.bf16.mxu1 %v8459_v62  ;;  %v8467_v57 = vld [vmem:[#allocation58_spill] sm:$0xff]  ;;  %v8468_v62 = vld [vmem:[#allocation59_spill] sm:$0xff] }
 0x4f4   :  { %2825 = vmatprep.mubr.f32.mxu0 %v8247_v8  ;;  %2896 = vmatprep.mubr.f32.mxu1 %v8247_v8 }
 0x4f6   :  { %5542 = vmatpush1.bf16.msra.mxu0 %v8460_v2  ;;  %5574 = vmatpush1.bf16.msra.mxu1 %v8461_v4  ;;  %v8471_v2 = vld [vmem:[#allocation62_spill] sm:$0xff]  ;;  %v8472_v4 = vld [vmem:[#allocation63_spill] sm:$0xff] }
 0x4f7   :  { %5544 = vmatprep.subr.bf16.mxu0 %v8462_v15  ;;  %5576 = vmatprep.subr.bf16.mxu1 %v8463_v43  ;;  %v8473_v15 = vld [vmem:[#allocation64_spill] sm:$0xff]  ;;  %v8474_v43 = vld [vmem:[#allocation65_spill] sm:$0xff] }
 0x4fa   :  { %5546 = vmatpush1.bf16.msra.mxu0 %v8464_v9  ;;  %5578 = vmatpush1.bf16.msra.mxu1 %v8465_v19  ;;  %v8475_v9 = vld [vmem:[#allocation66_spill] sm:$0xff]  ;;  %v8476_v19 = vld [vmem:[#allocation67_spill] sm:$0xff] }
 0x4fb   :  { %5548 = vmatprep.subr.bf16.mxu0 %v8466_v23  ;;  %5580 = vmatprep.subr.bf16.mxu1 %v8467_v57  ;;  %v8477_v23 = vld [vmem:[#allocation68_spill] sm:$0xff]  ;;  %v8478_v57 = vld [vmem:[#allocation69_spill] sm:$0xff] }
 0x4fe   :  { %5550 = vmatpush1.bf16.msra.mxu0 %v8468_v62  ;;  %5582 = vmatpush1.bf16.msra.mxu1 %v8469_v58  ;;  %v8479_v62 = vld [vmem:[#allocation70_spill] sm:$0xff]  ;;  %v8480_v58 = vld [vmem:[#allocation71_spill] sm:$0xff] }
 0x4ff   :  { %5552 = vmatprep.subr.bf16.mxu0 %v8470_v26  ;;  %5584 = vmatprep.subr.bf16.mxu1 %v8471_v2  ;;  %v8481_v26 = vld [vmem:[#allocation72_spill] sm:$0xff]  ;;  %v8482_v2 = vld [vmem:[#allocation73_spill] sm:$0xff] }
 0x502   :  { %5554 = vmatpush1.bf16.msra.mxu0 %v8472_v4  ;;  %5586 = vmatpush1.bf16.msra.mxu1 %v8473_v15  ;;  %v8483_v4 = vld [vmem:[#allocation74_spill] sm:$0xff]  ;;  %v8484_v15 = vld [vmem:[#allocation75_spill] sm:$0xff] }
 0x503   :  { %5556 = vmatprep.subr.bf16.mxu0 %v8474_v43  ;;  %5588 = vmatprep.subr.bf16.mxu1 %v8475_v9  ;;  %v8485_v43 = vld [vmem:[#allocation76_spill] sm:$0xff]  ;;  %v8486_v9 = vld [vmem:[#allocation77_spill] sm:$0xff] }
 0x506   :  { %5558 = vmatpush1.bf16.msra.mxu0 %v8476_v19  ;;  %5590 = vmatpush1.bf16.msra.mxu1 %v8477_v23  ;;  %v8487_v19 = vld [vmem:[#allocation78_spill] sm:$0xff] }
 0x507   :  { %5560 = vmatprep.subr.bf16.mxu0 %v8478_v57  ;;  %5592 = vmatprep.subr.bf16.mxu1 %v8479_v62 }
 0x50a   :  { %5562 = vmatpush1.bf16.msra.mxu0 %v8480_v58  ;;  %5594 = vmatpush1.bf16.msra.mxu1 %v8481_v26 }
 0x50b   :  { %5564 = vmatprep.subr.bf16.mxu0 %v8482_v2  ;;  %5596 = vmatprep.subr.bf16.mxu1 %v8483_v4  ;;  %v8489_v4 = vld [vmem:[#allocation114_spill] sm:$0xff] }
 0x50e   :  { %5566 = vmatpush1.bf16.msra.mxu0 %v8484_v15  ;;  %5598 = vmatpush1.bf16.msra.mxu1 %v8485_v43 }
 0x50f   :  { %5600 = vmatprep.subr.bf16.mxu0 %v8486_v9  ;;  %5632 = vmatprep.subr.bf16.mxu1 %v8487_v19 }
 0x5a4   :  { %v2480_v23 = vpop.f32.mrb[22].mxu0  ;;  %v2551_v57 = vpop.f32.mrb[22].mxu1 }
 0x5a5   :  { %v2556_v62 = vadd.f32 %v2480_v23, %v8488_v40  ;;  %v2482_v16 = vpop.f32.mrb[23].mxu0  ;;  %v2553_v58 = vpop.f32.mrb[23].mxu1  ;;  %v2558_v15 = vadd.f32 %v2551_v57, %v8489_v4 }
 0x5a6   :  { %v2557_v26 = vadd.f32 %v2482_v16, %v8366_v46  ;;  %v2559_v43 = vadd.f32 %v2553_v58, %v8429_v36 }
 0x5a7   :  { %v4611_v13 = vmul.f32 -1.442695, %v2556_v62  ;;  %v4613_v10 = vmul.f32 -1.442695, %v2558_v15 }
 0x5a8   :  { %v4612_v2 = vmul.f32 -1.442695, %v2557_v26 }
 0x5a9   :  { %6454 = vpow2.f32 %v4611_v13 }
 0x5aa   :  { %6456 = vpow2.f32 %v4612_v2 }
 0x5ab   :  { %6458 = vtanh.f32 %v2559_v43 }
 0x5ac   :  { %6460 = vpow2.f32 %v4613_v10 }
 0x5b3   :  { %v6455_v9 = vpop.eup %6454 }
 0x5b4   :  { %v2569_v6 = vadd.f32 1.0, %v6455_v9  ;;  %v6457_v19 = vpop.eup %6456 }
 0x5b5   :  { %v2570_v23 = vadd.f32 1.0, %v6457_v19  ;;  %v6459_v40 = vpop.eup %6458 }
 0x5b6   :  { %6462 = vrcp.f32 %v2569_v6  ;;  %v6461_v3 = vpop.eup %6460 }
 0x5b7   :  { %6464 = vrcp.f32 %v2570_v23  ;;  %v2571_v13 = vadd.f32 1.0, %v6461_v3 }
 0x5b9   :  { %6466 = vrcp.f32 %v2571_v13 }
 0x5c0   :  { %v6463_v16 = vpop.eup %6462 }
 0x5c1   :  { %v2580_v62 = vmul.f32 %v6463_v16, %v6459_v40  ;;  %v6465_v26 = vpop.eup %6464 }
 0x5c2   :  { %v2579_v2 = vmul.f32 %v6465_v26, %v7433_v39 }
 0x5c3   :  { %v6467_v39 = vpop.eup %6466 }
 0x5c4   :  { %v2657_v57 = vpop.f32.mrb[8].mxu0  ;;  %v2728_v4 = vpop.f32.mrb[8].mxu1  ;;  %v7551_v58 = vadd.f32 %v2580_v62, %v2579_v2 }
 0x5c5   :  { %v6247_v15 = vadd.f32 %v2657_v57, %v8369_v20  ;;  %v2659_v43 = vpop.f32.mrb[9].mxu0  ;;  %v2730_v9 = vpop.f32.mrb[9].mxu1  ;;  %v6263_v3 = vadd.f32 %v2728_v4, %v8310_v12 }
 0x5c6   :  { %v6248_v6 = vadd.f32 %v2659_v43, %v8309_v34  ;;  %6468 = vtanh.f32 %v7551_v58  ;;  %v6264_v40 = vadd.f32 %v2730_v9, %v7100_v49 }
 0x5c7   :  { %v4614_v10 = vmul.f32 -1.442695, %v6247_v15  ;;  %v4616_v16 = vmul.f32 -1.442695, %v6263_v3 }
 0x5c8   :  { %v4615_v19 = vmul.f32 -1.442695, %v6248_v6 }
 0x5c9   :  { %6470 = vpow2.f32 %v4614_v10 }
 0x5ca   :  { %6472 = vpow2.f32 %v4615_v19 }
 0x5cb   :  { %6474 = vtanh.f32 %v6264_v40 }
 0x5cc   :  { %6476 = vpow2.f32 %v4616_v16  ;;  %v8491_v16 = vld [vmem:[#allocation22_spill] sm:$0xff] }
 0x5d0   :  { %v6469_v23 = vpop.eup %6468 }
 0x5d1   :  { %v2583_v62 = vmul.f32 %v6469_v23, %v6467_v39  ;;  %v8490_v23 = vld [vmem:[#allocation21_spill] sm:$0xff] }
 0x5d3   :  { %v6471_v26 = vpop.eup %6470  ;;  %2826 = vmatmul.mubr.f32.vlgmr.msra.gmra.mrb[24].mxu0 %v2583_v62  ;;  %2897 = vmatmul.mubr.f32.vlgmr.msra.gmra.mrb[24].mxu1 %v2583_v62  ;;  %v8492_v62 = vld [vmem:[#allocation23_spill] sm:$0xff] }
 0x5d4   :  { %v2746_v2 = vadd.f32 1.0, %v6471_v26  ;;  %v6473_v13 = vpop.eup %6472  ;;  %5602 = vmatpush1.bf16.msra.mxu0 %v8311_v61  ;;  %5634 = vmatpush1.bf16.msra.mxu1 %v8312_v30  ;;  %v8493_v26 = vld [vmem:[#allocation24_spill] sm:$0xff] }
 0x5d5   :  { %v2747_v57 = vadd.f32 1.0, %v6473_v13  ;;  %5604 = vmatprep.subr.bf16.mxu0 %v8370_v17  ;;  %5636 = vmatprep.subr.bf16.mxu1 %v8371_v42  ;;  %v6475_v4 = vpop.eup %6474  ;;  %v8495_v13 = vld [vmem:[#allocation26_spill] sm:$0xff] }
 0x5d6   :  { %6478 = vrcp.f32 %v2746_v2  ;;  %2967 = vmatprep.mubr.f32.mxu0 %v8247_v8  ;;  %3038 = vmatprep.mubr.f32.mxu1 %v8247_v8  ;;  %v6477_v15 = vpop.eup %6476  ;;  %v8494_v2 = vld [vmem:[#allocation25_spill] sm:$0xff] }
 0x5d7   :  { %6480 = vrcp.f32 %v2747_v57  ;;  %v2748_v10 = vadd.f32 1.0, %v6477_v15  ;;  %v8496_v57 = vld [vmem:[#allocation27_spill] sm:$0xff]  ;;  %v8498_v15 = vld [vmem:[#allocation29_spill] sm:$0xff] }
 0x5d8   :  { %5606 = vmatpush1.bf16.msra.mxu0 %v8372_v33  ;;  %5638 = vmatpush1.bf16.msra.mxu1 %v8373_v27 }
 0x5d9   :  { %5608 = vmatprep.subr.bf16.mxu0 %v8374_v22  ;;  %5640 = vmatprep.subr.bf16.mxu1 %v8430_v18  ;;  %6482 = vrcp.f32 %v2748_v10  ;;  %v8502_v10 = vld [vmem:[#allocation33_spill] sm:$0xff] }
 0x5dc   :  { %5610 = vmatpush1.bf16.msra.mxu0 %v8431_v48  ;;  %5642 = vmatpush1.bf16.msra.mxu1 %v8432_v54 }
 0x5dd   :  { %5612 = vmatprep.subr.bf16.mxu0 %v8433_v29  ;;  %5644 = vmatprep.subr.bf16.mxu1 %v8434_v32 }
 0x5e0   :  { %v6479_v43 = vpop.eup %6478  ;;  %5614 = vmatpush1.bf16.msra.mxu0 %v8323_v41  ;;  %5646 = vmatpush1.bf16.msra.mxu1 %v8324_v5 }
 0x5e1   :  { %v2757_v9 = vmul.f32 %v6479_v43, %v6475_v4  ;;  %v6481_v6 = vpop.eup %6480  ;;  %5616 = vmatprep.subr.bf16.mxu0 %v8435_v44  ;;  %5648 = vmatprep.subr.bf16.mxu1 %v8436_v14  ;;  %v8497_v4 = vld [vmem:[#allocation28_spill] sm:$0xff]  ;;  %v8499_v43 = vld [vmem:[#allocation30_spill] sm:$0xff] }
 0x5e2   :  { %v2756_v19 = vmul.f32 %v6481_v6, %v7459_v7  ;;  %v8501_v6 = vld [vmem:[#allocation32_spill] sm:$0xff] }
 0x5e3   :  { %v6483_v7 = vpop.eup %6482 }
 0x5e4   :  { %v7577_v3 = vadd.f32 %v2757_v9, %v2756_v19  ;;  %5618 = vmatpush1.bf16.msra.mxu0 %v8382_v1  ;;  %5650 = vmatpush1.bf16.msra.mxu1 %v8383_v11  ;;  %v8500_v9 = vld [vmem:[#allocation31_spill] sm:$0xff]  ;;  %v8503_v19 = vld [vmem:[#allocation34_spill] sm:$0xff] }
 0x5e5   :  { %5620 = vmatprep.subr.bf16.mxu0 %v8384_v55  ;;  %5652 = vmatprep.subr.bf16.mxu1 %v8385_v37 }
 0x5e6   :  { %6484 = vtanh.f32 %v7577_v3 }
 0x5e8   :  { %5622 = vmatpush1.bf16.msra.mxu0 %v8386_v52  ;;  %5654 = vmatpush1.bf16.msra.mxu1 %v8387_v24 }
 0x5e9   :  { %5624 = vmatprep.subr.bf16.mxu0 %v8388_v28  ;;  %5656 = vmatprep.subr.bf16.mxu1 %v8334_v0 }
 0x5ec   :  { %5626 = vmatpush1.bf16.msra.mxu0 %v8335_v21  ;;  %5658 = vmatpush1.bf16.msra.mxu1 %v8336_v59 }
 0x5ed   :  { %5628 = vmatprep.subr.bf16.mxu0 %v8337_v45  ;;  %5660 = vmatprep.subr.bf16.mxu1 %v8338_v35 }
 0x5f0   :  { %v6485_v39 = vpop.eup %6484  ;;  %5630 = vmatpush1.bf16.msra.mxu0 %v8339_v25  ;;  %5662 = vmatpush1.bf16.msra.mxu1 %v8340_v31 }
 0x5f1   :  { %5664 = vmatprep.subr.bf16.mxu0 %v8341_v51  ;;  %5696 = vmatprep.subr.bf16.mxu1 %v8342_v38  ;;  %v2760_v40 = vmul.f32 %v6485_v39, %v6483_v7  ;;  %v8504_v7 = vld [vmem:[#allocation35_spill] sm:$0xff]  ;;  %v8505_v39 = vld [vmem:[#allocation36_spill] sm:$0xff] }
 0x5f3   :  { %2968 = vmatmul.mubr.f32.vlgmr.msra.gmra.mrb[24].mxu0 %v2760_v40  ;;  %3039 = vmatmul.mubr.f32.vlgmr.msra.gmra.mrb[24].mxu1 %v2760_v40 }
 0x5f4   :  { %5666 = vmatpush1.bf16.msra.mxu0 %v6764_v47  ;;  %5698 = vmatpush1.bf16.msra.mxu1 %v6767_v50 }
 0x5f5   :  { %5668 = vmatprep.subr.bf16.mxu0 %v6770_v53  ;;  %5700 = vmatprep.subr.bf16.mxu1 %v6772_v56 }
 0x5f6   :  { %3144 = vmatprep.mubr.f32.mxu0 %v8247_v8  ;;  %3215 = vmatprep.mubr.f32.mxu1 %v8247_v8 }
 0x5f8   :  { %5670 = vmatpush1.bf16.msra.mxu0 %v6775_v60  ;;  %5702 = vmatpush1.bf16.msra.mxu1 %v6779_v63 }
 0x5f9   :  { %5672 = vmatprep.subr.bf16.mxu0 %v8490_v23  ;;  %5704 = vmatprep.subr.bf16.mxu1 %v8491_v16 }
 0x5fc   :  { %5674 = vmatpush1.bf16.msra.mxu0 %v8492_v62  ;;  %5706 = vmatpush1.bf16.msra.mxu1 %v8493_v26 }
 0x5fd   :  { %5676 = vmatprep.subr.bf16.mxu0 %v8494_v2  ;;  %5708 = vmatprep.subr.bf16.mxu1 %v8495_v13  ;;  %v8506_v13 = vld [vmem:[#allocation37_spill] sm:$0xff] }
 0x600   :  { %5678 = vmatpush1.bf16.msra.mxu0 %v8496_v57  ;;  %5710 = vmatpush1.bf16.msra.mxu1 %v8497_v4  ;;  %v8507_v57 = vld [vmem:[#allocation38_spill] sm:$0xff]  ;;  %v8508_v4 = vld [vmem:[#allocation39_spill] sm:$0xff] }
 0x601   :  { %5680 = vmatprep.subr.bf16.mxu0 %v8498_v15  ;;  %5712 = vmatprep.subr.bf16.mxu1 %v8499_v43  ;;  %v8509_v15 = vld [vmem:[#allocation40_spill] sm:$0xff]  ;;  %v8510_v43 = vld [vmem:[#allocation41_spill] sm:$0xff] }
 0x604   :  { %5682 = vmatpush1.bf16.msra.mxu0 %v8500_v9  ;;  %5714 = vmatpush1.bf16.msra.mxu1 %v8501_v6  ;;  %v8511_v9 = vld [vmem:[#allocation42_spill] sm:$0xff]  ;;  %v8512_v6 = vld [vmem:[#allocation43_spill] sm:$0xff] }
 0x605   :  { %5684 = vmatprep.subr.bf16.mxu0 %v8502_v10  ;;  %5716 = vmatprep.subr.bf16.mxu1 %v8503_v19  ;;  %v8513_v10 = vld [vmem:[#allocation44_spill] sm:$0xff]  ;;  %v8514_v19 = vld [vmem:[#allocation45_spill] sm:$0xff] }
 0x608   :  { %5686 = vmatpush1.bf16.msra.mxu0 %v8504_v7  ;;  %5718 = vmatpush1.bf16.msra.mxu1 %v8505_v39  ;;  %v8515_v7 = vld [vmem:[#allocation46_spill] sm:$0xff]  ;;  %v8548_v39 = vld [vmem:[#allocation112_spill] sm:$0xff] }
 0x609   :  { %5688 = vmatprep.subr.bf16.mxu0 %v8506_v13  ;;  %5720 = vmatprep.subr.bf16.mxu1 %v8507_v57  ;;  %v8516_v13 = vld [vmem:[#allocation47_spill] sm:$0xff]  ;;  %v8517_v57 = vld [vmem:[#allocation48_spill] sm:$0xff] }
 0x60c   :  { %5690 = vmatpush1.bf16.msra.mxu0 %v8508_v4  ;;  %5722 = vmatpush1.bf16.msra.mxu1 %v8509_v15  ;;  %v8518_v4 = vld [vmem:[#allocation49_spill] sm:$0xff]  ;;  %v8519_v15 = vld [vmem:[#allocation50_spill] sm:$0xff] }
 0x60d   :  { %5692 = vmatprep.subr.bf16.mxu0 %v8510_v43  ;;  %5724 = vmatprep.subr.bf16.mxu1 %v8511_v9  ;;  %v8529_v9 = vld [vmem:[#allocation60_spill] sm:$0xff]  ;;  %v8530_v43 = vld [vmem:[#allocation61_spill] sm:$0xff] }
 0x610   :  { %5694 = vmatpush1.bf16.msra.mxu0 %v8512_v6  ;;  %5726 = vmatpush1.bf16.msra.mxu1 %v8513_v10  ;;  %v8520_v6 = vld [vmem:[#allocation51_spill] sm:$0xff]  ;;  %v8521_v10 = vld [vmem:[#allocation52_spill] sm:$0xff] }
 0x611   :  { %5728 = vmatprep.subr.bf16.mxu0 %v8514_v19  ;;  %5760 = vmatprep.subr.bf16.mxu1 %v8515_v7  ;;  %v8522_v19 = vld [vmem:[#allocation53_spill] sm:$0xff]  ;;  %v8523_v7 = vld [vmem:[#allocation54_spill] sm:$0xff] }
 0x613   :  { %3145 = vmatmul.mubr.f32.vlgmr.msra.gmra.mrb[10].mxu0 %v2760_v40  ;;  %3216 = vmatmul.mubr.f32.vlgmr.msra.gmra.mrb[10].mxu1 %v2760_v40  ;;  %v8524_v40 = vld [vmem:[#allocation55_spill] sm:$0xff] }
 0x614   :  { %5730 = vmatpush1.bf16.msra.mxu0 %v8516_v13  ;;  %5762 = vmatpush1.bf16.msra.mxu1 %v8517_v57  ;;  %v8525_v13 = vld [vmem:[#allocation56_spill] sm:$0xff]  ;;  %v8526_v57 = vld [vmem:[#allocation57_spill] sm:$0xff] }
 0x615   :  { %5732 = vmatprep.subr.bf16.mxu0 %v8518_v4  ;;  %5764 = vmatprep.subr.bf16.mxu1 %v8519_v15  ;;  %v8527_v4 = vld [vmem:[#allocation58_spill] sm:$0xff]  ;;  %v8528_v15 = vld [vmem:[#allocation59_spill] sm:$0xff] }
 0x616   :  { %3314 = vmatprep.mubr.f32.mxu0 %v8247_v8  ;;  %3385 = vmatprep.mubr.f32.mxu1 %v8247_v8 }
 0x618   :  { %5734 = vmatpush1.bf16.msra.mxu0 %v8520_v6  ;;  %5766 = vmatpush1.bf16.msra.mxu1 %v8521_v10  ;;  %v8531_v6 = vld [vmem:[#allocation62_spill] sm:$0xff]  ;;  %v8532_v10 = vld [vmem:[#allocation63_spill] sm:$0xff] }
 0x619   :  { %5736 = vmatprep.subr.bf16.mxu0 %v8522_v19  ;;  %5768 = vmatprep.subr.bf16.mxu1 %v8523_v7  ;;  %v8533_v19 = vld [vmem:[#allocation64_spill] sm:$0xff]  ;;  %v8534_v7 = vld [vmem:[#allocation65_spill] sm:$0xff] }
 0x61c   :  { %5738 = vmatpush1.bf16.msra.mxu0 %v8524_v40  ;;  %5770 = vmatpush1.bf16.msra.mxu1 %v8525_v13  ;;  %v8535_v40 = vld [vmem:[#allocation66_spill] sm:$0xff]  ;;  %v8536_v13 = vld [vmem:[#allocation67_spill] sm:$0xff] }
 0x61d   :  { %5740 = vmatprep.subr.bf16.mxu0 %v8526_v57  ;;  %5772 = vmatprep.subr.bf16.mxu1 %v8527_v4  ;;  %v8537_v57 = vld [vmem:[#allocation68_spill] sm:$0xff]  ;;  %v8538_v4 = vld [vmem:[#allocation69_spill] sm:$0xff] }
 0x620   :  { %5742 = vmatpush1.bf16.msra.mxu0 %v8528_v15  ;;  %5774 = vmatpush1.bf16.msra.mxu1 %v8529_v9  ;;  %v8539_v15 = vld [vmem:[#allocation70_spill] sm:$0xff]  ;;  %v8540_v9 = vld [vmem:[#allocation71_spill] sm:$0xff] }
 0x621   :  { %5744 = vmatprep.subr.bf16.mxu0 %v8530_v43  ;;  %5776 = vmatprep.subr.bf16.mxu1 %v8531_v6  ;;  %v8541_v43 = vld [vmem:[#allocation72_spill] sm:$0xff]  ;;  %v8542_v6 = vld [vmem:[#allocation73_spill] sm:$0xff] }
 0x624   :  { %5746 = vmatpush1.bf16.msra.mxu0 %v8532_v10  ;;  %5778 = vmatpush1.bf16.msra.mxu1 %v8533_v19  ;;  %v8543_v10 = vld [vmem:[#allocation74_spill] sm:$0xff]  ;;  %v8544_v19 = vld [vmem:[#allocation75_spill] sm:$0xff] }
 0x625   :  { %5748 = vmatprep.subr.bf16.mxu0 %v8534_v7  ;;  %5780 = vmatprep.subr.bf16.mxu1 %v8535_v40  ;;  %v8545_v7 = vld [vmem:[#allocation76_spill] sm:$0xff]  ;;  %v8546_v40 = vld [vmem:[#allocation77_spill] sm:$0xff] }
 0x628   :  { %5750 = vmatpush1.bf16.msra.mxu0 %v8536_v13  ;;  %5782 = vmatpush1.bf16.msra.mxu1 %v8537_v57  ;;  %v8547_v13 = vld [vmem:[#allocation78_spill] sm:$0xff] }
 0x629   :  { %5752 = vmatprep.subr.bf16.mxu0 %v8538_v4  ;;  %5784 = vmatprep.subr.bf16.mxu1 %v8539_v15 }
 0x62c   :  { %5754 = vmatpush1.bf16.msra.mxu0 %v8540_v9  ;;  %5786 = vmatpush1.bf16.msra.mxu1 %v8541_v43 }
 0x62d   :  { %5756 = vmatprep.subr.bf16.mxu0 %v8542_v6  ;;  %5788 = vmatprep.subr.bf16.mxu1 %v8543_v10  ;;  %v8549_v10 = vld [vmem:[#allocation114_spill] sm:$0xff] }
 0x630   :  { %5758 = vmatpush1.bf16.msra.mxu0 %v8544_v19  ;;  %5790 = vmatpush1.bf16.msra.mxu1 %v8545_v7 }
 0x631   :  { %5792 = vmatprep.subr.bf16.mxu0 %v8546_v40  ;;  %5824 = vmatprep.subr.bf16.mxu1 %v8547_v13 }
 0x6c6   :  { %v2969_v57 = vpop.f32.mrb[24].mxu0  ;;  %v3040_v4 = vpop.f32.mrb[24].mxu1 }
 0x6c7   :  { %v3045_v15 = vadd.f32 %v2969_v57, %v8548_v39  ;;  %v2971_v2 = vpop.f32.mrb[25].mxu0  ;;  %v3042_v9 = vpop.f32.mrb[25].mxu1  ;;  %v3047_v19 = vadd.f32 %v3040_v4, %v8549_v10 }
 0x6c8   :  { %v3046_v43 = vadd.f32 %v2971_v2, %v8366_v46  ;;  %v3048_v7 = vadd.f32 %v3042_v9, %v8429_v36 }
 0x6c9   :  { %v4617_v26 = vmul.f32 -1.442695, %v3045_v15  ;;  %v4619_v62 = vmul.f32 -1.442695, %v3047_v19 }
 0x6ca   :  { %v4618_v6 = vmul.f32 -1.442695, %v3046_v43 }
 0x6cb   :  { %6486 = vpow2.f32 %v4617_v26 }
 0x6cc   :  { %6488 = vpow2.f32 %v4618_v6 }
 0x6cd   :  { %6490 = vtanh.f32 %v3048_v7 }
 0x6ce   :  { %6492 = vpow2.f32 %v4619_v62 }
 0x6d5   :  { %v6487_v40 = vpop.eup %6486 }
 0x6d6   :  { %v3058_v16 = vadd.f32 1.0, %v6487_v40  ;;  %v6489_v13 = vpop.eup %6488 }
 0x6d7   :  { %v3059_v57 = vadd.f32 1.0, %v6489_v13  ;;  %v6491_v39 = vpop.eup %6490 }
 0x6d8   :  { %6494 = vrcp.f32 %v3058_v16  ;;  %v6493_v23 = vpop.eup %6492 }
 0x6d9   :  { %6496 = vrcp.f32 %v3059_v57  ;;  %v3060_v26 = vadd.f32 1.0, %v6493_v23 }
 0x6db   :  { %6498 = vrcp.f32 %v3060_v26 }
 0x6e2   :  { %v6495_v2 = vpop.eup %6494 }
 0x6e3   :  { %v3069_v15 = vmul.f32 %v6495_v2, %v6491_v39  ;;  %v6497_v43 = vpop.eup %6496 }
 0x6e4   :  { %v3068_v6 = vmul.f32 %v6497_v43, %v7551_v58 }
 0x6e5   :  { %v6499_v58 = vpop.eup %6498 }
 0x6e6   :  { %v3146_v4 = vpop.f32.mrb[10].mxu0  ;;  %v3217_v10 = vpop.f32.mrb[10].mxu1  ;;  %v7669_v9 = vadd.f32 %v3069_v15, %v3068_v6 }
 0x6e7   :  { %v6249_v19 = vadd.f32 %v3146_v4, %v8369_v20  ;;  %v3148_v7 = vpop.f32.mrb[11].mxu0  ;;  %v3219_v40 = vpop.f32.mrb[11].mxu1  ;;  %v6265_v23 = vadd.f32 %v3217_v10, %v8310_v12 }
 0x6e8   :  { %v6250_v16 = vadd.f32 %v3148_v7, %v8309_v34  ;;  %6500 = vtanh.f32 %v7669_v9  ;;  %v6266_v39 = vadd.f32 %v3219_v40, %v7100_v49 }
 0x6e9   :  { %v4620_v62 = vmul.f32 -1.442695, %v6249_v19  ;;  %v4622_v2 = vmul.f32 -1.442695, %v6265_v23 }
 0x6ea   :  { %v4621_v13 = vmul.f32 -1.442695, %v6250_v16 }
 0x6eb   :  { %6502 = vpow2.f32 %v4620_v62 }
 0x6ec   :  { %6504 = vpow2.f32 %v4621_v13 }
 0x6ed   :  { %6506 = vtanh.f32 %v6266_v39 }
 0x6ee   :  { %6508 = vpow2.f32 %v4622_v2  ;;  %v8551_v2 = vld [vmem:[#allocation22_spill] sm:$0xff] }
 0x6f2   :  { %v6501_v57 = vpop.eup %6500 }
 0x6f3   :  { %v3072_v15 = vmul.f32 %v6501_v57, %v6499_v58  ;;  %v8550_v57 = vld [vmem:[#allocation21_spill] sm:$0xff] }
 0x6f5   :  { %v6503_v43 = vpop.eup %6502  ;;  %3315 = vmatmul.mubr.f32.vlgmr.msra.gmra.mrb[26].mxu0 %v3072_v15  ;;  %3386 = vmatmul.mubr.f32.vlgmr.msra.gmra.mrb[26].mxu1 %v3072_v15  ;;  %v8552_v15 = vld [vmem:[#allocation23_spill] sm:$0xff] }
 0x6f6   :  { %v3235_v6 = vadd.f32 1.0, %v6503_v43  ;;  %v6505_v26 = vpop.eup %6504  ;;  %5794 = vmatpush1.bf16.msra.mxu0 %v8311_v61  ;;  %5826 = vmatpush1.bf16.msra.mxu1 %v8312_v30  ;;  %v8553_v43 = vld [vmem:[#allocation24_spill] sm:$0xff] }
 0x6f7   :  { %v3236_v4 = vadd.f32 1.0, %v6505_v26  ;;  %5796 = vmatprep.subr.bf16.mxu0 %v8370_v17  ;;  %5828 = vmatprep.subr.bf16.mxu1 %v8371_v42  ;;  %v6507_v10 = vpop.eup %6506  ;;  %v8555_v26 = vld [vmem:[#allocation26_spill] sm:$0xff] }
 0x6f8   :  { %6510 = vrcp.f32 %v3235_v6  ;;  %3456 = vmatprep.mubr.f32.mxu0 %v8247_v8  ;;  %3527 = vmatprep.mubr.f32.mxu1 %v8247_v8  ;;  %v6509_v19 = vpop.eup %6508  ;;  %v8554_v6 = vld [vmem:[#allocation25_spill] sm:$0xff] }
 0x6f9   :  { %6512 = vrcp.f32 %v3236_v4  ;;  %v3237_v62 = vadd.f32 1.0, %v6509_v19  ;;  %v8556_v4 = vld [vmem:[#allocation27_spill] sm:$0xff]  ;;  %v8558_v19 = vld [vmem:[#allocation29_spill] sm:$0xff] }
 0x6fa   :  { %5798 = vmatpush1.bf16.msra.mxu0 %v8372_v33  ;;  %5830 = vmatpush1.bf16.msra.mxu1 %v8373_v27 }
 0x6fb   :  { %5800 = vmatprep.subr.bf16.mxu0 %v8374_v22  ;;  %5832 = vmatprep.subr.bf16.mxu1 %v8430_v18  ;;  %6514 = vrcp.f32 %v3237_v62  ;;  %v8562_v62 = vld [vmem:[#allocation33_spill] sm:$0xff] }
 0x6fe   :  { %5802 = vmatpush1.bf16.msra.mxu0 %v8431_v48  ;;  %5834 = vmatpush1.bf16.msra.mxu1 %v8432_v54 }
 0x6ff   :  { %5804 = vmatprep.subr.bf16.mxu0 %v8433_v29  ;;  %5836 = vmatprep.subr.bf16.mxu1 %v8434_v32 }
 0x702   :  { %v6511_v7 = vpop.eup %6510  ;;  %5806 = vmatpush1.bf16.msra.mxu0 %v8323_v41  ;;  %5838 = vmatpush1.bf16.msra.mxu1 %v8324_v5 }
 0x703   :  { %v3246_v40 = vmul.f32 %v6511_v7, %v6507_v10  ;;  %v6513_v16 = vpop.eup %6512  ;;  %5808 = vmatprep.subr.bf16.mxu0 %v8435_v44  ;;  %5840 = vmatprep.subr.bf16.mxu1 %v8436_v14  ;;  %v8557_v10 = vld [vmem:[#allocation28_spill] sm:$0xff]  ;;  %v8559_v7 = vld [vmem:[#allocation30_spill] sm:$0xff] }
 0x704   :  { %v3245_v13 = vmul.f32 %v6513_v16, %v7577_v3  ;;  %v8561_v16 = vld [vmem:[#allocation32_spill] sm:$0xff] }
 0x705   :  { %v6515_v3 = vpop.eup %6514 }
 0x706   :  { %v7695_v23 = vadd.f32 %v3246_v40, %v3245_v13  ;;  %5810 = vmatpush1.bf16.msra.mxu0 %v8382_v1  ;;  %5842 = vmatpush1.bf16.msra.mxu1 %v8383_v11  ;;  %v8560_v40 = vld [vmem:[#allocation31_spill] sm:$0xff]  ;;  %v8563_v13 = vld [vmem:[#allocation34_spill] sm:$0xff] }
 0x707   :  { %5812 = vmatprep.subr.bf16.mxu0 %v8384_v55  ;;  %5844 = vmatprep.subr.bf16.mxu1 %v8385_v37 }
 0x708   :  { %6516 = vtanh.f32 %v7695_v23 }
 0x70a   :  { %5814 = vmatpush1.bf16.msra.mxu0 %v8386_v52  ;;  %5846 = vmatpush1.bf16.msra.mxu1 %v8387_v24 }
 0x70b   :  { %5816 = vmatprep.subr.bf16.mxu0 %v8388_v28  ;;  %5848 = vmatprep.subr.bf16.mxu1 %v8334_v0 }
 0x70e   :  { %5818 = vmatpush1.bf16.msra.mxu0 %v8335_v21  ;;  %5850 = vmatpush1.bf16.msra.mxu1 %v8336_v59 }
 0x70f   :  { %5820 = vmatprep.subr.bf16.mxu0 %v8337_v45  ;;  %5852 = vmatprep.subr.bf16.mxu1 %v8338_v35 }
 0x712   :  { %v6517_v58 = vpop.eup %6516  ;;  %5822 = vmatpush1.bf16.msra.mxu0 %v8339_v25  ;;  %5854 = vmatpush1.bf16.msra.mxu1 %v8340_v31 }
 0x713   :  { %v3249_v39 = vmul.f32 %v6517_v58, %v6515_v3  ;;  %5856 = vmatprep.subr.bf16.mxu0 %v8341_v51  ;;  %5888 = vmatprep.subr.bf16.mxu1 %v8342_v38  ;;  %v8564_v3 = vld [vmem:[#allocation35_spill] sm:$0xff]  ;;  %v8565_v58 = vld [vmem:[#allocation36_spill] sm:$0xff] }
 0x715   :  { %3457 = vmatmul.mubr.f32.vlgmr.msra.gmra.mrb[26].mxu0 %v3249_v39  ;;  %3528 = vmatmul.mubr.f32.vlgmr.msra.gmra.mrb[26].mxu1 %v3249_v39 }
 0x716   :  { %5858 = vmatpush1.bf16.msra.mxu0 %v6764_v47  ;;  %5890 = vmatpush1.bf16.msra.mxu1 %v6767_v50 }
 0x717   :  { %5860 = vmatprep.subr.bf16.mxu0 %v6770_v53  ;;  %5892 = vmatprep.subr.bf16.mxu1 %v6772_v56 }
 0x718   :  { %3633 = vmatprep.mubr.f32.mxu0 %v8247_v8  ;;  %3704 = vmatprep.mubr.f32.mxu1 %v8247_v8 }
 0x71a   :  { %5862 = vmatpush1.bf16.msra.mxu0 %v6775_v60  ;;  %5894 = vmatpush1.bf16.msra.mxu1 %v6779_v63 }
 0x71b   :  { %5864 = vmatprep.subr.bf16.mxu0 %v8550_v57  ;;  %5896 = vmatprep.subr.bf16.mxu1 %v8551_v2 }
 0x71e   :  { %5866 = vmatpush1.bf16.msra.mxu0 %v8552_v15  ;;  %5898 = vmatpush1.bf16.msra.mxu1 %v8553_v43 }
 0x71f   :  { %5868 = vmatprep.subr.bf16.mxu0 %v8554_v6  ;;  %5900 = vmatprep.subr.bf16.mxu1 %v8555_v26  ;;  %v8566_v26 = vld [vmem:[#allocation37_spill] sm:$0xff] }
 0x722   :  { %5870 = vmatpush1.bf16.msra.mxu0 %v8556_v4  ;;  %5902 = vmatpush1.bf16.msra.mxu1 %v8557_v10  ;;  %v8567_v4 = vld [vmem:[#allocation38_spill] sm:$0xff]  ;;  %v8568_v10 = vld [vmem:[#allocation39_spill] sm:$0xff] }
 0x723   :  { %5872 = vmatprep.subr.bf16.mxu0 %v8558_v19  ;;  %5904 = vmatprep.subr.bf16.mxu1 %v8559_v7  ;;  %v8569_v19 = vld [vmem:[#allocation40_spill] sm:$0xff]  ;;  %v8570_v7 = vld [vmem:[#allocation41_spill] sm:$0xff] }
 0x726   :  { %5874 = vmatpush1.bf16.msra.mxu0 %v8560_v40  ;;  %5906 = vmatpush1.bf16.msra.mxu1 %v8561_v16  ;;  %v8571_v40 = vld [vmem:[#allocation42_spill] sm:$0xff]  ;;  %v8572_v16 = vld [vmem:[#allocation43_spill] sm:$0xff] }
 0x727   :  { %5876 = vmatprep.subr.bf16.mxu0 %v8562_v62  ;;  %5908 = vmatprep.subr.bf16.mxu1 %v8563_v13  ;;  %v8573_v62 = vld [vmem:[#allocation44_spill] sm:$0xff]  ;;  %v8574_v13 = vld [vmem:[#allocation45_spill] sm:$0xff] }
 0x72a   :  { %5878 = vmatpush1.bf16.msra.mxu0 %v8564_v3  ;;  %5910 = vmatpush1.bf16.msra.mxu1 %v8565_v58  ;;  %v8575_v3 = vld [vmem:[#allocation46_spill] sm:$0xff]  ;;  %v8608_v58 = vld [vmem:[#allocation112_spill] sm:$0xff] }
 0x72b   :  { %5880 = vmatprep.subr.bf16.mxu0 %v8566_v26  ;;  %5912 = vmatprep.subr.bf16.mxu1 %v8567_v4  ;;  %v8576_v26 = vld [vmem:[#allocation47_spill] sm:$0xff]  ;;  %v8577_v4 = vld [vmem:[#allocation48_spill] sm:$0xff] }
 0x72e   :  { %5882 = vmatpush1.bf16.msra.mxu0 %v8568_v10  ;;  %5914 = vmatpush1.bf16.msra.mxu1 %v8569_v19  ;;  %v8578_v10 = vld [vmem:[#allocation49_spill] sm:$0xff]  ;;  %v8579_v19 = vld [vmem:[#allocation50_spill] sm:$0xff] }
 0x72f   :  { %5884 = vmatprep.subr.bf16.mxu0 %v8570_v7  ;;  %5916 = vmatprep.subr.bf16.mxu1 %v8571_v40  ;;  %v8589_v40 = vld [vmem:[#allocation60_spill] sm:$0xff]  ;;  %v8590_v7 = vld [vmem:[#allocation61_spill] sm:$0xff] }
 0x732   :  { %5886 = vmatpush1.bf16.msra.mxu0 %v8572_v16  ;;  %5918 = vmatpush1.bf16.msra.mxu1 %v8573_v62  ;;  %v8580_v16 = vld [vmem:[#allocation51_spill] sm:$0xff]  ;;  %v8581_v62 = vld [vmem:[#allocation52_spill] sm:$0xff] }
 0x733   :  { %5920 = vmatprep.subr.bf16.mxu0 %v8574_v13  ;;  %5952 = vmatprep.subr.bf16.mxu1 %v8575_v3  ;;  %v8582_v13 = vld [vmem:[#allocation53_spill] sm:$0xff]  ;;  %v8583_v3 = vld [vmem:[#allocation54_spill] sm:$0xff] }
 0x735   :  { %3634 = vmatmul.mubr.f32.vlgmr.msra.gmra.mrb[12].mxu0 %v3249_v39  ;;  %3705 = vmatmul.mubr.f32.vlgmr.msra.gmra.mrb[12].mxu1 %v3249_v39  ;;  %v8584_v39 = vld [vmem:[#allocation55_spill] sm:$0xff] }
 0x736   :  { %5922 = vmatpush1.bf16.msra.mxu0 %v8576_v26  ;;  %5954 = vmatpush1.bf16.msra.mxu1 %v8577_v4  ;;  %v8585_v26 = vld [vmem:[#allocation56_spill] sm:$0xff]  ;;  %v8586_v4 = vld [vmem:[#allocation57_spill] sm:$0xff] }
 0x737   :  { %5924 = vmatprep.subr.bf16.mxu0 %v8578_v10  ;;  %5956 = vmatprep.subr.bf16.mxu1 %v8579_v19  ;;  %v8587_v10 = vld [vmem:[#allocation58_spill] sm:$0xff]  ;;  %v8588_v19 = vld [vmem:[#allocation59_spill] sm:$0xff] }
 0x738   :  { %3803 = vmatprep.mubr.f32.mxu0 %v8247_v8  ;;  %3874 = vmatprep.mubr.f32.mxu1 %v8247_v8 }
 0x73a   :  { %5926 = vmatpush1.bf16.msra.mxu0 %v8580_v16  ;;  %5958 = vmatpush1.bf16.msra.mxu1 %v8581_v62  ;;  %v8591_v16 = vld [vmem:[#allocation62_spill] sm:$0xff]  ;;  %v8592_v62 = vld [vmem:[#allocation63_spill] sm:$0xff] }
 0x73b   :  { %5928 = vmatprep.subr.bf16.mxu0 %v8582_v13  ;;  %5960 = vmatprep.subr.bf16.mxu1 %v8583_v3  ;;  %v8593_v13 = vld [vmem:[#allocation64_spill] sm:$0xff]  ;;  %v8594_v3 = vld [vmem:[#allocation65_spill] sm:$0xff] }
 0x73e   :  { %5930 = vmatpush1.bf16.msra.mxu0 %v8584_v39  ;;  %5962 = vmatpush1.bf16.msra.mxu1 %v8585_v26  ;;  %v8595_v39 = vld [vmem:[#allocation66_spill] sm:$0xff]  ;;  %v8596_v26 = vld [vmem:[#allocation67_spill] sm:$0xff] }
 0x73f   :  { %5932 = vmatprep.subr.bf16.mxu0 %v8586_v4  ;;  %5964 = vmatprep.subr.bf16.mxu1 %v8587_v10  ;;  %v8597_v4 = vld [vmem:[#allocation68_spill] sm:$0xff]  ;;  %v8598_v10 = vld [vmem:[#allocation69_spill] sm:$0xff] }
 0x742   :  { %5934 = vmatpush1.bf16.msra.mxu0 %v8588_v19  ;;  %5966 = vmatpush1.bf16.msra.mxu1 %v8589_v40  ;;  %v8599_v19 = vld [vmem:[#allocation70_spill] sm:$0xff]  ;;  %v8600_v40 = vld [vmem:[#allocation71_spill] sm:$0xff] }
 0x743   :  { %5936 = vmatprep.subr.bf16.mxu0 %v8590_v7  ;;  %5968 = vmatprep.subr.bf16.mxu1 %v8591_v16  ;;  %v8601_v7 = vld [vmem:[#allocation72_spill] sm:$0xff]  ;;  %v8602_v16 = vld [vmem:[#allocation73_spill] sm:$0xff] }
 0x746   :  { %5938 = vmatpush1.bf16.msra.mxu0 %v8592_v62  ;;  %5970 = vmatpush1.bf16.msra.mxu1 %v8593_v13  ;;  %v8603_v62 = vld [vmem:[#allocation74_spill] sm:$0xff]  ;;  %v8604_v13 = vld [vmem:[#allocation75_spill] sm:$0xff] }
 0x747   :  { %5940 = vmatprep.subr.bf16.mxu0 %v8594_v3  ;;  %5972 = vmatprep.subr.bf16.mxu1 %v8595_v39  ;;  %v8605_v3 = vld [vmem:[#allocation76_spill] sm:$0xff]  ;;  %v8606_v39 = vld [vmem:[#allocation77_spill] sm:$0xff] }
 0x74a   :  { %5942 = vmatpush1.bf16.msra.mxu0 %v8596_v26  ;;  %5974 = vmatpush1.bf16.msra.mxu1 %v8597_v4  ;;  %v8607_v26 = vld [vmem:[#allocation78_spill] sm:$0xff] }
 0x74b   :  { %5944 = vmatprep.subr.bf16.mxu0 %v8598_v10  ;;  %5976 = vmatprep.subr.bf16.mxu1 %v8599_v19 }
 0x74e   :  { %5946 = vmatpush1.bf16.msra.mxu0 %v8600_v40  ;;  %5978 = vmatpush1.bf16.msra.mxu1 %v8601_v7 }
 0x74f   :  { %5948 = vmatprep.subr.bf16.mxu0 %v8602_v16  ;;  %5980 = vmatprep.subr.bf16.mxu1 %v8603_v62  ;;  %v8609_v62 = vld [vmem:[#allocation114_spill] sm:$0xff] }
 0x752   :  { %5950 = vmatpush1.bf16.msra.mxu0 %v8604_v13  ;;  %5982 = vmatpush1.bf16.msra.mxu1 %v8605_v3 }
 0x753   :  { %5984 = vmatprep.subr.bf16.mxu0 %v8606_v39  ;;  %6016 = vmatprep.subr.bf16.mxu1 %v8607_v26 }
 0x7e8   :  { %v3458_v4 = vpop.f32.mrb[26].mxu0  ;;  %v3529_v10 = vpop.f32.mrb[26].mxu1 }
 0x7e9   :  { %v3534_v19 = vadd.f32 %v3458_v4, %v8608_v58  ;;  %v3460_v6 = vpop.f32.mrb[27].mxu0  ;;  %v3531_v40 = vpop.f32.mrb[27].mxu1  ;;  %v3536_v13 = vadd.f32 %v3529_v10, %v8609_v62 }
 0x7ea   :  { %v3535_v7 = vadd.f32 %v3460_v6, %v8366_v46  ;;  %v3537_v3 = vadd.f32 %v3531_v40, %v8429_v36 }
 0x7eb   :  { %v4623_v43 = vmul.f32 -1.442695, %v3534_v19  ;;  %v4625_v15 = vmul.f32 -1.442695, %v3536_v13 }
 0x7ec   :  { %v4624_v16 = vmul.f32 -1.442695, %v3535_v7 }
 0x7ed   :  { %6518 = vpow2.f32 %v4623_v43 }
 0x7ee   :  { %6520 = vpow2.f32 %v4624_v16 }
 0x7ef   :  { %6522 = vtanh.f32 %v3537_v3 }
 0x7f0   :  { %6524 = vpow2.f32 %v4625_v15 }
 0x7f7   :  { %v6519_v39 = vpop.eup %6518 }
 0x7f8   :  { %v3547_v2 = vadd.f32 1.0, %v6519_v39  ;;  %v6521_v26 = vpop.eup %6520 }
 0x7f9   :  { %v3548_v4 = vadd.f32 1.0, %v6521_v26  ;;  %v6523_v58 = vpop.eup %6522 }
 0x7fa   :  { %6526 = vrcp.f32 %v3547_v2  ;;  %v6525_v57 = vpop.eup %6524 }
 0x7fb   :  { %6528 = vrcp.f32 %v3548_v4  ;;  %v3549_v43 = vadd.f32 1.0, %v6525_v57 }
 0x7fd   :  { %6530 = vrcp.f32 %v3549_v43 }
 0x804   :  { %v6527_v6 = vpop.eup %6526 }
 0x805   :  { %v3558_v19 = vmul.f32 %v6527_v6, %v6523_v58  ;;  %v6529_v7 = vpop.eup %6528 }
 0x806   :  { %v3557_v16 = vmul.f32 %v6529_v7, %v7669_v9 }
 0x807   :  { %v6531_v9 = vpop.eup %6530 }
 0x808   :  { %v3635_v10 = vpop.f32.mrb[12].mxu0  ;;  %v3706_v62 = vpop.f32.mrb[12].mxu1  ;;  %v7787_v40 = vadd.f32 %v3558_v19, %v3557_v16 }
 0x809   :  { %v6251_v13 = vadd.f32 %v3635_v10, %v8369_v20  ;;  %v3637_v3 = vpop.f32.mrb[13].mxu0  ;;  %v3708_v39 = vpop.f32.mrb[13].mxu1  ;;  %v6267_v57 = vadd.f32 %v3706_v62, %v8310_v12 }
 0x80a   :  { %v6252_v2 = vadd.f32 %v3637_v3, %v8309_v34  ;;  %6532 = vtanh.f32 %v7787_v40  ;;  %v6268_v58 = vadd.f32 %v3708_v39, %v7100_v49 }
 0x80b   :  { %v4626_v15 = vmul.f32 -1.442695, %v6251_v13  ;;  %v4628_v6 = vmul.f32 -1.442695, %v6267_v57 }
 0x80c   :  { %v4627_v26 = vmul.f32 -1.442695, %v6252_v2 }
 0x80d   :  { %6534 = vpow2.f32 %v4626_v15 }
 0x80e   :  { %6536 = vpow2.f32 %v4627_v26 }
 0x80f   :  { %6538 = vtanh.f32 %v6268_v58 }
 0x810   :  { %6540 = vpow2.f32 %v4628_v6  ;;  %v8617_v6 = vld [vmem:[#allocation28_spill] sm:$0xff] }
 0x814   :  { %v6533_v4 = vpop.eup %6532 }
 0x815   :  { %v3561_v19 = vmul.f32 %v6533_v4, %v6531_v9  ;;  %v8612_v4 = vld [vmem:[#allocation23_spill] sm:$0xff] }
 0x817   :  { %v6535_v7 = vpop.eup %6534  ;;  %3804 = vmatmul.mubr.f32.vlgmr.msra.gmra.mrb[28].mxu0 %v3561_v19  ;;  %3875 = vmatmul.mubr.f32.vlgmr.msra.gmra.mrb[28].mxu1 %v3561_v19  ;;  %v8618_v19 = vld [vmem:[#allocation29_spill] sm:$0xff] }
 0x818   :  { %v3724_v16 = vadd.f32 1.0, %v6535_v7  ;;  %v6537_v43 = vpop.eup %6536  ;;  %5986 = vmatpush1.bf16.msra.mxu0 %v8311_v61  ;;  %6018 = vmatpush1.bf16.msra.mxu1 %v8312_v30  ;;  %v8621_v7 = vld [vmem:[#allocation32_spill] sm:$0xff] }
 0x819   :  { %v3725_v10 = vadd.f32 1.0, %v6537_v43  ;;  %5988 = vmatprep.subr.bf16.mxu0 %v8370_v17  ;;  %6020 = vmatprep.subr.bf16.mxu1 %v8371_v42  ;;  %v6539_v62 = vpop.eup %6538  ;;  %v8623_v43 = vld [vmem:[#allocation34_spill] sm:$0xff] }
 0x81a   :  { %6542 = vrcp.f32 %v3724_v16  ;;  %3945 = vmatprep.mubr.f32.mxu0 %v8247_v8  ;;  %4016 = vmatprep.mubr.f32.mxu1 %v8247_v8  ;;  %v6541_v13 = vpop.eup %6540  ;;  %v8622_v16 = vld [vmem:[#allocation33_spill] sm:$0xff] }
 0x81b   :  { %6544 = vrcp.f32 %v3725_v10  ;;  %v3726_v15 = vadd.f32 1.0, %v6541_v13  ;;  %v8624_v10 = vld [vmem:[#allocation35_spill] sm:$0xff]  ;;  %v8626_v13 = vld [vmem:[#allocation37_spill] sm:$0xff] }
 0x81c   :  { %5990 = vmatpush1.bf16.msra.mxu0 %v8372_v33  ;;  %6022 = vmatpush1.bf16.msra.mxu1 %v8373_v27 }
 0x81d   :  { %5992 = vmatprep.subr.bf16.mxu0 %v8374_v22  ;;  %6024 = vmatprep.subr.bf16.mxu1 %v8430_v18  ;;  %6546 = vrcp.f32 %v3726_v15  ;;  %v8630_v15 = vld [vmem:[#allocation41_spill] sm:$0xff] }
 0x820   :  { %5994 = vmatpush1.bf16.msra.mxu0 %v8431_v48  ;;  %6026 = vmatpush1.bf16.msra.mxu1 %v8432_v54 }
 0x821   :  { %5996 = vmatprep.subr.bf16.mxu0 %v8433_v29  ;;  %6028 = vmatprep.subr.bf16.mxu1 %v8434_v32 }
 0x824   :  { %v6543_v3 = vpop.eup %6542  ;;  %5998 = vmatpush1.bf16.msra.mxu0 %v8323_v41  ;;  %6030 = vmatpush1.bf16.msra.mxu1 %v8324_v5 }
 0x825   :  { %v3735_v39 = vmul.f32 %v6543_v3, %v6539_v62  ;;  %v6545_v2 = vpop.eup %6544  ;;  %6000 = vmatprep.subr.bf16.mxu0 %v8435_v44  ;;  %6032 = vmatprep.subr.bf16.mxu1 %v8436_v14  ;;  %v8625_v62 = vld [vmem:[#allocation36_spill] sm:$0xff]  ;;  %v8627_v3 = vld [vmem:[#allocation38_spill] sm:$0xff] }
 0x826   :  { %v3734_v26 = vmul.f32 %v6545_v2, %v7695_v23  ;;  %v8629_v2 = vld [vmem:[#allocation40_spill] sm:$0xff] }
 0x827   :  { %v6547_v23 = vpop.eup %6546 }
 0x828   :  { %v7813_v57 = vadd.f32 %v3735_v39, %v3734_v26  ;;  %6002 = vmatpush1.bf16.msra.mxu0 %v8382_v1  ;;  %6034 = vmatpush1.bf16.msra.mxu1 %v8383_v11  ;;  %v8628_v39 = vld [vmem:[#allocation39_spill] sm:$0xff]  ;;  %v8631_v26 = vld [vmem:[#allocation42_spill] sm:$0xff] }
 0x829   :  { %6004 = vmatprep.subr.bf16.mxu0 %v8384_v55  ;;  %6036 = vmatprep.subr.bf16.mxu1 %v8385_v37 }
 0x82a   :  { %6548 = vtanh.f32 %v7813_v57 }
 0x82c   :  { %6006 = vmatpush1.bf16.msra.mxu0 %v8386_v52  ;;  %6038 = vmatpush1.bf16.msra.mxu1 %v8387_v24 }
 0x82d   :  { %6008 = vmatprep.subr.bf16.mxu0 %v8388_v28  ;;  %6040 = vmatprep.subr.bf16.mxu1 %v8334_v0 }
 0x830   :  { %6010 = vmatpush1.bf16.msra.mxu0 %v8335_v21  ;;  %6042 = vmatpush1.bf16.msra.mxu1 %v8336_v59 }
 0x831   :  { %6012 = vmatprep.subr.bf16.mxu0 %v8337_v45  ;;  %6044 = vmatprep.subr.bf16.mxu1 %v8338_v35 }
 0x834   :  { %v6549_v9 = vpop.eup %6548  ;;  %6014 = vmatpush1.bf16.msra.mxu0 %v8339_v25  ;;  %6046 = vmatpush1.bf16.msra.mxu1 %v8340_v31 }
 0x835   :  { %6048 = vmatprep.subr.bf16.mxu0 %v8341_v51  ;;  %6080 = vmatprep.subr.bf16.mxu1 %v8342_v38  ;;  %v3738_v58 = vmul.f32 %v6549_v9, %v6547_v23  ;;  %v8610_v51 = vld [vmem:[#allocation21_spill] sm:$0xff]  ;;  %v8611_v38 = vld [vmem:[#allocation22_spill] sm:$0xff]  ;;  %v8632_v23 = vld [vmem:[#allocation43_spill] sm:$0xff] }
 0x836   :  { %v8633_v9 = vld [vmem:[#allocation44_spill] sm:$0xff] }
 0x837   :  { %3946 = vmatmul.mubr.f32.vlgmr.msra.gmra.mrb[28].mxu0 %v3738_v58  ;;  %4017 = vmatmul.mubr.f32.vlgmr.msra.gmra.mrb[28].mxu1 %v3738_v58 }
 0x838   :  { %6050 = vmatpush1.bf16.msra.mxu0 %v6764_v47  ;;  %6082 = vmatpush1.bf16.msra.mxu1 %v6767_v50  ;;  %v8613_v47 = vld [vmem:[#allocation24_spill] sm:$0xff]  ;;  %v8614_v50 = vld [vmem:[#allocation25_spill] sm:$0xff] }
 0x839   :  { %6052 = vmatprep.subr.bf16.mxu0 %v6770_v53  ;;  %6084 = vmatprep.subr.bf16.mxu1 %v6772_v56  ;;  %v8615_v53 = vld [vmem:[#allocation26_spill] sm:$0xff]  ;;  %v8616_v56 = vld [vmem:[#allocation27_spill] sm:$0xff] }
 0x83a   :  { %4122 = vmatprep.mubr.f32.mxu0 %v8247_v8  ;;  %4193 = vmatprep.mubr.f32.mxu1 %v8247_v8 }
 0x83c   :  { %6054 = vmatpush1.bf16.msra.mxu0 %v6775_v60  ;;  %6086 = vmatpush1.bf16.msra.mxu1 %v6779_v63  ;;  %v8619_v60 = vld [vmem:[#allocation30_spill] sm:$0xff]  ;;  %v8620_v63 = vld [vmem:[#allocation31_spill] sm:$0xff] }
 0x83d   :  { %6056 = vmatprep.subr.bf16.mxu0 %v8610_v51  ;;  %6088 = vmatprep.subr.bf16.mxu1 %v8611_v38  ;;  %v8634_v51 = vld [vmem:[#allocation45_spill] sm:$0xff]  ;;  %v8635_v38 = vld [vmem:[#allocation46_spill] sm:$0xff] }
 0x840   :  { %6058 = vmatpush1.bf16.msra.mxu0 %v8612_v4  ;;  %6090 = vmatpush1.bf16.msra.mxu1 %v8613_v47  ;;  %v8636_v4 = vld [vmem:[#allocation47_spill] sm:$0xff]  ;;  %v8637_v47 = vld [vmem:[#allocation48_spill] sm:$0xff] }
 0x841   :  { %6060 = vmatprep.subr.bf16.mxu0 %v8614_v50  ;;  %6092 = vmatprep.subr.bf16.mxu1 %v8615_v53  ;;  %v8638_v50 = vld [vmem:[#allocation49_spill] sm:$0xff]  ;;  %v8639_v53 = vld [vmem:[#allocation50_spill] sm:$0xff] }
 0x844   :  { %6062 = vmatpush1.bf16.msra.mxu0 %v8616_v56  ;;  %6094 = vmatpush1.bf16.msra.mxu1 %v8617_v6  ;;  %v8640_v56 = vld [vmem:[#allocation51_spill] sm:$0xff]  ;;  %v8641_v6 = vld [vmem:[#allocation52_spill] sm:$0xff] }
 0x845   :  { %6064 = vmatprep.subr.bf16.mxu0 %v8618_v19  ;;  %6096 = vmatprep.subr.bf16.mxu1 %v8619_v60  ;;  %v8642_v19 = vld [vmem:[#allocation53_spill] sm:$0xff]  ;;  %v8643_v60 = vld [vmem:[#allocation54_spill] sm:$0xff] }
 0x848   :  { %6066 = vmatpush1.bf16.msra.mxu0 %v8620_v63  ;;  %6098 = vmatpush1.bf16.msra.mxu1 %v8621_v7  ;;  %v8645_v63 = vld [vmem:[#allocation56_spill] sm:$0xff]  ;;  %v8646_v7 = vld [vmem:[#allocation57_spill] sm:$0xff] }
 0x849   :  { %6068 = vmatprep.subr.bf16.mxu0 %v8622_v16  ;;  %6100 = vmatprep.subr.bf16.mxu1 %v8623_v43  ;;  %v8647_v16 = vld [vmem:[#allocation58_spill] sm:$0xff]  ;;  %v8648_v43 = vld [vmem:[#allocation59_spill] sm:$0xff] }
 0x84c   :  { %6070 = vmatpush1.bf16.msra.mxu0 %v8624_v10  ;;  %6102 = vmatpush1.bf16.msra.mxu1 %v8625_v62  ;;  %v8649_v10 = vld [vmem:[#allocation60_spill] sm:$0xff]  ;;  %v8650_v62 = vld [vmem:[#allocation61_spill] sm:$0xff] }
 0x84d   :  { %6072 = vmatprep.subr.bf16.mxu0 %v8626_v13  ;;  %6104 = vmatprep.subr.bf16.mxu1 %v8627_v3  ;;  %v8651_v13 = vld [vmem:[#allocation62_spill] sm:$0xff]  ;;  %v8652_v3 = vld [vmem:[#allocation63_spill] sm:$0xff] }
 0x850   :  { %6074 = vmatpush1.bf16.msra.mxu0 %v8628_v39  ;;  %6106 = vmatpush1.bf16.msra.mxu1 %v8629_v2  ;;  %v8653_v39 = vld [vmem:[#allocation64_spill] sm:$0xff]  ;;  %v8654_v2 = vld [vmem:[#allocation65_spill] sm:$0xff] }
 0x851   :  { %6076 = vmatprep.subr.bf16.mxu0 %v8630_v15  ;;  %6108 = vmatprep.subr.bf16.mxu1 %v8631_v26  ;;  %v8655_v15 = vld [vmem:[#allocation66_spill] sm:$0xff]  ;;  %v8656_v26 = vld [vmem:[#allocation67_spill] sm:$0xff] }
 0x854   :  { %6078 = vmatpush1.bf16.msra.mxu0 %v8632_v23  ;;  %6110 = vmatpush1.bf16.msra.mxu1 %v8633_v9  ;;  %v8657_v23 = vld [vmem:[#allocation68_spill] sm:$0xff]  ;;  %v8658_v9 = vld [vmem:[#allocation69_spill] sm:$0xff] }
 0x855   :  { %6112 = vmatprep.subr.bf16.mxu0 %v8634_v51  ;;  %6144 = vmatprep.subr.bf16.mxu1 %v8635_v38  ;;  %v8659_v51 = vld [vmem:[#allocation70_spill] sm:$0xff]  ;;  %v8660_v38 = vld [vmem:[#allocation71_spill] sm:$0xff] }
 0x857   :  { %4123 = vmatmul.mubr.f32.vlgmr.msra.gmra.mrb[14].mxu0 %v3738_v58  ;;  %4194 = vmatmul.mubr.f32.vlgmr.msra.gmra.mrb[14].mxu1 %v3738_v58  ;;  %v8644_v58 = vld [vmem:[#allocation55_spill] sm:$0xff] }
 0x858   :  { %6114 = vmatpush1.bf16.msra.mxu0 %v8636_v4  ;;  %6146 = vmatpush1.bf16.msra.mxu1 %v8637_v47  ;;  %v8661_v4 = vld [vmem:[#allocation72_spill] sm:$0xff]  ;;  %v8662_v47 = vld [vmem:[#allocation73_spill] sm:$0xff] }
 0x859   :  { %6116 = vmatprep.subr.bf16.mxu0 %v8638_v50  ;;  %6148 = vmatprep.subr.bf16.mxu1 %v8639_v53  ;;  %v8663_v50 = vld [vmem:[#allocation74_spill] sm:$0xff]  ;;  %v8664_v53 = vld [vmem:[#allocation75_spill] sm:$0xff] }
 0x85a   :  { %4292 = vmatprep.mubr.f32.mxu0 %v8247_v8  ;;  %4363 = vmatprep.mubr.f32.mxu1 %v8247_v8 }
 0x85c   :  { %6118 = vmatpush1.bf16.msra.mxu0 %v8640_v56  ;;  %6150 = vmatpush1.bf16.msra.mxu1 %v8641_v6  ;;  %v8665_v56 = vld [vmem:[#allocation76_spill] sm:$0xff]  ;;  %v8666_v6 = vld [vmem:[#allocation77_spill] sm:$0xff] }
 0x85d   :  { %6120 = vmatprep.subr.bf16.mxu0 %v8642_v19  ;;  %6152 = vmatprep.subr.bf16.mxu1 %v8643_v60  ;;  %v8667_v19 = vld [vmem:[#allocation78_spill] sm:$0xff] }
 0x860   :  { %6122 = vmatpush1.bf16.msra.mxu0 %v8644_v58  ;;  %6154 = vmatpush1.bf16.msra.mxu1 %v8645_v63  ;;  %v8668_v63 = vld [vmem:[#allocation112_spill] sm:$0xff] }
 0x861   :  { %6124 = vmatprep.subr.bf16.mxu0 %v8646_v7  ;;  %6156 = vmatprep.subr.bf16.mxu1 %v8647_v16 }
 0x864   :  { %6126 = vmatpush1.bf16.msra.mxu0 %v8648_v43  ;;  %6158 = vmatpush1.bf16.msra.mxu1 %v8649_v10 }
 0x865   :  { %6128 = vmatprep.subr.bf16.mxu0 %v8650_v62  ;;  %6160 = vmatprep.subr.bf16.mxu1 %v8651_v13 }
 0x868   :  { %6130 = vmatpush1.bf16.msra.mxu0 %v8652_v3  ;;  %6162 = vmatpush1.bf16.msra.mxu1 %v8653_v39  ;;  %v8669_v3 = vld [vmem:[#allocation114_spill] sm:$0xff] }
 0x869   :  { %6132 = vmatprep.subr.bf16.mxu0 %v8654_v2  ;;  %6164 = vmatprep.subr.bf16.mxu1 %v8655_v15 }
 0x86c   :  { %6134 = vmatpush1.bf16.msra.mxu0 %v8656_v26  ;;  %6166 = vmatpush1.bf16.msra.mxu1 %v8657_v23 }
 0x86d   :  { %6136 = vmatprep.subr.bf16.mxu0 %v8658_v9  ;;  %6168 = vmatprep.subr.bf16.mxu1 %v8659_v51 }
 0x870   :  { %6138 = vmatpush1.bf16.msra.mxu0 %v8660_v38  ;;  %6170 = vmatpush1.bf16.msra.mxu1 %v8661_v4 }
 0x871   :  { %6140 = vmatprep.subr.bf16.mxu0 %v8662_v47  ;;  %6172 = vmatprep.subr.bf16.mxu1 %v8663_v50 }
 0x874   :  { %6142 = vmatpush1.bf16.msra.mxu0 %v8664_v53  ;;  %6174 = vmatpush1.bf16.msra.mxu1 %v8665_v56 }
 0x875   :  { %6176 = vmatprep.subr.bf16.mxu0 %v8666_v6  ;;  %6208 = vmatprep.subr.bf16.mxu1 %v8667_v19 }
 0x90a   :  { %v3947_v60 = vpop.f32.mrb[28].mxu0  ;;  %v4018_v58 = vpop.f32.mrb[28].mxu1 }
 0x90b   :  { %v4023_v7 = vadd.f32 %v3947_v60, %v8668_v63  ;;  %v3949_v16 = vpop.f32.mrb[29].mxu0  ;;  %v4020_v43 = vpop.f32.mrb[29].mxu1  ;;  %v4025_v39 = vadd.f32 %v4018_v58, %v8669_v3 }
 0x90c   :  { %v4024_v10 = vadd.f32 %v3949_v16, %v8366_v46  ;;  %v4026_v2 = vadd.f32 %v4020_v43, %v8429_v36 }
 0x90d   :  { %v4629_v62 = vmul.f32 -1.442695, %v4023_v7  ;;  %v4631_v15 = vmul.f32 -1.442695, %v4025_v39 }
 0x90e   :  { %v4630_v13 = vmul.f32 -1.442695, %v4024_v10 }
 0x90f   :  { %6550 = vpow2.f32 %v4629_v62 }
 0x910   :  { %6552 = vpow2.f32 %v4630_v13 }
 0x911   :  { %6554 = vtanh.f32 %v4026_v2 }
 0x912   :  { %6556 = vpow2.f32 %v4631_v15 }
 0x919   :  { %v6551_v26 = vpop.eup %6550 }
 0x91a   :  { %v4036_v23 = vadd.f32 1.0, %v6551_v26  ;;  %v6553_v9 = vpop.eup %6552 }
 0x91b   :  { %v4037_v51 = vadd.f32 1.0, %v6553_v9  ;;  %v6555_v38 = vpop.eup %6554 }
 0x91c   :  { %6558 = vrcp.f32 %v4036_v23  ;;  %v6557_v4 = vpop.eup %6556 }
 0x91d   :  { %6560 = vrcp.f32 %v4037_v51  ;;  %v4038_v56 = vadd.f32 1.0, %v6557_v4 }
 0x91f   :  { %6562 = vrcp.f32 %v4038_v56 }
 0x926   :  { %v6559_v47 = vpop.eup %6558 }
 0x927   :  { %v4047_v50 = vmul.f32 %v6559_v47, %v6555_v38  ;;  %v6561_v53 = vpop.eup %6560 }
 0x928   :  { %v4046_v6 = vmul.f32 %v6561_v53, %v7787_v40 }
 0x929   :  { %v6563_v40 = vpop.eup %6562 }
 0x92a   :  { %v4124_v19 = vpop.f32.mrb[14].mxu0  ;;  %v4195_v60 = vpop.f32.mrb[14].mxu1  ;;  %v7905_v58 = vadd.f32 %v4047_v50, %v4046_v6 }
 0x92b   :  { %v6253_v7 = vadd.f32 %v4124_v19, %v8369_v20  ;;  %v4126_v16 = vpop.f32.mrb[15].mxu0  ;;  %v4197_v43 = vpop.f32.mrb[15].mxu1  ;;  %v6269_v39 = vadd.f32 %v4195_v60, %v8310_v12 }
 0x92c   :  { %v6254_v10 = vadd.f32 %v4126_v16, %v8309_v34  ;;  %6564 = vtanh.f32 %v7905_v58  ;;  %v6270_v2 = vadd.f32 %v4197_v43, %v7100_v49 }
 0x92d   :  { %v4632_v62 = vmul.f32 -1.442695, %v6253_v7  ;;  %v4634_v26 = vmul.f32 -1.442695, %v6269_v39 }
 0x92e   :  { %v4633_v13 = vmul.f32 -1.442695, %v6254_v10 }
 0x92f   :  { %6566 = vpow2.f32 %v4632_v62 }
 0x930   :  { %6568 = vpow2.f32 %v4633_v13 }
 0x931   :  { %6570 = vtanh.f32 %v6270_v2 }
 0x932   :  { %6572 = vpow2.f32 %v4634_v26 }
 0x936   :  { %v6565_v15 = vpop.eup %6564 }
 0x937   :  { %v4050_v23 = vmul.f32 %v6565_v15, %v6563_v40 }
 0x939   :  { %v6567_v20 = vpop.eup %6566  ;;  %4293 = vmatmul.mubr.f32.vlgmr.msra.gmra.mrb[30].mxu0 %v4050_v23  ;;  %4364 = vmatmul.mubr.f32.vlgmr.msra.gmra.mrb[30].mxu1 %v4050_v23 }
 0x93a   :  { %v4213_v9 = vadd.f32 1.0, %v6567_v20  ;;  %v6569_v34 = vpop.eup %6568  ;;  %6178 = vmatpush1.bf16.msra.mxu0 %v8311_v61  ;;  %6210 = vmatpush1.bf16.msra.mxu1 %v8312_v30 }
 0x93b   :  { %v4214_v51 = vadd.f32 1.0, %v6569_v34  ;;  %6180 = vmatprep.subr.bf16.mxu0 %v8370_v17  ;;  %6212 = vmatprep.subr.bf16.mxu1 %v8371_v42  ;;  %v6571_v49 = vpop.eup %6570 }
 0x93c   :  { %6574 = vrcp.f32 %v4213_v9  ;;  %4434 = vmatprep.mubr.f32.mxu0 %v8247_v8  ;;  %4505 = vmatprep.mubr.f32.mxu1 %v8247_v8  ;;  %v6573_v12 = vpop.eup %6572 }
 0x93d   :  { %6576 = vrcp.f32 %v4214_v51  ;;  %v4215_v17 = vadd.f32 1.0, %v6573_v12 }
 0x93e   :  { %6182 = vmatpush1.bf16.msra.mxu0 %v8372_v33  ;;  %6214 = vmatpush1.bf16.msra.mxu1 %v8373_v27 }
 0x93f   :  { %6184 = vmatprep.subr.bf16.mxu0 %v8374_v22  ;;  %6216 = vmatprep.subr.bf16.mxu1 %v8430_v18  ;;  %6578 = vrcp.f32 %v4215_v17 }
 0x942   :  { %6186 = vmatpush1.bf16.msra.mxu0 %v8431_v48  ;;  %6218 = vmatpush1.bf16.msra.mxu1 %v8432_v54 }
 0x943   :  { %6188 = vmatprep.subr.bf16.mxu0 %v8433_v29  ;;  %6220 = vmatprep.subr.bf16.mxu1 %v8434_v32 }
 0x946   :  { %v6575_v8 = vpop.eup %6574  ;;  %6190 = vmatpush1.bf16.msra.mxu0 %v8323_v41  ;;  %6222 = vmatpush1.bf16.msra.mxu1 %v8324_v5 }
 0x947   :  { %v4224_v61 = vmul.f32 %v6575_v8, %v6571_v49  ;;  %v6577_v30 = vpop.eup %6576  ;;  %6192 = vmatprep.subr.bf16.mxu0 %v8435_v44  ;;  %6224 = vmatprep.subr.bf16.mxu1 %v8436_v14 }
 0x948   :  { %v4223_v42 = vmul.f32 %v6577_v30, %v7813_v57 }
 0x949   :  { %v6579_v41 = vpop.eup %6578 }
 0x94a   :  { %v4225_v33 = vadd.f32 %v4224_v61, %v4223_v42  ;;  %6194 = vmatpush1.bf16.msra.mxu0 %v8382_v1  ;;  %6226 = vmatpush1.bf16.msra.mxu1 %v8383_v11 }
 0x94b   :  { %6196 = vmatprep.subr.bf16.mxu0 %v8384_v55  ;;  %6228 = vmatprep.subr.bf16.mxu1 %v8385_v37 }
 0x94c   :  { %6580 = vtanh.f32 %v4225_v33  ;;  %4541 = vst [vmem:[#allocation9] sm:$0xff] %v4225_v33 }
 0x94e   :  { %6198 = vmatpush1.bf16.msra.mxu0 %v8386_v52  ;;  %6230 = vmatpush1.bf16.msra.mxu1 %v8387_v24 }
 0x94f   :  { %6200 = vmatprep.subr.bf16.mxu0 %v8388_v28  ;;  %6232 = vmatprep.subr.bf16.mxu1 %v8334_v0 }
 0x952   :  { %6202 = vmatpush1.bf16.msra.mxu0 %v8335_v21  ;;  %6234 = vmatpush1.bf16.msra.mxu1 %v8336_v59 }
 0x953   :  { %6204 = vmatprep.subr.bf16.mxu0 %v8337_v45  ;;  %6236 = vmatprep.subr.bf16.mxu1 %v8338_v35 }
 0x956   :  { %v6581_v5 = vpop.eup %6580  ;;  %6206 = vmatpush1.bf16.msra.mxu0 %v8339_v25  ;;  %6238 = vmatpush1.bf16.msra.mxu1 %v8340_v31 }
 0x957   :  { %v4227_v27 = vmul.f32 %v6581_v5, %v6579_v41 }
 0x959   :  { %4435 = vmatmul.mubr.f32.vlgmr.msra.gmra.mrb[30].mxu0 %v4227_v27  ;;  %4540 = vst [vmem:[#allocation8] sm:$0xff] %v4227_v27  ;;  %4506 = vmatmul.mubr.f32.vlgmr.msra.gmra.mrb[30].mxu1 %v4227_v27 }
 0xa2c   :  { %v4436_v22 = vpop.f32.mrb[30].mxu0  ;;  %v4507_v0 = vpop.f32.mrb[30].mxu1 }
 0xa2d   :  { %v4512_v21 = vadd.f32 %v4436_v22, %v8668_v63  ;;  %v4438_v28 = vpop.f32.mrb[31].mxu0  ;;  %v4509_v59 = vpop.f32.mrb[31].mxu1  ;;  %v4514_v25 = vadd.f32 %v4507_v0, %v8669_v3 }
 0xa2e   :  { %v4513_v45 = vadd.f32 %v4438_v28, %v8366_v46  ;;  %v4515_v31 = vadd.f32 %v4509_v59, %v8429_v36 }
 0xa2f   :  { %v4635_v1 = vmul.f32 -1.442695, %v4512_v21  ;;  %v4637_v11 = vmul.f32 -1.442695, %v4514_v25 }
 0xa30   :  { %v4636_v35 = vmul.f32 -1.442695, %v4513_v45 }
 0xa31   :  { %6582 = vpow2.f32 %v4635_v1 }
 0xa32   :  { %6584 = vpow2.f32 %v4636_v35 }
 0xa33   :  { %6586 = vtanh.f32 %v4515_v31 }
 0xa34   :  { %6588 = vpow2.f32 %v4637_v11 }
 0xa3b   :  { %v6583_v24 = vpop.eup %6582 }
 0xa3c   :  { %v4525_v55 = vadd.f32 1.0, %v6583_v24  ;;  %v6585_v37 = vpop.eup %6584 }
 0xa3d   :  { %v4526_v52 = vadd.f32 1.0, %v6585_v37  ;;  %v6587_v18 = vpop.eup %6586 }
 0xa3e   :  { %6590 = vrcp.f32 %v4525_v55  ;;  %v6589_v48 = vpop.eup %6588 }
 0xa3f   :  { %6592 = vrcp.f32 %v4526_v52  ;;  %v4527_v32 = vadd.f32 1.0, %v6589_v48 }
 0xa41   :  { %6594 = vrcp.f32 %v4527_v32 }
 0xa48   :  { %v6591_v46 = vpop.eup %6590 }
 0xa49   :  { %v4536_v54 = vmul.f32 %v6591_v46, %v6587_v18  ;;  %v6593_v29 = vpop.eup %6592 }
 0xa4a   :  { %v4535_v44 = vmul.f32 %v6593_v29, %v7905_v58 }
 0xa4c   :  { %v4537_v36 = vadd.f32 %v4536_v54, %v4535_v44 }
 0xa4e   :  { %6596 = vtanh.f32 %v4537_v36  ;;  %4543 = vst [vmem:[#allocation9 + $0x8] sm:$0xff] %v4537_v36 }
 0xa4f   :  { %6653 = shalt.err (!%p6650_p6)
}
 0xa50   :  { %s6654_s24 = scalar_lea.hbm %s7985_s5, 256 }
 0xa51   :  { %p6655_p7 = scmp.ne.s32.totalorder %s7985_s5, %s6654_s24  ;;  %p6658_p8 = scmp.lt.u32.totalorder %s6654_s24, %s7985_s5 }
 0xa53   :  { %p6660_p9 = pnand %p6658_p8, %p6655_p7 }
 0xa55   :  { %6663 = shalt.err (!%p6660_p9)
}
 0xa56   :  { %4567 = dma.vmem_to_hbm [thread:$0]  %s4562_s20, 256, %s7985_s5, [#allocation10], %s6695_s28, %s6695_s28, %s6696_s29   ;;  %v6595_v14 = vpop.eup %6594 }
 0xa57   :  { %s6700_s8 = smov [#allocation8]  }
 0xa58   :  { %s4549_s9 = sshll.u32 %s6700_s8, 4  ;;  %v6597_v57 = vpop.eup %6596  ;;  %s4550_s9 = int_to_ptr.vmem [resolvable:$true] %s4549_s9 }
 0xa59   :  { %v4539_v63 = vmul.f32 %v6597_v57, %v6595_v14  ;;  %s6664_s10 = scalar_lea.vmem %s4550_s9, 256  ;;  %p6669_p11 = scmp.lt.s32.totalorder %s4550_s9, %s4550_s9 }
 0xa5a   :  { %p6665_p10 = scmp.ne.s32.totalorder %s4550_s9, %s6664_s10  ;;  %p6670_p12 = scmp.lt.s32.totalorder %s6664_s10, %s6664_s10 }
 0xa5b   :  { %4542 = vst [vmem:[#allocation8 + $0x8] sm:$0xff] %v4539_v63 }
 0xa5c   :  { %p6671_p13 = por %p6670_p12, %p6669_p11 }
 0xa5e   :  { %p6672_p0 = pnand %p6671_p13, %p6665_p10 }
 0xa60   :  { %6675 = shalt.err (!%p6672_p0)
}
 0xa61   :  { %s6676_s13 = scalar_lea.hbm %s7984_s4, 256 }
 0xa62   :  { %p6677_p1 = scmp.ne.s32.totalorder %s7984_s4, %s6676_s13  ;;  %p6680_p2 = scmp.lt.u32.totalorder %s6676_s13, %s7984_s4 }
 0xa64   :  { %p6682_p3 = pnand %p6680_p2, %p6677_p1 }
 0xa66   :  { %6685 = shalt.err (!%p6682_p3)
}
 0xa67   :  { %4555 = dma.vmem_to_hbm [thread:$0]  %s4550_s9, 256, %s7984_s4, [#allocation7], %s6695_s28, %s6695_s28, %s6696_s29  }
 0xa68   :  { %6690 = dma.done.wait [#allocation7], 256  }
 0xa69   :  { %6691 = vsyncadd [#allocation7], 4294967040 }
 0xa6a   :  { %6692 = dma.done.wait [#allocation10], 256  }
 0xa6b   :  { %6693 = vsyncadd [#allocation10], 4294967040 }
 0xa6c   :  { %4574 = vsyncpa [#allocation6], 1 }
 0xa6d   :  { %4575 = vsyncpa [#allocation7], 1 }
 0xa6e   :  { %4576 = vsyncpa [#allocation10], 1 }
 0xa6f   :  { %4577 = vsyncmov [#allocation4] }
 0xa72   :  { %s4578_s1 = vpop.sfrf %4577 }
 0xa73   :  { %p4638_p4 = scmp.ne.s32.totalorder %s4578_s1, 0 }
 0xa75   :  { %4582 = shalt.err (%p4638_p4)  }

</bundles_post_ra>
